<compile_context>
chip_gen: v6e
topology: v6e:2x2x1
jax: 0.10.0
libtpu: 0.0.40
codegen_flags: <defaults>
</compile_context>

<pallas_src>
import jax
import jax.numpy as jnp
from jax import lax
from jax.experimental import pallas as pl
from jax.experimental.pallas import tpu as pltpu

INPUT_SIZE = 8
HIDDEN_SIZE = 4            # forced by out.view(seq_len * batch * 4)
BATCH = 8
SEQ_LEN = 16
NUM_LAYERS = 2
NEG_SLOPE = 0.01           # torch.nn.LeakyReLU default negative_slope

H = HIDDEN_SIZE


def make_gru_nilm_kernel(seq_len, batch, hidden):
    """Factory so S/B/H are static Python ints inside the kernel (no shape-derived
    magic that silently breaks if HIDDEN_SIZE changes)."""
    S, B, Hh = seq_len, batch, hidden

    def kernel(x_ref, wih0_ref, wsm_ref, b_ref, w2_ref, b2_ref, o_ref,
               gi0_sc, gi1_sc, h0_sc, m_sc):
        # x_ref   : (S*B, I)   inputs, flattened over (seq, batch) in the wrapper
        # wih0_ref: (I, 3H)    layer-0 input weights, gates packed [r | z | n]
        # wsm_ref : (3, H, 3H) [whh0 | wih1 | whh1], gates packed [r | z | n]
        # b_ref   : (4, 3H)    [bih0 ; bhh0 ; bih1 ; bhh1]
        # w2_ref  : (H, S*B, O) final Linear weight, w2[h, r, o] = W_lin[o, r*H + h]
        # b2_ref  : (1, O)
        # o_ref   : (1, O)
        # scratches: gi0_sc/gi1_sc (S*B, 3H), h0_sc/m_sc (S*B, H)
        bi0 = b_ref[0:1, :]
        bh0 = b_ref[1:2, :]
        bi1 = b_ref[2:3, :]
        bh1 = b_ref[3:4, :]
        whh0 = wsm_ref[0]
        wih1 = wsm_ref[1]
        whh1 = wsm_ref[2]

        # Hoisted layer-0 input projection: no serial dependence, one MXU matmul.
        gi0_sc[...] = jnp.dot(x_ref[...], wih0_ref[...],
                              preferred_element_type=jnp.float32) + bi0

        def gru_update(gi, gh, h):
            r = jax.nn.sigmoid(gi[:, 0:Hh] + gh[:, 0:Hh])
            z = jax.nn.sigmoid(gi[:, Hh:2 * Hh] + gh[:, Hh:2 * Hh])
            n = jnp.tanh(gi[:, 2 * Hh:3 * Hh] + r * gh[:, 2 * Hh:3 * Hh])
            return n + z * (h - n)                       # == (1-z)*n + z*h

        def make_body(gi_ref, out_sc, whh, bh):
            def body(t, h):
                row = pl.multiple_of(t * B, B)           # B=8 -> sublane aligned
                gi = gi_ref[pl.ds(row, B), :]
                gh = jnp.dot(h, whh, preferred_element_type=jnp.float32) + bh
                h_new = gru_update(gi, gh, h)
                out_sc[pl.ds(row, B), :] = h_new         # off the serial chain
                return h_new
            return body

        h_init = jnp.zeros((B, Hh), jnp.float32)

        # Layer-0 recurrence: exactly one small matmul per serial step.
        lax.fori_loop(0, S, make_body(gi0_sc, h0_sc, whh0, bh0), h_init,
                      unroll=True)

        # Hoisted layer-1 input projection over all layer-0 outputs: one matmul.
        gi1_sc[...] = jnp.dot(h0_sc[...], wih1,
                              preferred_element_type=jnp.float32) + bi1

        # Layer-1 recurrence: one small matmul per serial step.
        lax.fori_loop(0, S, make_body(gi1_sc, m_sc, whh1, bh1), h_init,
                      unroll=True)

        # Output Linear + LeakyReLU.
        #   flat[r*H + h] = M[r, h],   y[o] = b2[o] + sum_{r,h} M[r,h] * w2[h, r, o]
        # Accumulate T on the VPU, then ONE cross-sublane reduce.
        M = m_sc[...]                                    # (S*B, H), row r = t*B + b
        T = M[:, 0:1] * w2_ref[0]
        for h in range(1, Hh):
            T = T + M[:, h:h + 1] * w2_ref[h]            # (S*B, O)
        y = b2_ref[...] + jnp.sum(T, axis=0, keepdims=True)   # (1, O)
        o_ref[...] = jnp.where(y >= 0.0, y, NEG_SLOPE * y).astype(o_ref.dtype)

    return kernel


def _cat_gates(w):      # (3, D, H) -> (D, 3H), gate order [r | z | n]
    return jnp.concatenate([w[0], w[1], w[2]], axis=1)


def _cat_bias(b):       # (3, 1, H) -> (1, 3H)
    return jnp.concatenate([b[0], b[1], b[2]], axis=1)


def gru_nilm_forward(x, params):
    S, B, I = x.shape
    O = B * 4

    # All weight packing below is trace-time XLA glue (tiny, outside the kernel).
    x2d = x.reshape(S * B, I)                                         # (S*B, I)
    wih0 = _cat_gates(params["wih0"])                                 # (I, 3H)
    w_small = jnp.stack([_cat_gates(params["whh0"]),
                         _cat_gates(params["wih1"]),
                         _cat_gates(params["whh1"])], axis=0)         # (3, H, 3H)
    b_all = jnp.concatenate([_cat_bias(params["bih0"]),
                             _cat_bias(params["bhh0"]),
                             _cat_bias(params["bih1"]),
                             _cat_bias(params["bhh1"])], axis=0)      # (4, 3H)
    # w2[h, r, o] = W_lin[o, r*H + h]  (matches torch's row-major .view flatten)
    w2 = params["w_lin"].reshape(O, S * B, H).transpose(2, 1, 0)      # (H, S*B, O)
    b2 = params["b_lin"].reshape(1, O)

    vmem = pl.BlockSpec(memory_space=pltpu.MemorySpace.VMEM)

    y = pl.pallas_call(
        make_gru_nilm_kernel(S, B, H),
        out_shape=jax.ShapeDtypeStruct((1, O), jnp.float32),
        in_specs=[vmem] * 6,
        out_specs=vmem,
        scratch_shapes=[pltpu.VMEM((S * B, 3 * H), jnp.float32),   # gi0_all
                        pltpu.VMEM((S * B, 3 * H), jnp.float32),   # gi1_all
                        pltpu.VMEM((S * B, H), jnp.float32),       # layer-0 outputs
                        pltpu.VMEM((S * B, H), jnp.float32)],      # layer-1 outputs (M)
    )(x2d, wih0, w_small, b_all, w2, b2)

    return y.reshape(-1, 4)                  # torch's `out.view(-1, 4)` -> (batch, 4)


def reference_forward(x, params):
    """Pure-JAX reference mirroring PyTorch GRU + Linear + LeakyReLU."""
    S, B, _ = x.shape

    def cell(x_t, h, wih, whh, bih, bhh):
        gi = [x_t @ wih[g] + bih[g] for g in range(3)]
        gh = [h @ whh[g] + bhh[g] for g in range(3)]
        r = jax.nn.sigmoid(gi[0] + gh[0])
        z = jax.nn.sigmoid(gi[1] + gh[1])
        n = jnp.tanh(gi[2] + r * gh[2])
        return (1.0 - z) * n + z * h

    h0 = jnp.zeros((B, H), jnp.float32)
    h1 = jnp.zeros((B, H), jnp.float32)
    outs = []
    for t in range(S):
        h0 = cell(x[t], h0, params["wih0"], params["whh0"], params["bih0"], params["bhh0"])
        h1 = cell(h0, h1, params["wih1"], params["whh1"], params["bih1"], params["bhh1"])
        outs.append(h1)
    out = jnp.stack(outs, axis=0)                      # (S, B, H)
    flat = out.reshape(-1)
    y = params["w_lin"] @ flat + params["b_lin"]
    y = jnp.where(y >= 0.0, y, NEG_SLOPE * y)
    return y.reshape(-1, 4)


def init_params(key):
    ks = jax.random.split(key, 10)
    kh = HIDDEN_SIZE ** -0.5                           # PyTorch GRU init bound
    Fin = SEQ_LEN * BATCH * 4
    O = BATCH * 4
    kl = Fin ** -0.5                                   # PyTorch Linear init bound

    def u(k, shape, bound):
        return jax.random.uniform(k, shape, jnp.float32, -bound, bound)

    return dict(
        wih0=u(ks[0], (3, INPUT_SIZE, HIDDEN_SIZE), kh),
        whh0=u(ks[1], (3, HIDDEN_SIZE, HIDDEN_SIZE), kh),
        bih0=u(ks[2], (3, 1, HIDDEN_SIZE), kh),
        bhh0=u(ks[3], (3, 1, HIDDEN_SIZE), kh),
        wih1=u(ks[4], (3, HIDDEN_SIZE, HIDDEN_SIZE), kh),
        whh1=u(ks[5], (3, HIDDEN_SIZE, HIDDEN_SIZE), kh),
        bih1=u(ks[6], (3, 1, HIDDEN_SIZE), kh),
        bhh1=u(ks[7], (3, 1, HIDDEN_SIZE), kh),
        w_lin=u(ks[8], (O, Fin), kl),
        b_lin=u(ks[9], (O,), kl),
    )


if __name__ == "__main__":
    key = jax.random.PRNGKey(0)
    kp, kx = jax.random.split(key)
    params = init_params(kp)
    x = jax.random.normal(kx, (SEQ_LEN, BATCH, INPUT_SIZE), jnp.float32)

    out = jax.jit(gru_nilm_forward)(x, params)
    out = jax.block_until_ready(out)
    assert out.shape == (BATCH, 4), out.shape

    ref = reference_forward(x, params)
    assert jnp.allclose(out, ref, atol=1e-3, rtol=1e-3), (out, ref)

    print("KERNEL_OK")
</pallas_src>

<mosaic_0001>
module attributes {stable_mosaic.version = 11 : i64} {
  func.func @kernel(%arg0: memref<128x8xf32, #tpu.memory_space<vmem>>, %arg1: memref<8x12xf32, #tpu.memory_space<vmem>>, %arg2: memref<3x4x12xf32, #tpu.memory_space<vmem>>, %arg3: memref<4x12xf32, #tpu.memory_space<vmem>>, %arg4: memref<4x128x32xf32, #tpu.memory_space<vmem>>, %arg5: memref<1x32xf32, #tpu.memory_space<vmem>>, %arg6: memref<1x32xf32, #tpu.memory_space<vmem>>, %arg7: memref<128x12xf32, #tpu.memory_space<vmem>>, %arg8: memref<128x12xf32, #tpu.memory_space<vmem>>, %arg9: memref<128x4xf32, #tpu.memory_space<vmem>>, %arg10: memref<128x4xf32, #tpu.memory_space<vmem>>) attributes {dimension_semantics = [], scalar_prefetch = 0 : i64, scratch_operands = 4 : i64, tpu.core_type = #tpu.core_type<tc>} {
    %c0 = arith.constant 0 : index
    %c0_0 = arith.constant 0 : index
    %0 = vector.load %arg3[%c0, %c0_0] : memref<4x12xf32, #tpu.memory_space<vmem>>, vector<1x12xf32>
    %c1 = arith.constant 1 : index
    %c0_1 = arith.constant 0 : index
    %1 = vector.load %arg3[%c1, %c0_1] : memref<4x12xf32, #tpu.memory_space<vmem>>, vector<1x12xf32>
    %c2 = arith.constant 2 : index
    %c0_2 = arith.constant 0 : index
    %2 = vector.load %arg3[%c2, %c0_2] : memref<4x12xf32, #tpu.memory_space<vmem>>, vector<1x12xf32>
    %c3 = arith.constant 3 : index
    %c0_3 = arith.constant 0 : index
    %3 = vector.load %arg3[%c3, %c0_3] : memref<4x12xf32, #tpu.memory_space<vmem>>, vector<1x12xf32>
    %c0_4 = arith.constant 0 : index
    %c0_5 = arith.constant 0 : index
    %c0_6 = arith.constant 0 : index
    %4 = vector.load %arg2[%c0_4, %c0_5, %c0_6] : memref<3x4x12xf32, #tpu.memory_space<vmem>>, vector<1x4x12xf32>
    %5 = vector.shape_cast %4 : vector<1x4x12xf32> to vector<4x12xf32>
    %c1_7 = arith.constant 1 : index
    %c0_8 = arith.constant 0 : index
    %c0_9 = arith.constant 0 : index
    %6 = vector.load %arg2[%c1_7, %c0_8, %c0_9] : memref<3x4x12xf32, #tpu.memory_space<vmem>>, vector<1x4x12xf32>
    %7 = vector.shape_cast %6 : vector<1x4x12xf32> to vector<4x12xf32>
    %c2_10 = arith.constant 2 : index
    %c0_11 = arith.constant 0 : index
    %c0_12 = arith.constant 0 : index
    %8 = vector.load %arg2[%c2_10, %c0_11, %c0_12] : memref<3x4x12xf32, #tpu.memory_space<vmem>>, vector<1x4x12xf32>
    %9 = vector.shape_cast %8 : vector<1x4x12xf32> to vector<4x12xf32>
    %c0_13 = arith.constant 0 : index
    %c0_14 = arith.constant 0 : index
    %10 = vector.load %arg0[%c0_13, %c0_14] : memref<128x8xf32, #tpu.memory_space<vmem>>, vector<128x8xf32>
    %c0_15 = arith.constant 0 : index
    %c0_16 = arith.constant 0 : index
    %11 = vector.load %arg1[%c0_15, %c0_16] : memref<8x12xf32, #tpu.memory_space<vmem>>, vector<8x12xf32>
    %cst = arith.constant dense<0.000000e+00> : vector<128x12xf32>
    %12 = tpu.matmul %10, %11, %cst {dimension_numbers = #tpu.dot_dimension_numbers<[1], [0], [0], [1], [0, 0, 1, 1], [], []>} : vector<128x8xf32>, vector<8x12xf32>, vector<128x12xf32> -> vector<128x12xf32>
    %13 = vector.broadcast %0 : vector<1x12xf32> to vector<128x12xf32>
    %14 = arith.addf %12, %13 : vector<128x12xf32>
    %c0_17 = arith.constant 0 : index
    %c0_18 = arith.constant 0 : index
    %15 = vector.load %arg7[%c0_17, %c0_18] : memref<128x12xf32, #tpu.memory_space<vmem>>, vector<128x12xf32>
    tpu.vector_store %arg7[%c0_17, %c0_18], %14 {strides = array<i32>} : memref<128x12xf32, #tpu.memory_space<vmem>>, vector<128x12xf32>,
    %cst_19 = arith.constant 0.000000e+00 : f32
    %16 = vector.broadcast %cst_19 : f32 to vector<8x4xf32>
    %c0_i32 = arith.constant 0 : i32
    %c8_i32 = arith.constant 8 : i32
    %17 = arith.muli %c0_i32, %c8_i32 : i32
    %18 = tpu.assume_multiple %17, 8 : i32
    %19 = arith.index_cast %18 : i32 to index
    %c0_20 = arith.constant 0 : index
    %20 = vector.load %arg7[%19, %c0_20] : memref<128x12xf32, #tpu.memory_space<vmem>>, vector<8x12xf32>
    %cst_21 = arith.constant dense<0.000000e+00> : vector<8x12xf32>
    %21 = tpu.matmul %16, %5, %cst_21 {dimension_numbers = #tpu.dot_dimension_numbers<[1], [0], [0], [1], [0, 0, 1, 1], [], []>} : vector<8x4xf32>, vector<4x12xf32>, vector<8x12xf32> -> vector<8x12xf32>
    %22 = vector.broadcast %1 : vector<1x12xf32> to vector<8x12xf32>
    %23 = arith.addf %21, %22 : vector<8x12xf32>
    %24 = vector.extract_strided_slice %20 {offsets = [0, 0], sizes = [8, 4], strides = [1, 1]} : vector<8x12xf32> to vector<8x4xf32>
    %25 = vector.extract_strided_slice %23 {offsets = [0, 0], sizes = [8, 4], strides = [1, 1]} : vector<8x12xf32> to vector<8x4xf32>
    %26 = arith.addf %24, %25 : vector<8x4xf32>
    %27 = arith.negf %26 : vector<8x4xf32>
    %28 = math.exp %27 : vector<8x4xf32>
    %cst_22 = arith.constant 1.000000e+00 : f32
    %29 = vector.broadcast %cst_22 : f32 to vector<8x4xf32>
    %30 = arith.addf %29, %28 : vector<8x4xf32>
    %31 = arith.divf %29, %30 : vector<8x4xf32>
    %32 = vector.extract_strided_slice %20 {offsets = [0, 4], sizes = [8, 4], strides = [1, 1]} : vector<8x12xf32> to vector<8x4xf32>
    %33 = vector.extract_strided_slice %23 {offsets = [0, 4], sizes = [8, 4], strides = [1, 1]} : vector<8x12xf32> to vector<8x4xf32>
    %34 = arith.addf %32, %33 : vector<8x4xf32>
    %35 = arith.negf %34 : vector<8x4xf32>
    %36 = math.exp %35 : vector<8x4xf32>
    %cst_23 = arith.constant 1.000000e+00 : f32
    %37 = vector.broadcast %cst_23 : f32 to vector<8x4xf32>
    %38 = arith.addf %37, %36 : vector<8x4xf32>
    %39 = arith.divf %37, %38 : vector<8x4xf32>
    %40 = vector.extract_strided_slice %20 {offsets = [0, 8], sizes = [8, 4], strides = [1, 1]} : vector<8x12xf32> to vector<8x4xf32>
    %41 = vector.extract_strided_slice %23 {offsets = [0, 8], sizes = [8, 4], strides = [1, 1]} : vector<8x12xf32> to vector<8x4xf32>
    %42 = arith.mulf %31, %41 : vector<8x4xf32>
    %43 = arith.addf %40, %42 : vector<8x4xf32>
    %44 = math.tanh %43 : vector<8x4xf32>
    %45 = arith.subf %16, %44 : vector<8x4xf32>
    %46 = arith.mulf %39, %45 : vector<8x4xf32>
    %47 = arith.addf %44, %46 : vector<8x4xf32>
    %48 = arith.index_cast %18 : i32 to index
    %c0_24 = arith.constant 0 : index
    %49 = vector.load %arg9[%48, %c0_24] : memref<128x4xf32, #tpu.memory_space<vmem>>, vector<8x4xf32>
    tpu.vector_store %arg9[%48, %c0_24], %47 {strides = array<i32>} : memref<128x4xf32, #tpu.memory_space<vmem>>, vector<8x4xf32>,
    %c1_i32 = arith.constant 1 : i32
    %c8_i32_25 = arith.constant 8 : i32
    %50 = arith.muli %c1_i32, %c8_i32_25 : i32
    %51 = tpu.assume_multiple %50, 8 : i32
    %52 = arith.index_cast %51 : i32 to index
    %c0_26 = arith.constant 0 : index
    %53 = vector.load %arg7[%52, %c0_26] : memref<128x12xf32, #tpu.memory_space<vmem>>, vector<8x12xf32>
    %cst_27 = arith.constant dense<0.000000e+00> : vector<8x12xf32>
    %54 = tpu.matmul %47, %5, %cst_27 {dimension_numbers = #tpu.dot_dimension_numbers<[1], [0], [0], [1], [0, 0, 1, 1], [], []>} : vector<8x4xf32>, vector<4x12xf32>, vector<8x12xf32> -> vector<8x12xf32>
    %55 = vector.broadcast %1 : vector<1x12xf32> to vector<8x12xf32>
    %56 = arith.addf %54, %55 : vector<8x12xf32>
    %57 = vector.extract_strided_slice %53 {offsets = [0, 0], sizes = [8, 4], strides = [1, 1]} : vector<8x12xf32> to vector<8x4xf32>
    %58 = vector.extract_strided_slice %56 {offsets = [0, 0], sizes = [8, 4], strides = [1, 1]} : vector<8x12xf32> to vector<8x4xf32>
    %59 = arith.addf %57, %58 : vector<8x4xf32>
    %60 = arith.negf %59 : vector<8x4xf32>
    %61 = math.exp %60 : vector<8x4xf32>
    %cst_28 = arith.constant 1.000000e+00 : f32
    %62 = vector.broadcast %cst_28 : f32 to vector<8x4xf32>
    %63 = arith.addf %62, %61 : vector<8x4xf32>
    %64 = arith.divf %62, %63 : vector<8x4xf32>
    %65 = vector.extract_strided_slice %53 {offsets = [0, 4], sizes = [8, 4], strides = [1, 1]} : vector<8x12xf32> to vector<8x4xf32>
    %66 = vector.extract_strided_slice %56 {offsets = [0, 4], sizes = [8, 4], strides = [1, 1]} : vector<8x12xf32> to vector<8x4xf32>
    %67 = arith.addf %65, %66 : vector<8x4xf32>
    %68 = arith.negf %67 : vector<8x4xf32>
    %69 = math.exp %68 : vector<8x4xf32>
    %cst_29 = arith.constant 1.000000e+00 : f32
    %70 = vector.broadcast %cst_29 : f32 to vector<8x4xf32>
    %71 = arith.addf %70, %69 : vector<8x4xf32>
    %72 = arith.divf %70, %71 : vector<8x4xf32>
    %73 = vector.extract_strided_slice %53 {offsets = [0, 8], sizes = [8, 4], strides = [1, 1]} : vector<8x12xf32> to vector<8x4xf32>
    %74 = vector.extract_strided_slice %56 {offsets = [0, 8], sizes = [8, 4], strides = [1, 1]} : vector<8x12xf32> to vector<8x4xf32>
    %75 = arith.mulf %64, %74 : vector<8x4xf32>
    %76 = arith.addf %73, %75 : vector<8x4xf32>
    %77 = math.tanh %76 : vector<8x4xf32>
    %78 = arith.subf %47, %77 : vector<8x4xf32>
    %79 = arith.mulf %72, %78 : vector<8x4xf32>
    %80 = arith.addf %77, %79 : vector<8x4xf32>
    %81 = arith.index_cast %51 : i32 to index
    %c0_30 = arith.constant 0 : index
    %82 = vector.load %arg9[%81, %c0_30] : memref<128x4xf32, #tpu.memory_space<vmem>>, vector<8x4xf32>
    tpu.vector_store %arg9[%81, %c0_30], %80 {strides = array<i32>} : memref<128x4xf32, #tpu.memory_space<vmem>>, vector<8x4xf32>,
    %c2_i32 = arith.constant 2 : i32
    %c8_i32_31 = arith.constant 8 : i32
    %83 = arith.muli %c2_i32, %c8_i32_31 : i32
    %84 = tpu.assume_multiple %83, 8 : i32
    %85 = arith.index_cast %84 : i32 to index
    %c0_32 = arith.constant 0 : index
    %86 = vector.load %arg7[%85, %c0_32] : memref<128x12xf32, #tpu.memory_space<vmem>>, vector<8x12xf32>
    %cst_33 = arith.constant dense<0.000000e+00> : vector<8x12xf32>
    %87 = tpu.matmul %80, %5, %cst_33 {dimension_numbers = #tpu.dot_dimension_numbers<[1], [0], [0], [1], [0, 0, 1, 1], [], []>} : vector<8x4xf32>, vector<4x12xf32>, vector<8x12xf32> -> vector<8x12xf32>
    %88 = vector.broadcast %1 : vector<1x12xf32> to vector<8x12xf32>
    %89 = arith.addf %87, %88 : vector<8x12xf32>
    %90 = vector.extract_strided_slice %86 {offsets = [0, 0], sizes = [8, 4], strides = [1, 1]} : vector<8x12xf32> to vector<8x4xf32>
    %91 = vector.extract_strided_slice %89 {offsets = [0, 0], sizes = [8, 4], strides = [1, 1]} : vector<8x12xf32> to vector<8x4xf32>
    %92 = arith.addf %90, %91 : vector<8x4xf32>
    %93 = arith.negf %92 : vector<8x4xf32>
    %94 = math.exp %93 : vector<8x4xf32>
    %cst_34 = arith.constant 1.000000e+00 : f32
    %95 = vector.broadcast %cst_34 : f32 to vector<8x4xf32>
    %96 = arith.addf %95, %94 : vector<8x4xf32>
    %97 = arith.divf %95, %96 : vector<8x4xf32>
    %98 = vector.extract_strided_slice %86 {offsets = [0, 4], sizes = [8, 4], strides = [1, 1]} : vector<8x12xf32> to vector<8x4xf32>
    %99 = vector.extract_strided_slice %89 {offsets = [0, 4], sizes = [8, 4], strides = [1, 1]} : vector<8x12xf32> to vector<8x4xf32>
    %100 = arith.addf %98, %99 : vector<8x4xf32>
    %101 = arith.negf %100 : vector<8x4xf32>
    %102 = math.exp %101 : vector<8x4xf32>
    %cst_35 = arith.constant 1.000000e+00 : f32
    %103 = vector.broadcast %cst_35 : f32 to vector<8x4xf32>
    %104 = arith.addf %103, %102 : vector<8x4xf32>
    %105 = arith.divf %103, %104 : vector<8x4xf32>
    %106 = vector.extract_strided_slice %86 {offsets = [0, 8], sizes = [8, 4], strides = [1, 1]} : vector<8x12xf32> to vector<8x4xf32>
    %107 = vector.extract_strided_slice %89 {offsets = [0, 8], sizes = [8, 4], strides = [1, 1]} : vector<8x12xf32> to vector<8x4xf32>
    %108 = arith.mulf %97, %107 : vector<8x4xf32>
    %109 = arith.addf %106, %108 : vector<8x4xf32>
    %110 = math.tanh %109 : vector<8x4xf32>
    %111 = arith.subf %80, %110 : vector<8x4xf32>
    %112 = arith.mulf %105, %111 : vector<8x4xf32>
    %113 = arith.addf %110, %112 : vector<8x4xf32>
    %114 = arith.index_cast %84 : i32 to index
    %c0_36 = arith.constant 0 : index
    %115 = vector.load %arg9[%114, %c0_36] : memref<128x4xf32, #tpu.memory_space<vmem>>, vector<8x4xf32>
    tpu.vector_store %arg9[%114, %c0_36], %113 {strides = array<i32>} : memref<128x4xf32, #tpu.memory_space<vmem>>, vector<8x4xf32>,
    %c3_i32 = arith.constant 3 : i32
    %c8_i32_37 = arith.constant 8 : i32
    %116 = arith.muli %c3_i32, %c8_i32_37 : i32
    %117 = tpu.assume_multiple %116, 8 : i32
    %118 = arith.index_cast %117 : i32 to index
    %c0_38 = arith.constant 0 : index
    %119 = vector.load %arg7[%118, %c0_38] : memref<128x12xf32, #tpu.memory_space<vmem>>, vector<8x12xf32>
    %cst_39 = arith.constant dense<0.000000e+00> : vector<8x12xf32>
    %120 = tpu.matmul %113, %5, %cst_39 {dimension_numbers = #tpu.dot_dimension_numbers<[1], [0], [0], [1], [0, 0, 1, 1], [], []>} : vector<8x4xf32>, vector<4x12xf32>, vector<8x12xf32> -> vector<8x12xf32>
    %121 = vector.broadcast %1 : vector<1x12xf32> to vector<8x12xf32>
    %122 = arith.addf %120, %121 : vector<8x12xf32>
    %123 = vector.extract_strided_slice %119 {offsets = [0, 0], sizes = [8, 4], strides = [1, 1]} : vector<8x12xf32> to vector<8x4xf32>
    %124 = vector.extract_strided_slice %122 {offsets = [0, 0], sizes = [8, 4], strides = [1, 1]} : vector<8x12xf32> to vector<8x4xf32>
    %125 = arith.addf %123, %124 : vector<8x4xf32>
    %126 = arith.negf %125 : vector<8x4xf32>
    %127 = math.exp %126 : vector<8x4xf32>
    %cst_40 = arith.constant 1.000000e+00 : f32
    %128 = vector.broadcast %cst_40 : f32 to vector<8x4xf32>
    %129 = arith.addf %128, %127 : vector<8x4xf32>
    %130 = arith.divf %128, %129 : vector<8x4xf32>
    %131 = vector.extract_strided_slice %119 {offsets = [0, 4], sizes = [8, 4], strides = [1, 1]} : vector<8x12xf32> to vector<8x4xf32>
    %132 = vector.extract_strided_slice %122 {offsets = [0, 4], sizes = [8, 4], strides = [1, 1]} : vector<8x12xf32> to vector<8x4xf32>
    %133 = arith.addf %131, %132 : vector<8x4xf32>
    %134 = arith.negf %133 : vector<8x4xf32>
    %135 = math.exp %134 : vector<8x4xf32>
    %cst_41 = arith.constant 1.000000e+00 : f32
    %136 = vector.broadcast %cst_41 : f32 to vector<8x4xf32>
    %137 = arith.addf %136, %135 : vector<8x4xf32>
    %138 = arith.divf %136, %137 : vector<8x4xf32>
    %139 = vector.extract_strided_slice %119 {offsets = [0, 8], sizes = [8, 4], strides = [1, 1]} : vector<8x12xf32> to vector<8x4xf32>
    %140 = vector.extract_strided_slice %122 {offsets = [0, 8], sizes = [8, 4], strides = [1, 1]} : vector<8x12xf32> to vector<8x4xf32>
    %141 = arith.mulf %130, %140 : vector<8x4xf32>
    %142 = arith.addf %139, %141 : vector<8x4xf32>
    %143 = math.tanh %142 : vector<8x4xf32>
    %144 = arith.subf %113, %143 : vector<8x4xf32>
    %145 = arith.mulf %138, %144 : vector<8x4xf32>
    %146 = arith.addf %143, %145 : vector<8x4xf32>
    %147 = arith.index_cast %117 : i32 to index
    %c0_42 = arith.constant 0 : index
    %148 = vector.load %arg9[%147, %c0_42] : memref<128x4xf32, #tpu.memory_space<vmem>>, vector<8x4xf32>
    tpu.vector_store %arg9[%147, %c0_42], %146 {strides = array<i32>} : memref<128x4xf32, #tpu.memory_space<vmem>>, vector<8x4xf32>,
    %c4_i32 = arith.constant 4 : i32
    %c8_i32_43 = arith.constant 8 : i32
    %149 = arith.muli %c4_i32, %c8_i32_43 : i32
    %150 = tpu.assume_multiple %149, 8 : i32
    %151 = arith.index_cast %150 : i32 to index
    %c0_44 = arith.constant 0 : index
    %152 = vector.load %arg7[%151, %c0_44] : memref<128x12xf32, #tpu.memory_space<vmem>>, vector<8x12xf32>
    %cst_45 = arith.constant dense<0.000000e+00> : vector<8x12xf32>
    %153 = tpu.matmul %146, %5, %cst_45 {dimension_numbers = #tpu.dot_dimension_numbers<[1], [0], [0], [1], [0, 0, 1, 1], [], []>} : vector<8x4xf32>, vector<4x12xf32>, vector<8x12xf32> -> vector<8x12xf32>
    %154 = vector.broadcast %1 : vector<1x12xf32> to vector<8x12xf32>
    %155 = arith.addf %153, %154 : vector<8x12xf32>
    %156 = vector.extract_strided_slice %152 {offsets = [0, 0], sizes = [8, 4], strides = [1, 1]} : vector<8x12xf32> to vector<8x4xf32>
    %157 = vector.extract_strided_slice %155 {offsets = [0, 0], sizes = [8, 4], strides = [1, 1]} : vector<8x12xf32> to vector<8x4xf32>
    %158 = arith.addf %156, %157 : vector<8x4xf32>
    %159 = arith.negf %158 : vector<8x4xf32>
    %160 = math.exp %159 : vector<8x4xf32>
    %cst_46 = arith.constant 1.000000e+00 : f32
    %161 = vector.broadcast %cst_46 : f32 to vector<8x4xf32>
    %162 = arith.addf %161, %160 : vector<8x4xf32>
    %163 = arith.divf %161, %162 : vector<8x4xf32>
    %164 = vector.extract_strided_slice %152 {offsets = [0, 4], sizes = [8, 4], strides = [1, 1]} : vector<8x12xf32> to vector<8x4xf32>
    %165 = vector.extract_strided_slice %155 {offsets = [0, 4], sizes = [8, 4], strides = [1, 1]} : vector<8x12xf32> to vector<8x4xf32>
    %166 = arith.addf %164, %165 : vector<8x4xf32>
    %167 = arith.negf %166 : vector<8x4xf32>
    %168 = math.exp %167 : vector<8x4xf32>
    %cst_47 = arith.constant 1.000000e+00 : f32
    %169 = vector.broadcast %cst_47 : f32 to vector<8x4xf32>
    %170 = arith.addf %169, %168 : vector<8x4xf32>
    %171 = arith.divf %169, %170 : vector<8x4xf32>
    %172 = vector.extract_strided_slice %152 {offsets = [0, 8], sizes = [8, 4], strides = [1, 1]} : vector<8x12xf32> to vector<8x4xf32>
    %173 = vector.extract_strided_slice %155 {offsets = [0, 8], sizes = [8, 4], strides = [1, 1]} : vector<8x12xf32> to vector<8x4xf32>
    %174 = arith.mulf %163, %173 : vector<8x4xf32>
    %175 = arith.addf %172, %174 : vector<8x4xf32>
    %176 = math.tanh %175 : vector<8x4xf32>
    %177 = arith.subf %146, %176 : vector<8x4xf32>
    %178 = arith.mulf %171, %177 : vector<8x4xf32>
    %179 = arith.addf %176, %178 : vector<8x4xf32>
    %180 = arith.index_cast %150 : i32 to index
    %c0_48 = arith.constant 0 : index
    %181 = vector.load %arg9[%180, %c0_48] : memref<128x4xf32, #tpu.memory_space<vmem>>, vector<8x4xf32>
    tpu.vector_store %arg9[%180, %c0_48], %179 {strides = array<i32>} : memref<128x4xf32, #tpu.memory_space<vmem>>, vector<8x4xf32>,
    %c5_i32 = arith.constant 5 : i32
    %c8_i32_49 = arith.constant 8 : i32
    %182 = arith.muli %c5_i32, %c8_i32_49 : i32
    %183 = tpu.assume_multiple %182, 8 : i32
    %184 = arith.index_cast %183 : i32 to index
    %c0_50 = arith.constant 0 : index
    %185 = vector.load %arg7[%184, %c0_50] : memref<128x12xf32, #tpu.memory_space<vmem>>, vector<8x12xf32>
    %cst_51 = arith.constant dense<0.000000e+00> : vector<8x12xf32>
    %186 = tpu.matmul %179, %5, %cst_51 {dimension_numbers = #tpu.dot_dimension_numbers<[1], [0], [0], [1], [0, 0, 1, 1], [], []>} : vector<8x4xf32>, vector<4x12xf32>, vector<8x12xf32> -> vector<8x12xf32>
    %187 = vector.broadcast %1 : vector<1x12xf32> to vector<8x12xf32>
    %188 = arith.addf %186, %187 : vector<8x12xf32>
    %189 = vector.extract_strided_slice %185 {offsets = [0, 0], sizes = [8, 4], strides = [1, 1]} : vector<8x12xf32> to vector<8x4xf32>
    %190 = vector.extract_strided_slice %188 {offsets = [0, 0], sizes = [8, 4], strides = [1, 1]} : vector<8x12xf32> to vector<8x4xf32>
    %191 = arith.addf %189, %190 : vector<8x4xf32>
    %192 = arith.negf %191 : vector<8x4xf32>
    %193 = math.exp %192 : vector<8x4xf32>
    %cst_52 = arith.constant 1.000000e+00 : f32
    %194 = vector.broadcast %cst_52 : f32 to vector<8x4xf32>
    %195 = arith.addf %194, %193 : vector<8x4xf32>
    %196 = arith.divf %194, %195 : vector<8x4xf32>
    %197 = vector.extract_strided_slice %185 {offsets = [0, 4], sizes = [8, 4], strides = [1, 1]} : vector<8x12xf32> to vector<8x4xf32>
    %198 = vector.extract_strided_slice %188 {offsets = [0, 4], sizes = [8, 4], strides = [1, 1]} : vector<8x12xf32> to vector<8x4xf32>
    %199 = arith.addf %197, %198 : vector<8x4xf32>
    %200 = arith.negf %199 : vector<8x4xf32>
    %201 = math.exp %200 : vector<8x4xf32>
    %cst_53 = arith.constant 1.000000e+00 : f32
    %202 = vector.broadcast %cst_53 : f32 to vector<8x4xf32>
    %203 = arith.addf %202, %201 : vector<8x4xf32>
    %204 = arith.divf %202, %203 : vector<8x4xf32>
    %205 = vector.extract_strided_slice %185 {offsets = [0, 8], sizes = [8, 4], strides = [1, 1]} : vector<8x12xf32> to vector<8x4xf32>
    %206 = vector.extract_strided_slice %188 {offsets = [0, 8], sizes = [8, 4], strides = [1, 1]} : vector<8x12xf32> to vector<8x4xf32>
    %207 = arith.mulf %196, %206 : vector<8x4xf32>
    %208 = arith.addf %205, %207 : vector<8x4xf32>
    %209 = math.tanh %208 : vector<8x4xf32>
    %210 = arith.subf %179, %209 : vector<8x4xf32>
    %211 = arith.mulf %204, %210 : vector<8x4xf32>
    %212 = arith.addf %209, %211 : vector<8x4xf32>
    %213 = arith.index_cast %183 : i32 to index
    %c0_54 = arith.constant 0 : index
    %214 = vector.load %arg9[%213, %c0_54] : memref<128x4xf32, #tpu.memory_space<vmem>>, vector<8x4xf32>
    tpu.vector_store %arg9[%213, %c0_54], %212 {strides = array<i32>} : memref<128x4xf32, #tpu.memory_space<vmem>>, vector<8x4xf32>,
    %c6_i32 = arith.constant 6 : i32
    %c8_i32_55 = arith.constant 8 : i32
    %215 = arith.muli %c6_i32, %c8_i32_55 : i32
    %216 = tpu.assume_multiple %215, 8 : i32
    %217 = arith.index_cast %216 : i32 to index
    %c0_56 = arith.constant 0 : index
    %218 = vector.load %arg7[%217, %c0_56] : memref<128x12xf32, #tpu.memory_space<vmem>>, vector<8x12xf32>
    %cst_57 = arith.constant dense<0.000000e+00> : vector<8x12xf32>
    %219 = tpu.matmul %212, %5, %cst_57 {dimension_numbers = #tpu.dot_dimension_numbers<[1], [0], [0], [1], [0, 0, 1, 1], [], []>} : vector<8x4xf32>, vector<4x12xf32>, vector<8x12xf32> -> vector<8x12xf32>
    %220 = vector.broadcast %1 : vector<1x12xf32> to vector<8x12xf32>
    %221 = arith.addf %219, %220 : vector<8x12xf32>
    %222 = vector.extract_strided_slice %218 {offsets = [0, 0], sizes = [8, 4], strides = [1, 1]} : vector<8x12xf32> to vector<8x4xf32>
    %223 = vector.extract_strided_slice %221 {offsets = [0, 0], sizes = [8, 4], strides = [1, 1]} : vector<8x12xf32> to vector<8x4xf32>
    %224 = arith.addf %222, %223 : vector<8x4xf32>
    %225 = arith.negf %224 : vector<8x4xf32>
    %226 = math.exp %225 : vector<8x4xf32>
    %cst_58 = arith.constant 1.000000e+00 : f32
    %227 = vector.broadcast %cst_58 : f32 to vector<8x4xf32>
    %228 = arith.addf %227, %226 : vector<8x4xf32>
    %229 = arith.divf %227, %228 : vector<8x4xf32>
    %230 = vector.extract_strided_slice %218 {offsets = [0, 4], sizes = [8, 4], strides = [1, 1]} : vector<8x12xf32> to vector<8x4xf32>
    %231 = vector.extract_strided_slice %221 {offsets = [0, 4], sizes = [8, 4], strides = [1, 1]} : vector<8x12xf32> to vector<8x4xf32>
    %232 = arith.addf %230, %231 : vector<8x4xf32>
    %233 = arith.negf %232 : vector<8x4xf32>
    %234 = math.exp %233 : vector<8x4xf32>
    %cst_59 = arith.constant 1.000000e+00 : f32
    %235 = vector.broadcast %cst_59 : f32 to vector<8x4xf32>
    %236 = arith.addf %235, %234 : vector<8x4xf32>
    %237 = arith.divf %235, %236 : vector<8x4xf32>
    %238 = vector.extract_strided_slice %218 {offsets = [0, 8], sizes = [8, 4], strides = [1, 1]} : vector<8x12xf32> to vector<8x4xf32>
    %239 = vector.extract_strided_slice %221 {offsets = [0, 8], sizes = [8, 4], strides = [1, 1]} : vector<8x12xf32> to vector<8x4xf32>
    %240 = arith.mulf %229, %239 : vector<8x4xf32>
    %241 = arith.addf %238, %240 : vector<8x4xf32>
    %242 = math.tanh %241 : vector<8x4xf32>
    %243 = arith.subf %212, %242 : vector<8x4xf32>
    %244 = arith.mulf %237, %243 : vector<8x4xf32>
    %245 = arith.addf %242, %244 : vector<8x4xf32>
    %246 = arith.index_cast %216 : i32 to index
    %c0_60 = arith.constant 0 : index
    %247 = vector.load %arg9[%246, %c0_60] : memref<128x4xf32, #tpu.memory_space<vmem>>, vector<8x4xf32>
    tpu.vector_store %arg9[%246, %c0_60], %245 {strides = array<i32>} : memref<128x4xf32, #tpu.memory_space<vmem>>, vector<8x4xf32>,
    %c7_i32 = arith.constant 7 : i32
    %c8_i32_61 = arith.constant 8 : i32
    %248 = arith.muli %c7_i32, %c8_i32_61 : i32
    %249 = tpu.assume_multiple %248, 8 : i32
    %250 = arith.index_cast %249 : i32 to index
    %c0_62 = arith.constant 0 : index
    %251 = vector.load %arg7[%250, %c0_62] : memref<128x12xf32, #tpu.memory_space<vmem>>, vector<8x12xf32>
    %cst_63 = arith.constant dense<0.000000e+00> : vector<8x12xf32>
    %252 = tpu.matmul %245, %5, %cst_63 {dimension_numbers = #tpu.dot_dimension_numbers<[1], [0], [0], [1], [0, 0, 1, 1], [], []>} : vector<8x4xf32>, vector<4x12xf32>, vector<8x12xf32> -> vector<8x12xf32>
    %253 = vector.broadcast %1 : vector<1x12xf32> to vector<8x12xf32>
    %254 = arith.addf %252, %253 : vector<8x12xf32>
    %255 = vector.extract_strided_slice %251 {offsets = [0, 0], sizes = [8, 4], strides = [1, 1]} : vector<8x12xf32> to vector<8x4xf32>
    %256 = vector.extract_strided_slice %254 {offsets = [0, 0], sizes = [8, 4], strides = [1, 1]} : vector<8x12xf32> to vector<8x4xf32>
    %257 = arith.addf %255, %256 : vector<8x4xf32>
    %258 = arith.negf %257 : vector<8x4xf32>
    %259 = math.exp %258 : vector<8x4xf32>
    %cst_64 = arith.constant 1.000000e+00 : f32
    %260 = vector.broadcast %cst_64 : f32 to vector<8x4xf32>
    %261 = arith.addf %260, %259 : vector<8x4xf32>
    %262 = arith.divf %260, %261 : vector<8x4xf32>
    %263 = vector.extract_strided_slice %251 {offsets = [0, 4], sizes = [8, 4], strides = [1, 1]} : vector<8x12xf32> to vector<8x4xf32>
    %264 = vector.extract_strided_slice %254 {offsets = [0, 4], sizes = [8, 4], strides = [1, 1]} : vector<8x12xf32> to vector<8x4xf32>
    %265 = arith.addf %263, %264 : vector<8x4xf32>
    %266 = arith.negf %265 : vector<8x4xf32>
    %267 = math.exp %266 : vector<8x4xf32>
    %cst_65 = arith.constant 1.000000e+00 : f32
    %268 = vector.broadcast %cst_65 : f32 to vector<8x4xf32>
    %269 = arith.addf %268, %267 : vector<8x4xf32>
    %270 = arith.divf %268, %269 : vector<8x4xf32>
    %271 = vector.extract_strided_slice %251 {offsets = [0, 8], sizes = [8, 4], strides = [1, 1]} : vector<8x12xf32> to vector<8x4xf32>
    %272 = vector.extract_strided_slice %254 {offsets = [0, 8], sizes = [8, 4], strides = [1, 1]} : vector<8x12xf32> to vector<8x4xf32>
    %273 = arith.mulf %262, %272 : vector<8x4xf32>
    %274 = arith.addf %271, %273 : vector<8x4xf32>
    %275 = math.tanh %274 : vector<8x4xf32>
    %276 = arith.subf %245, %275 : vector<8x4xf32>
    %277 = arith.mulf %270, %276 : vector<8x4xf32>
    %278 = arith.addf %275, %277 : vector<8x4xf32>
    %279 = arith.index_cast %249 : i32 to index
    %c0_66 = arith.constant 0 : index
    %280 = vector.load %arg9[%279, %c0_66] : memref<128x4xf32, #tpu.memory_space<vmem>>, vector<8x4xf32>
    tpu.vector_store %arg9[%279, %c0_66], %278 {strides = array<i32>} : memref<128x4xf32, #tpu.memory_space<vmem>>, vector<8x4xf32>,
    %c8_i32_67 = arith.constant 8 : i32
    %c8_i32_68 = arith.constant 8 : i32
    %281 = arith.muli %c8_i32_67, %c8_i32_68 : i32
    %282 = tpu.assume_multiple %281, 8 : i32
    %283 = arith.index_cast %282 : i32 to index
    %c0_69 = arith.constant 0 : index
    %284 = vector.load %arg7[%283, %c0_69] : memref<128x12xf32, #tpu.memory_space<vmem>>, vector<8x12xf32>
    %cst_70 = arith.constant dense<0.000000e+00> : vector<8x12xf32>
    %285 = tpu.matmul %278, %5, %cst_70 {dimension_numbers = #tpu.dot_dimension_numbers<[1], [0], [0], [1], [0, 0, 1, 1], [], []>} : vector<8x4xf32>, vector<4x12xf32>, vector<8x12xf32> -> vector<8x12xf32>
    %286 = vector.broadcast %1 : vector<1x12xf32> to vector<8x12xf32>
    %287 = arith.addf %285, %286 : vector<8x12xf32>
    %288 = vector.extract_strided_slice %284 {offsets = [0, 0], sizes = [8, 4], strides = [1, 1]} : vector<8x12xf32> to vector<8x4xf32>
    %289 = vector.extract_strided_slice %287 {offsets = [0, 0], sizes = [8, 4], strides = [1, 1]} : vector<8x12xf32> to vector<8x4xf32>
    %290 = arith.addf %288, %289 : vector<8x4xf32>
    %291 = arith.negf %290 : vector<8x4xf32>
    %292 = math.exp %291 : vector<8x4xf32>
    %cst_71 = arith.constant 1.000000e+00 : f32
    %293 = vector.broadcast %cst_71 : f32 to vector<8x4xf32>
    %294 = arith.addf %293, %292 : vector<8x4xf32>
    %295 = arith.divf %293, %294 : vector<8x4xf32>
    %296 = vector.extract_strided_slice %284 {offsets = [0, 4], sizes = [8, 4], strides = [1, 1]} : vector<8x12xf32> to vector<8x4xf32>
    %297 = vector.extract_strided_slice %287 {offsets = [0, 4], sizes = [8, 4], strides = [1, 1]} : vector<8x12xf32> to vector<8x4xf32>
    %298 = arith.addf %296, %297 : vector<8x4xf32>
    %299 = arith.negf %298 : vector<8x4xf32>
    %300 = math.exp %299 : vector<8x4xf32>
    %cst_72 = arith.constant 1.000000e+00 : f32
    %301 = vector.broadcast %cst_72 : f32 to vector<8x4xf32>
    %302 = arith.addf %301, %300 : vector<8x4xf32>
    %303 = arith.divf %301, %302 : vector<8x4xf32>
    %304 = vector.extract_strided_slice %284 {offsets = [0, 8], sizes = [8, 4], strides = [1, 1]} : vector<8x12xf32> to vector<8x4xf32>
    %305 = vector.extract_strided_slice %287 {offsets = [0, 8], sizes = [8, 4], strides = [1, 1]} : vector<8x12xf32> to vector<8x4xf32>
    %306 = arith.mulf %295, %305 : vector<8x4xf32>
    %307 = arith.addf %304, %306 : vector<8x4xf32>
    %308 = math.tanh %307 : vector<8x4xf32>
    %309 = arith.subf %278, %308 : vector<8x4xf32>
    %310 = arith.mulf %303, %309 : vector<8x4xf32>
    %311 = arith.addf %308, %310 : vector<8x4xf32>
    %312 = arith.index_cast %282 : i32 to index
    %c0_73 = arith.constant 0 : index
    %313 = vector.load %arg9[%312, %c0_73] : memref<128x4xf32, #tpu.memory_space<vmem>>, vector<8x4xf32>
    tpu.vector_store %arg9[%312, %c0_73], %311 {strides = array<i32>} : memref<128x4xf32, #tpu.memory_space<vmem>>, vector<8x4xf32>,
    %c9_i32 = arith.constant 9 : i32
    %c8_i32_74 = arith.constant 8 : i32
    %314 = arith.muli %c9_i32, %c8_i32_74 : i32
    %315 = tpu.assume_multiple %314, 8 : i32
    %316 = arith.index_cast %315 : i32 to index
    %c0_75 = arith.constant 0 : index
    %317 = vector.load %arg7[%316, %c0_75] : memref<128x12xf32, #tpu.memory_space<vmem>>, vector<8x12xf32>
    %cst_76 = arith.constant dense<0.000000e+00> : vector<8x12xf32>
    %318 = tpu.matmul %311, %5, %cst_76 {dimension_numbers = #tpu.dot_dimension_numbers<[1], [0], [0], [1], [0, 0, 1, 1], [], []>} : vector<8x4xf32>, vector<4x12xf32>, vector<8x12xf32> -> vector<8x12xf32>
    %319 = vector.broadcast %1 : vector<1x12xf32> to vector<8x12xf32>
    %320 = arith.addf %318, %319 : vector<8x12xf32>
    %321 = vector.extract_strided_slice %317 {offsets = [0, 0], sizes = [8, 4], strides = [1, 1]} : vector<8x12xf32> to vector<8x4xf32>
    %322 = vector.extract_strided_slice %320 {offsets = [0, 0], sizes = [8, 4], strides = [1, 1]} : vector<8x12xf32> to vector<8x4xf32>
    %323 = arith.addf %321, %322 : vector<8x4xf32>
    %324 = arith.negf %323 : vector<8x4xf32>
    %325 = math.exp %324 : vector<8x4xf32>
    %cst_77 = arith.constant 1.000000e+00 : f32
    %326 = vector.broadcast %cst_77 : f32 to vector<8x4xf32>
    %327 = arith.addf %326, %325 : vector<8x4xf32>
    %328 = arith.divf %326, %327 : vector<8x4xf32>
    %329 = vector.extract_strided_slice %317 {offsets = [0, 4], sizes = [8, 4], strides = [1, 1]} : vector<8x12xf32> to vector<8x4xf32>
    %330 = vector.extract_strided_slice %320 {offsets = [0, 4], sizes = [8, 4], strides = [1, 1]} : vector<8x12xf32> to vector<8x4xf32>
    %331 = arith.addf %329, %330 : vector<8x4xf32>
    %332 = arith.negf %331 : vector<8x4xf32>
    %333 = math.exp %332 : vector<8x4xf32>
    %cst_78 = arith.constant 1.000000e+00 : f32
    %334 = vector.broadcast %cst_78 : f32 to vector<8x4xf32>
    %335 = arith.addf %334, %333 : vector<8x4xf32>
    %336 = arith.divf %334, %335 : vector<8x4xf32>
    %337 = vector.extract_strided_slice %317 {offsets = [0, 8], sizes = [8, 4], strides = [1, 1]} : vector<8x12xf32> to vector<8x4xf32>
    %338 = vector.extract_strided_slice %320 {offsets = [0, 8], sizes = [8, 4], strides = [1, 1]} : vector<8x12xf32> to vector<8x4xf32>
    %339 = arith.mulf %328, %338 : vector<8x4xf32>
    %340 = arith.addf %337, %339 : vector<8x4xf32>
    %341 = math.tanh %340 : vector<8x4xf32>
    %342 = arith.subf %311, %341 : vector<8x4xf32>
    %343 = arith.mulf %336, %342 : vector<8x4xf32>
    %344 = arith.addf %341, %343 : vector<8x4xf32>
    %345 = arith.index_cast %315 : i32 to index
    %c0_79 = arith.constant 0 : index
    %346 = vector.load %arg9[%345, %c0_79] : memref<128x4xf32, #tpu.memory_space<vmem>>, vector<8x4xf32>
    tpu.vector_store %arg9[%345, %c0_79], %344 {strides = array<i32>} : memref<128x4xf32, #tpu.memory_space<vmem>>, vector<8x4xf32>,
    %c10_i32 = arith.constant 10 : i32
    %c8_i32_80 = arith.constant 8 : i32
    %347 = arith.muli %c10_i32, %c8_i32_80 : i32
    %348 = tpu.assume_multiple %347, 8 : i32
    %349 = arith.index_cast %348 : i32 to index
    %c0_81 = arith.constant 0 : index
    %350 = vector.load %arg7[%349, %c0_81] : memref<128x12xf32, #tpu.memory_space<vmem>>, vector<8x12xf32>
    %cst_82 = arith.constant dense<0.000000e+00> : vector<8x12xf32>
    %351 = tpu.matmul %344, %5, %cst_82 {dimension_numbers = #tpu.dot_dimension_numbers<[1], [0], [0], [1], [0, 0, 1, 1], [], []>} : vector<8x4xf32>, vector<4x12xf32>, vector<8x12xf32> -> vector<8x12xf32>
    %352 = vector.broadcast %1 : vector<1x12xf32> to vector<8x12xf32>
    %353 = arith.addf %351, %352 : vector<8x12xf32>
    %354 = vector.extract_strided_slice %350 {offsets = [0, 0], sizes = [8, 4], strides = [1, 1]} : vector<8x12xf32> to vector<8x4xf32>
    %355 = vector.extract_strided_slice %353 {offsets = [0, 0], sizes = [8, 4], strides = [1, 1]} : vector<8x12xf32> to vector<8x4xf32>
    %356 = arith.addf %354, %355 : vector<8x4xf32>
    %357 = arith.negf %356 : vector<8x4xf32>
    %358 = math.exp %357 : vector<8x4xf32>
    %cst_83 = arith.constant 1.000000e+00 : f32
    %359 = vector.broadcast %cst_83 : f32 to vector<8x4xf32>
    %360 = arith.addf %359, %358 : vector<8x4xf32>
    %361 = arith.divf %359, %360 : vector<8x4xf32>
    %362 = vector.extract_strided_slice %350 {offsets = [0, 4], sizes = [8, 4], strides = [1, 1]} : vector<8x12xf32> to vector<8x4xf32>
    %363 = vector.extract_strided_slice %353 {offsets = [0, 4], sizes = [8, 4], strides = [1, 1]} : vector<8x12xf32> to vector<8x4xf32>
    %364 = arith.addf %362, %363 : vector<8x4xf32>
    %365 = arith.negf %364 : vector<8x4xf32>
    %366 = math.exp %365 : vector<8x4xf32>
    %cst_84 = arith.constant 1.000000e+00 : f32
    %367 = vector.broadcast %cst_84 : f32 to vector<8x4xf32>
    %368 = arith.addf %367, %366 : vector<8x4xf32>
    %369 = arith.divf %367, %368 : vector<8x4xf32>
    %370 = vector.extract_strided_slice %350 {offsets = [0, 8], sizes = [8, 4], strides = [1, 1]} : vector<8x12xf32> to vector<8x4xf32>
    %371 = vector.extract_strided_slice %353 {offsets = [0, 8], sizes = [8, 4], strides = [1, 1]} : vector<8x12xf32> to vector<8x4xf32>
    %372 = arith.mulf %361, %371 : vector<8x4xf32>
    %373 = arith.addf %370, %372 : vector<8x4xf32>
    %374 = math.tanh %373 : vector<8x4xf32>
    %375 = arith.subf %344, %374 : vector<8x4xf32>
    %376 = arith.mulf %369, %375 : vector<8x4xf32>
    %377 = arith.addf %374, %376 : vector<8x4xf32>
    %378 = arith.index_cast %348 : i32 to index
    %c0_85 = arith.constant 0 : index
    %379 = vector.load %arg9[%378, %c0_85] : memref<128x4xf32, #tpu.memory_space<vmem>>, vector<8x4xf32>
    tpu.vector_store %arg9[%378, %c0_85], %377 {strides = array<i32>} : memref<128x4xf32, #tpu.memory_space<vmem>>, vector<8x4xf32>,
    %c11_i32 = arith.constant 11 : i32
    %c8_i32_86 = arith.constant 8 : i32
    %380 = arith.muli %c11_i32, %c8_i32_86 : i32
    %381 = tpu.assume_multiple %380, 8 : i32
    %382 = arith.index_cast %381 : i32 to index
    %c0_87 = arith.constant 0 : index
    %383 = vector.load %arg7[%382, %c0_87] : memref<128x12xf32, #tpu.memory_space<vmem>>, vector<8x12xf32>
    %cst_88 = arith.constant dense<0.000000e+00> : vector<8x12xf32>
    %384 = tpu.matmul %377, %5, %cst_88 {dimension_numbers = #tpu.dot_dimension_numbers<[1], [0], [0], [1], [0, 0, 1, 1], [], []>} : vector<8x4xf32>, vector<4x12xf32>, vector<8x12xf32> -> vector<8x12xf32>
    %385 = vector.broadcast %1 : vector<1x12xf32> to vector<8x12xf32>
    %386 = arith.addf %384, %385 : vector<8x12xf32>
    %387 = vector.extract_strided_slice %383 {offsets = [0, 0], sizes = [8, 4], strides = [1, 1]} : vector<8x12xf32> to vector<8x4xf32>
    %388 = vector.extract_strided_slice %386 {offsets = [0, 0], sizes = [8, 4], strides = [1, 1]} : vector<8x12xf32> to vector<8x4xf32>
    %389 = arith.addf %387, %388 : vector<8x4xf32>
    %390 = arith.negf %389 : vector<8x4xf32>
    %391 = math.exp %390 : vector<8x4xf32>
    %cst_89 = arith.constant 1.000000e+00 : f32
    %392 = vector.broadcast %cst_89 : f32 to vector<8x4xf32>
    %393 = arith.addf %392, %391 : vector<8x4xf32>
    %394 = arith.divf %392, %393 : vector<8x4xf32>
    %395 = vector.extract_strided_slice %383 {offsets = [0, 4], sizes = [8, 4], strides = [1, 1]} : vector<8x12xf32> to vector<8x4xf32>
    %396 = vector.extract_strided_slice %386 {offsets = [0, 4], sizes = [8, 4], strides = [1, 1]} : vector<8x12xf32> to vector<8x4xf32>
    %397 = arith.addf %395, %396 : vector<8x4xf32>
    %398 = arith.negf %397 : vector<8x4xf32>
    %399 = math.exp %398 : vector<8x4xf32>
    %cst_90 = arith.constant 1.000000e+00 : f32
    %400 = vector.broadcast %cst_90 : f32 to vector<8x4xf32>
    %401 = arith.addf %400, %399 : vector<8x4xf32>
    %402 = arith.divf %400, %401 : vector<8x4xf32>
    %403 = vector.extract_strided_slice %383 {offsets = [0, 8], sizes = [8, 4], strides = [1, 1]} : vector<8x12xf32> to vector<8x4xf32>
    %404 = vector.extract_strided_slice %386 {offsets = [0, 8], sizes = [8, 4], strides = [1, 1]} : vector<8x12xf32> to vector<8x4xf32>
    %405 = arith.mulf %394, %404 : vector<8x4xf32>
    %406 = arith.addf %403, %405 : vector<8x4xf32>
    %407 = math.tanh %406 : vector<8x4xf32>
    %408 = arith.subf %377, %407 : vector<8x4xf32>
    %409 = arith.mulf %402, %408 : vector<8x4xf32>
    %410 = arith.addf %407, %409 : vector<8x4xf32>
    %411 = arith.index_cast %381 : i32 to index
    %c0_91 = arith.constant 0 : index
    %412 = vector.load %arg9[%411, %c0_91] : memref<128x4xf32, #tpu.memory_space<vmem>>, vector<8x4xf32>
    tpu.vector_store %arg9[%411, %c0_91], %410 {strides = array<i32>} : memref<128x4xf32, #tpu.memory_space<vmem>>, vector<8x4xf32>,
    %c12_i32 = arith.constant 12 : i32
    %c8_i32_92 = arith.constant 8 : i32
    %413 = arith.muli %c12_i32, %c8_i32_92 : i32
    %414 = tpu.assume_multiple %413, 8 : i32
    %415 = arith.index_cast %414 : i32 to index
    %c0_93 = arith.constant 0 : index
    %416 = vector.load %arg7[%415, %c0_93] : memref<128x12xf32, #tpu.memory_space<vmem>>, vector<8x12xf32>
    %cst_94 = arith.constant dense<0.000000e+00> : vector<8x12xf32>
    %417 = tpu.matmul %410, %5, %cst_94 {dimension_numbers = #tpu.dot_dimension_numbers<[1], [0], [0], [1], [0, 0, 1, 1], [], []>} : vector<8x4xf32>, vector<4x12xf32>, vector<8x12xf32> -> vector<8x12xf32>
    %418 = vector.broadcast %1 : vector<1x12xf32> to vector<8x12xf32>
    %419 = arith.addf %417, %418 : vector<8x12xf32>
    %420 = vector.extract_strided_slice %416 {offsets = [0, 0], sizes = [8, 4], strides = [1, 1]} : vector<8x12xf32> to vector<8x4xf32>
    %421 = vector.extract_strided_slice %419 {offsets = [0, 0], sizes = [8, 4], strides = [1, 1]} : vector<8x12xf32> to vector<8x4xf32>
    %422 = arith.addf %420, %421 : vector<8x4xf32>
    %423 = arith.negf %422 : vector<8x4xf32>
    %424 = math.exp %423 : vector<8x4xf32>
    %cst_95 = arith.constant 1.000000e+00 : f32
    %425 = vector.broadcast %cst_95 : f32 to vector<8x4xf32>
    %426 = arith.addf %425, %424 : vector<8x4xf32>
    %427 = arith.divf %425, %426 : vector<8x4xf32>
    %428 = vector.extract_strided_slice %416 {offsets = [0, 4], sizes = [8, 4], strides = [1, 1]} : vector<8x12xf32> to vector<8x4xf32>
    %429 = vector.extract_strided_slice %419 {offsets = [0, 4], sizes = [8, 4], strides = [1, 1]} : vector<8x12xf32> to vector<8x4xf32>
    %430 = arith.addf %428, %429 : vector<8x4xf32>
    %431 = arith.negf %430 : vector<8x4xf32>
    %432 = math.exp %431 : vector<8x4xf32>
    %cst_96 = arith.constant 1.000000e+00 : f32
    %433 = vector.broadcast %cst_96 : f32 to vector<8x4xf32>
    %434 = arith.addf %433, %432 : vector<8x4xf32>
    %435 = arith.divf %433, %434 : vector<8x4xf32>
    %436 = vector.extract_strided_slice %416 {offsets = [0, 8], sizes = [8, 4], strides = [1, 1]} : vector<8x12xf32> to vector<8x4xf32>
    %437 = vector.extract_strided_slice %419 {offsets = [0, 8], sizes = [8, 4], strides = [1, 1]} : vector<8x12xf32> to vector<8x4xf32>
    %438 = arith.mulf %427, %437 : vector<8x4xf32>
    %439 = arith.addf %436, %438 : vector<8x4xf32>
    %440 = math.tanh %439 : vector<8x4xf32>
    %441 = arith.subf %410, %440 : vector<8x4xf32>
    %442 = arith.mulf %435, %441 : vector<8x4xf32>
    %443 = arith.addf %440, %442 : vector<8x4xf32>
    %444 = arith.index_cast %414 : i32 to index
    %c0_97 = arith.constant 0 : index
    %445 = vector.load %arg9[%444, %c0_97] : memref<128x4xf32, #tpu.memory_space<vmem>>, vector<8x4xf32>
    tpu.vector_store %arg9[%444, %c0_97], %443 {strides = array<i32>} : memref<128x4xf32, #tpu.memory_space<vmem>>, vector<8x4xf32>,
    %c13_i32 = arith.constant 13 : i32
    %c8_i32_98 = arith.constant 8 : i32
    %446 = arith.muli %c13_i32, %c8_i32_98 : i32
    %447 = tpu.assume_multiple %446, 8 : i32
    %448 = arith.index_cast %447 : i32 to index
    %c0_99 = arith.constant 0 : index
    %449 = vector.load %arg7[%448, %c0_99] : memref<128x12xf32, #tpu.memory_space<vmem>>, vector<8x12xf32>
    %cst_100 = arith.constant dense<0.000000e+00> : vector<8x12xf32>
    %450 = tpu.matmul %443, %5, %cst_100 {dimension_numbers = #tpu.dot_dimension_numbers<[1], [0], [0], [1], [0, 0, 1, 1], [], []>} : vector<8x4xf32>, vector<4x12xf32>, vector<8x12xf32> -> vector<8x12xf32>
    %451 = vector.broadcast %1 : vector<1x12xf32> to vector<8x12xf32>
    %452 = arith.addf %450, %451 : vector<8x12xf32>
    %453 = vector.extract_strided_slice %449 {offsets = [0, 0], sizes = [8, 4], strides = [1, 1]} : vector<8x12xf32> to vector<8x4xf32>
    %454 = vector.extract_strided_slice %452 {offsets = [0, 0], sizes = [8, 4], strides = [1, 1]} : vector<8x12xf32> to vector<8x4xf32>
    %455 = arith.addf %453, %454 : vector<8x4xf32>
    %456 = arith.negf %455 : vector<8x4xf32>
    %457 = math.exp %456 : vector<8x4xf32>
    %cst_101 = arith.constant 1.000000e+00 : f32
    %458 = vector.broadcast %cst_101 : f32 to vector<8x4xf32>
    %459 = arith.addf %458, %457 : vector<8x4xf32>
    %460 = arith.divf %458, %459 : vector<8x4xf32>
    %461 = vector.extract_strided_slice %449 {offsets = [0, 4], sizes = [8, 4], strides = [1, 1]} : vector<8x12xf32> to vector<8x4xf32>
    %462 = vector.extract_strided_slice %452 {offsets = [0, 4], sizes = [8, 4], strides = [1, 1]} : vector<8x12xf32> to vector<8x4xf32>
    %463 = arith.addf %461, %462 : vector<8x4xf32>
    %464 = arith.negf %463 : vector<8x4xf32>
    %465 = math.exp %464 : vector<8x4xf32>
    %cst_102 = arith.constant 1.000000e+00 : f32
    %466 = vector.broadcast %cst_102 : f32 to vector<8x4xf32>
    %467 = arith.addf %466, %465 : vector<8x4xf32>
    %468 = arith.divf %466, %467 : vector<8x4xf32>
    %469 = vector.extract_strided_slice %449 {offsets = [0, 8], sizes = [8, 4], strides = [1, 1]} : vector<8x12xf32> to vector<8x4xf32>
    %470 = vector.extract_strided_slice %452 {offsets = [0, 8], sizes = [8, 4], strides = [1, 1]} : vector<8x12xf32> to vector<8x4xf32>
    %471 = arith.mulf %460, %470 : vector<8x4xf32>
    %472 = arith.addf %469, %471 : vector<8x4xf32>
    %473 = math.tanh %472 : vector<8x4xf32>
    %474 = arith.subf %443, %473 : vector<8x4xf32>
    %475 = arith.mulf %468, %474 : vector<8x4xf32>
    %476 = arith.addf %473, %475 : vector<8x4xf32>
    %477 = arith.index_cast %447 : i32 to index
    %c0_103 = arith.constant 0 : index
    %478 = vector.load %arg9[%477, %c0_103] : memref<128x4xf32, #tpu.memory_space<vmem>>, vector<8x4xf32>
    tpu.vector_store %arg9[%477, %c0_103], %476 {strides = array<i32>} : memref<128x4xf32, #tpu.memory_space<vmem>>, vector<8x4xf32>,
    %c14_i32 = arith.constant 14 : i32
    %c8_i32_104 = arith.constant 8 : i32
    %479 = arith.muli %c14_i32, %c8_i32_104 : i32
    %480 = tpu.assume_multiple %479, 8 : i32
    %481 = arith.index_cast %480 : i32 to index
    %c0_105 = arith.constant 0 : index
    %482 = vector.load %arg7[%481, %c0_105] : memref<128x12xf32, #tpu.memory_space<vmem>>, vector<8x12xf32>
    %cst_106 = arith.constant dense<0.000000e+00> : vector<8x12xf32>
    %483 = tpu.matmul %476, %5, %cst_106 {dimension_numbers = #tpu.dot_dimension_numbers<[1], [0], [0], [1], [0, 0, 1, 1], [], []>} : vector<8x4xf32>, vector<4x12xf32>, vector<8x12xf32> -> vector<8x12xf32>
    %484 = vector.broadcast %1 : vector<1x12xf32> to vector<8x12xf32>
    %485 = arith.addf %483, %484 : vector<8x12xf32>
    %486 = vector.extract_strided_slice %482 {offsets = [0, 0], sizes = [8, 4], strides = [1, 1]} : vector<8x12xf32> to vector<8x4xf32>
    %487 = vector.extract_strided_slice %485 {offsets = [0, 0], sizes = [8, 4], strides = [1, 1]} : vector<8x12xf32> to vector<8x4xf32>
    %488 = arith.addf %486, %487 : vector<8x4xf32>
    %489 = arith.negf %488 : vector<8x4xf32>
    %490 = math.exp %489 : vector<8x4xf32>
    %cst_107 = arith.constant 1.000000e+00 : f32
    %491 = vector.broadcast %cst_107 : f32 to vector<8x4xf32>
    %492 = arith.addf %491, %490 : vector<8x4xf32>
    %493 = arith.divf %491, %492 : vector<8x4xf32>
    %494 = vector.extract_strided_slice %482 {offsets = [0, 4], sizes = [8, 4], strides = [1, 1]} : vector<8x12xf32> to vector<8x4xf32>
    %495 = vector.extract_strided_slice %485 {offsets = [0, 4], sizes = [8, 4], strides = [1, 1]} : vector<8x12xf32> to vector<8x4xf32>
    %496 = arith.addf %494, %495 : vector<8x4xf32>
    %497 = arith.negf %496 : vector<8x4xf32>
    %498 = math.exp %497 : vector<8x4xf32>
    %cst_108 = arith.constant 1.000000e+00 : f32
    %499 = vector.broadcast %cst_108 : f32 to vector<8x4xf32>
    %500 = arith.addf %499, %498 : vector<8x4xf32>
    %501 = arith.divf %499, %500 : vector<8x4xf32>
    %502 = vector.extract_strided_slice %482 {offsets = [0, 8], sizes = [8, 4], strides = [1, 1]} : vector<8x12xf32> to vector<8x4xf32>
    %503 = vector.extract_strided_slice %485 {offsets = [0, 8], sizes = [8, 4], strides = [1, 1]} : vector<8x12xf32> to vector<8x4xf32>
    %504 = arith.mulf %493, %503 : vector<8x4xf32>
    %505 = arith.addf %502, %504 : vector<8x4xf32>
    %506 = math.tanh %505 : vector<8x4xf32>
    %507 = arith.subf %476, %506 : vector<8x4xf32>
    %508 = arith.mulf %501, %507 : vector<8x4xf32>
    %509 = arith.addf %506, %508 : vector<8x4xf32>
    %510 = arith.index_cast %480 : i32 to index
    %c0_109 = arith.constant 0 : index
    %511 = vector.load %arg9[%510, %c0_109] : memref<128x4xf32, #tpu.memory_space<vmem>>, vector<8x4xf32>
    tpu.vector_store %arg9[%510, %c0_109], %509 {strides = array<i32>} : memref<128x4xf32, #tpu.memory_space<vmem>>, vector<8x4xf32>,
    %c15_i32 = arith.constant 15 : i32
    %c8_i32_110 = arith.constant 8 : i32
    %512 = arith.muli %c15_i32, %c8_i32_110 : i32
    %513 = tpu.assume_multiple %512, 8 : i32
    %514 = arith.index_cast %513 : i32 to index
    %c0_111 = arith.constant 0 : index
    %515 = vector.load %arg7[%514, %c0_111] : memref<128x12xf32, #tpu.memory_space<vmem>>, vector<8x12xf32>
    %cst_112 = arith.constant dense<0.000000e+00> : vector<8x12xf32>
    %516 = tpu.matmul %509, %5, %cst_112 {dimension_numbers = #tpu.dot_dimension_numbers<[1], [0], [0], [1], [0, 0, 1, 1], [], []>} : vector<8x4xf32>, vector<4x12xf32>, vector<8x12xf32> -> vector<8x12xf32>
    %517 = vector.broadcast %1 : vector<1x12xf32> to vector<8x12xf32>
    %518 = arith.addf %516, %517 : vector<8x12xf32>
    %519 = vector.extract_strided_slice %515 {offsets = [0, 0], sizes = [8, 4], strides = [1, 1]} : vector<8x12xf32> to vector<8x4xf32>
    %520 = vector.extract_strided_slice %518 {offsets = [0, 0], sizes = [8, 4], strides = [1, 1]} : vector<8x12xf32> to vector<8x4xf32>
    %521 = arith.addf %519, %520 : vector<8x4xf32>
    %522 = arith.negf %521 : vector<8x4xf32>
    %523 = math.exp %522 : vector<8x4xf32>
    %cst_113 = arith.constant 1.000000e+00 : f32
    %524 = vector.broadcast %cst_113 : f32 to vector<8x4xf32>
    %525 = arith.addf %524, %523 : vector<8x4xf32>
    %526 = arith.divf %524, %525 : vector<8x4xf32>
    %527 = vector.extract_strided_slice %515 {offsets = [0, 4], sizes = [8, 4], strides = [1, 1]} : vector<8x12xf32> to vector<8x4xf32>
    %528 = vector.extract_strided_slice %518 {offsets = [0, 4], sizes = [8, 4], strides = [1, 1]} : vector<8x12xf32> to vector<8x4xf32>
    %529 = arith.addf %527, %528 : vector<8x4xf32>
    %530 = arith.negf %529 : vector<8x4xf32>
    %531 = math.exp %530 : vector<8x4xf32>
    %cst_114 = arith.constant 1.000000e+00 : f32
    %532 = vector.broadcast %cst_114 : f32 to vector<8x4xf32>
    %533 = arith.addf %532, %531 : vector<8x4xf32>
    %534 = arith.divf %532, %533 : vector<8x4xf32>
    %535 = vector.extract_strided_slice %515 {offsets = [0, 8], sizes = [8, 4], strides = [1, 1]} : vector<8x12xf32> to vector<8x4xf32>
    %536 = vector.extract_strided_slice %518 {offsets = [0, 8], sizes = [8, 4], strides = [1, 1]} : vector<8x12xf32> to vector<8x4xf32>
    %537 = arith.mulf %526, %536 : vector<8x4xf32>
    %538 = arith.addf %535, %537 : vector<8x4xf32>
    %539 = math.tanh %538 : vector<8x4xf32>
    %540 = arith.subf %509, %539 : vector<8x4xf32>
    %541 = arith.mulf %534, %540 : vector<8x4xf32>
    %542 = arith.addf %539, %541 : vector<8x4xf32>
    %543 = arith.index_cast %513 : i32 to index
    %c0_115 = arith.constant 0 : index
    %544 = vector.load %arg9[%543, %c0_115] : memref<128x4xf32, #tpu.memory_space<vmem>>, vector<8x4xf32>
    tpu.vector_store %arg9[%543, %c0_115], %542 {strides = array<i32>} : memref<128x4xf32, #tpu.memory_space<vmem>>, vector<8x4xf32>,
    %c16_i32 = arith.constant 16 : i32
    %c0_116 = arith.constant 0 : index
    %c0_117 = arith.constant 0 : index
    %545 = vector.load %arg9[%c0_116, %c0_117] : memref<128x4xf32, #tpu.memory_space<vmem>>, vector<128x4xf32>
    %cst_118 = arith.constant dense<0.000000e+00> : vector<128x12xf32>
    %546 = tpu.matmul %545, %7, %cst_118 {dimension_numbers = #tpu.dot_dimension_numbers<[1], [0], [0], [1], [0, 0, 1, 1], [], []>} : vector<128x4xf32>, vector<4x12xf32>, vector<128x12xf32> -> vector<128x12xf32>
    %547 = vector.broadcast %2 : vector<1x12xf32> to vector<128x12xf32>
    %548 = arith.addf %546, %547 : vector<128x12xf32>
    %c0_119 = arith.constant 0 : index
    %c0_120 = arith.constant 0 : index
    %549 = vector.load %arg8[%c0_119, %c0_120] : memref<128x12xf32, #tpu.memory_space<vmem>>, vector<128x12xf32>
    tpu.vector_store %arg8[%c0_119, %c0_120], %548 {strides = array<i32>} : memref<128x12xf32, #tpu.memory_space<vmem>>, vector<128x12xf32>,
    %c0_i32_121 = arith.constant 0 : i32
    %c8_i32_122 = arith.constant 8 : i32
    %550 = arith.muli %c0_i32_121, %c8_i32_122 : i32
    %551 = tpu.assume_multiple %550, 8 : i32
    %552 = arith.index_cast %551 : i32 to index
    %c0_123 = arith.constant 0 : index
    %553 = vector.load %arg8[%552, %c0_123] : memref<128x12xf32, #tpu.memory_space<vmem>>, vector<8x12xf32>
    %cst_124 = arith.constant dense<0.000000e+00> : vector<8x12xf32>
    %554 = tpu.matmul %16, %9, %cst_124 {dimension_numbers = #tpu.dot_dimension_numbers<[1], [0], [0], [1], [0, 0, 1, 1], [], []>} : vector<8x4xf32>, vector<4x12xf32>, vector<8x12xf32> -> vector<8x12xf32>
    %555 = vector.broadcast %3 : vector<1x12xf32> to vector<8x12xf32>
    %556 = arith.addf %554, %555 : vector<8x12xf32>
    %557 = vector.extract_strided_slice %553 {offsets = [0, 0], sizes = [8, 4], strides = [1, 1]} : vector<8x12xf32> to vector<8x4xf32>
    %558 = vector.extract_strided_slice %556 {offsets = [0, 0], sizes = [8, 4], strides = [1, 1]} : vector<8x12xf32> to vector<8x4xf32>
    %559 = arith.addf %557, %558 : vector<8x4xf32>
    %560 = arith.negf %559 : vector<8x4xf32>
    %561 = math.exp %560 : vector<8x4xf32>
    %cst_125 = arith.constant 1.000000e+00 : f32
    %562 = vector.broadcast %cst_125 : f32 to vector<8x4xf32>
    %563 = arith.addf %562, %561 : vector<8x4xf32>
    %564 = arith.divf %562, %563 : vector<8x4xf32>
    %565 = vector.extract_strided_slice %553 {offsets = [0, 4], sizes = [8, 4], strides = [1, 1]} : vector<8x12xf32> to vector<8x4xf32>
    %566 = vector.extract_strided_slice %556 {offsets = [0, 4], sizes = [8, 4], strides = [1, 1]} : vector<8x12xf32> to vector<8x4xf32>
    %567 = arith.addf %565, %566 : vector<8x4xf32>
    %568 = arith.negf %567 : vector<8x4xf32>
    %569 = math.exp %568 : vector<8x4xf32>
    %cst_126 = arith.constant 1.000000e+00 : f32
    %570 = vector.broadcast %cst_126 : f32 to vector<8x4xf32>
    %571 = arith.addf %570, %569 : vector<8x4xf32>
    %572 = arith.divf %570, %571 : vector<8x4xf32>
    %573 = vector.extract_strided_slice %553 {offsets = [0, 8], sizes = [8, 4], strides = [1, 1]} : vector<8x12xf32> to vector<8x4xf32>
    %574 = vector.extract_strided_slice %556 {offsets = [0, 8], sizes = [8, 4], strides = [1, 1]} : vector<8x12xf32> to vector<8x4xf32>
    %575 = arith.mulf %564, %574 : vector<8x4xf32>
    %576 = arith.addf %573, %575 : vector<8x4xf32>
    %577 = math.tanh %576 : vector<8x4xf32>
    %578 = arith.subf %16, %577 : vector<8x4xf32>
    %579 = arith.mulf %572, %578 : vector<8x4xf32>
    %580 = arith.addf %577, %579 : vector<8x4xf32>
    %581 = arith.index_cast %551 : i32 to index
    %c0_127 = arith.constant 0 : index
    %582 = vector.load %arg10[%581, %c0_127] : memref<128x4xf32, #tpu.memory_space<vmem>>, vector<8x4xf32>
    tpu.vector_store %arg10[%581, %c0_127], %580 {strides = array<i32>} : memref<128x4xf32, #tpu.memory_space<vmem>>, vector<8x4xf32>,
    %c1_i32_128 = arith.constant 1 : i32
    %c8_i32_129 = arith.constant 8 : i32
    %583 = arith.muli %c1_i32_128, %c8_i32_129 : i32
    %584 = tpu.assume_multiple %583, 8 : i32
    %585 = arith.index_cast %584 : i32 to index
    %c0_130 = arith.constant 0 : index
    %586 = vector.load %arg8[%585, %c0_130] : memref<128x12xf32, #tpu.memory_space<vmem>>, vector<8x12xf32>
    %cst_131 = arith.constant dense<0.000000e+00> : vector<8x12xf32>
    %587 = tpu.matmul %580, %9, %cst_131 {dimension_numbers = #tpu.dot_dimension_numbers<[1], [0], [0], [1], [0, 0, 1, 1], [], []>} : vector<8x4xf32>, vector<4x12xf32>, vector<8x12xf32> -> vector<8x12xf32>
    %588 = vector.broadcast %3 : vector<1x12xf32> to vector<8x12xf32>
    %589 = arith.addf %587, %588 : vector<8x12xf32>
    %590 = vector.extract_strided_slice %586 {offsets = [0, 0], sizes = [8, 4], strides = [1, 1]} : vector<8x12xf32> to vector<8x4xf32>
    %591 = vector.extract_strided_slice %589 {offsets = [0, 0], sizes = [8, 4], strides = [1, 1]} : vector<8x12xf32> to vector<8x4xf32>
    %592 = arith.addf %590, %591 : vector<8x4xf32>
    %593 = arith.negf %592 : vector<8x4xf32>
    %594 = math.exp %593 : vector<8x4xf32>
    %cst_132 = arith.constant 1.000000e+00 : f32
    %595 = vector.broadcast %cst_132 : f32 to vector<8x4xf32>
    %596 = arith.addf %595, %594 : vector<8x4xf32>
    %597 = arith.divf %595, %596 : vector<8x4xf32>
    %598 = vector.extract_strided_slice %586 {offsets = [0, 4], sizes = [8, 4], strides = [1, 1]} : vector<8x12xf32> to vector<8x4xf32>
    %599 = vector.extract_strided_slice %589 {offsets = [0, 4], sizes = [8, 4], strides = [1, 1]} : vector<8x12xf32> to vector<8x4xf32>
    %600 = arith.addf %598, %599 : vector<8x4xf32>
    %601 = arith.negf %600 : vector<8x4xf32>
    %602 = math.exp %601 : vector<8x4xf32>
    %cst_133 = arith.constant 1.000000e+00 : f32
    %603 = vector.broadcast %cst_133 : f32 to vector<8x4xf32>
    %604 = arith.addf %603, %602 : vector<8x4xf32>
    %605 = arith.divf %603, %604 : vector<8x4xf32>
    %606 = vector.extract_strided_slice %586 {offsets = [0, 8], sizes = [8, 4], strides = [1, 1]} : vector<8x12xf32> to vector<8x4xf32>
    %607 = vector.extract_strided_slice %589 {offsets = [0, 8], sizes = [8, 4], strides = [1, 1]} : vector<8x12xf32> to vector<8x4xf32>
    %608 = arith.mulf %597, %607 : vector<8x4xf32>
    %609 = arith.addf %606, %608 : vector<8x4xf32>
    %610 = math.tanh %609 : vector<8x4xf32>
    %611 = arith.subf %580, %610 : vector<8x4xf32>
    %612 = arith.mulf %605, %611 : vector<8x4xf32>
    %613 = arith.addf %610, %612 : vector<8x4xf32>
    %614 = arith.index_cast %584 : i32 to index
    %c0_134 = arith.constant 0 : index
    %615 = vector.load %arg10[%614, %c0_134] : memref<128x4xf32, #tpu.memory_space<vmem>>, vector<8x4xf32>
    tpu.vector_store %arg10[%614, %c0_134], %613 {strides = array<i32>} : memref<128x4xf32, #tpu.memory_space<vmem>>, vector<8x4xf32>,
    %c2_i32_135 = arith.constant 2 : i32
    %c8_i32_136 = arith.constant 8 : i32
    %616 = arith.muli %c2_i32_135, %c8_i32_136 : i32
    %617 = tpu.assume_multiple %616, 8 : i32
    %618 = arith.index_cast %617 : i32 to index
    %c0_137 = arith.constant 0 : index
    %619 = vector.load %arg8[%618, %c0_137] : memref<128x12xf32, #tpu.memory_space<vmem>>, vector<8x12xf32>
    %cst_138 = arith.constant dense<0.000000e+00> : vector<8x12xf32>
    %620 = tpu.matmul %613, %9, %cst_138 {dimension_numbers = #tpu.dot_dimension_numbers<[1], [0], [0], [1], [0, 0, 1, 1], [], []>} : vector<8x4xf32>, vector<4x12xf32>, vector<8x12xf32> -> vector<8x12xf32>
    %621 = vector.broadcast %3 : vector<1x12xf32> to vector<8x12xf32>
    %622 = arith.addf %620, %621 : vector<8x12xf32>
    %623 = vector.extract_strided_slice %619 {offsets = [0, 0], sizes = [8, 4], strides = [1, 1]} : vector<8x12xf32> to vector<8x4xf32>
    %624 = vector.extract_strided_slice %622 {offsets = [0, 0], sizes = [8, 4], strides = [1, 1]} : vector<8x12xf32> to vector<8x4xf32>
    %625 = arith.addf %623, %624 : vector<8x4xf32>
    %626 = arith.negf %625 : vector<8x4xf32>
    %627 = math.exp %626 : vector<8x4xf32>
    %cst_139 = arith.constant 1.000000e+00 : f32
    %628 = vector.broadcast %cst_139 : f32 to vector<8x4xf32>
    %629 = arith.addf %628, %627 : vector<8x4xf32>
    %630 = arith.divf %628, %629 : vector<8x4xf32>
    %631 = vector.extract_strided_slice %619 {offsets = [0, 4], sizes = [8, 4], strides = [1, 1]} : vector<8x12xf32> to vector<8x4xf32>
    %632 = vector.extract_strided_slice %622 {offsets = [0, 4], sizes = [8, 4], strides = [1, 1]} : vector<8x12xf32> to vector<8x4xf32>
    %633 = arith.addf %631, %632 : vector<8x4xf32>
    %634 = arith.negf %633 : vector<8x4xf32>
    %635 = math.exp %634 : vector<8x4xf32>
    %cst_140 = arith.constant 1.000000e+00 : f32
    %636 = vector.broadcast %cst_140 : f32 to vector<8x4xf32>
    %637 = arith.addf %636, %635 : vector<8x4xf32>
    %638 = arith.divf %636, %637 : vector<8x4xf32>
    %639 = vector.extract_strided_slice %619 {offsets = [0, 8], sizes = [8, 4], strides = [1, 1]} : vector<8x12xf32> to vector<8x4xf32>
    %640 = vector.extract_strided_slice %622 {offsets = [0, 8], sizes = [8, 4], strides = [1, 1]} : vector<8x12xf32> to vector<8x4xf32>
    %641 = arith.mulf %630, %640 : vector<8x4xf32>
    %642 = arith.addf %639, %641 : vector<8x4xf32>
    %643 = math.tanh %642 : vector<8x4xf32>
    %644 = arith.subf %613, %643 : vector<8x4xf32>
    %645 = arith.mulf %638, %644 : vector<8x4xf32>
    %646 = arith.addf %643, %645 : vector<8x4xf32>
    %647 = arith.index_cast %617 : i32 to index
    %c0_141 = arith.constant 0 : index
    %648 = vector.load %arg10[%647, %c0_141] : memref<128x4xf32, #tpu.memory_space<vmem>>, vector<8x4xf32>
    tpu.vector_store %arg10[%647, %c0_141], %646 {strides = array<i32>} : memref<128x4xf32, #tpu.memory_space<vmem>>, vector<8x4xf32>,
    %c3_i32_142 = arith.constant 3 : i32
    %c8_i32_143 = arith.constant 8 : i32
    %649 = arith.muli %c3_i32_142, %c8_i32_143 : i32
    %650 = tpu.assume_multiple %649, 8 : i32
    %651 = arith.index_cast %650 : i32 to index
    %c0_144 = arith.constant 0 : index
    %652 = vector.load %arg8[%651, %c0_144] : memref<128x12xf32, #tpu.memory_space<vmem>>, vector<8x12xf32>
    %cst_145 = arith.constant dense<0.000000e+00> : vector<8x12xf32>
    %653 = tpu.matmul %646, %9, %cst_145 {dimension_numbers = #tpu.dot_dimension_numbers<[1], [0], [0], [1], [0, 0, 1, 1], [], []>} : vector<8x4xf32>, vector<4x12xf32>, vector<8x12xf32> -> vector<8x12xf32>
    %654 = vector.broadcast %3 : vector<1x12xf32> to vector<8x12xf32>
    %655 = arith.addf %653, %654 : vector<8x12xf32>
    %656 = vector.extract_strided_slice %652 {offsets = [0, 0], sizes = [8, 4], strides = [1, 1]} : vector<8x12xf32> to vector<8x4xf32>
    %657 = vector.extract_strided_slice %655 {offsets = [0, 0], sizes = [8, 4], strides = [1, 1]} : vector<8x12xf32> to vector<8x4xf32>
    %658 = arith.addf %656, %657 : vector<8x4xf32>
    %659 = arith.negf %658 : vector<8x4xf32>
    %660 = math.exp %659 : vector<8x4xf32>
    %cst_146 = arith.constant 1.000000e+00 : f32
    %661 = vector.broadcast %cst_146 : f32 to vector<8x4xf32>
    %662 = arith.addf %661, %660 : vector<8x4xf32>
    %663 = arith.divf %661, %662 : vector<8x4xf32>
    %664 = vector.extract_strided_slice %652 {offsets = [0, 4], sizes = [8, 4], strides = [1, 1]} : vector<8x12xf32> to vector<8x4xf32>
    %665 = vector.extract_strided_slice %655 {offsets = [0, 4], sizes = [8, 4], strides = [1, 1]} : vector<8x12xf32> to vector<8x4xf32>
    %666 = arith.addf %664, %665 : vector<8x4xf32>
    %667 = arith.negf %666 : vector<8x4xf32>
    %668 = math.exp %667 : vector<8x4xf32>
    %cst_147 = arith.constant 1.000000e+00 : f32
    %669 = vector.broadcast %cst_147 : f32 to vector<8x4xf32>
    %670 = arith.addf %669, %668 : vector<8x4xf32>
    %671 = arith.divf %669, %670 : vector<8x4xf32>
    %672 = vector.extract_strided_slice %652 {offsets = [0, 8], sizes = [8, 4], strides = [1, 1]} : vector<8x12xf32> to vector<8x4xf32>
    %673 = vector.extract_strided_slice %655 {offsets = [0, 8], sizes = [8, 4], strides = [1, 1]} : vector<8x12xf32> to vector<8x4xf32>
    %674 = arith.mulf %663, %673 : vector<8x4xf32>
    %675 = arith.addf %672, %674 : vector<8x4xf32>
    %676 = math.tanh %675 : vector<8x4xf32>
    %677 = arith.subf %646, %676 : vector<8x4xf32>
    %678 = arith.mulf %671, %677 : vector<8x4xf32>
    %679 = arith.addf %676, %678 : vector<8x4xf32>
    %680 = arith.index_cast %650 : i32 to index
    %c0_148 = arith.constant 0 : index
    %681 = vector.load %arg10[%680, %c0_148] : memref<128x4xf32, #tpu.memory_space<vmem>>, vector<8x4xf32>
    tpu.vector_store %arg10[%680, %c0_148], %679 {strides = array<i32>} : memref<128x4xf32, #tpu.memory_space<vmem>>, vector<8x4xf32>,
    %c4_i32_149 = arith.constant 4 : i32
    %c8_i32_150 = arith.constant 8 : i32
    %682 = arith.muli %c4_i32_149, %c8_i32_150 : i32
    %683 = tpu.assume_multiple %682, 8 : i32
    %684 = arith.index_cast %683 : i32 to index
    %c0_151 = arith.constant 0 : index
    %685 = vector.load %arg8[%684, %c0_151] : memref<128x12xf32, #tpu.memory_space<vmem>>, vector<8x12xf32>
    %cst_152 = arith.constant dense<0.000000e+00> : vector<8x12xf32>
    %686 = tpu.matmul %679, %9, %cst_152 {dimension_numbers = #tpu.dot_dimension_numbers<[1], [0], [0], [1], [0, 0, 1, 1], [], []>} : vector<8x4xf32>, vector<4x12xf32>, vector<8x12xf32> -> vector<8x12xf32>
    %687 = vector.broadcast %3 : vector<1x12xf32> to vector<8x12xf32>
    %688 = arith.addf %686, %687 : vector<8x12xf32>
    %689 = vector.extract_strided_slice %685 {offsets = [0, 0], sizes = [8, 4], strides = [1, 1]} : vector<8x12xf32> to vector<8x4xf32>
    %690 = vector.extract_strided_slice %688 {offsets = [0, 0], sizes = [8, 4], strides = [1, 1]} : vector<8x12xf32> to vector<8x4xf32>
    %691 = arith.addf %689, %690 : vector<8x4xf32>
    %692 = arith.negf %691 : vector<8x4xf32>
    %693 = math.exp %692 : vector<8x4xf32>
    %cst_153 = arith.constant 1.000000e+00 : f32
    %694 = vector.broadcast %cst_153 : f32 to vector<8x4xf32>
    %695 = arith.addf %694, %693 : vector<8x4xf32>
    %696 = arith.divf %694, %695 : vector<8x4xf32>
    %697 = vector.extract_strided_slice %685 {offsets = [0, 4], sizes = [8, 4], strides = [1, 1]} : vector<8x12xf32> to vector<8x4xf32>
    %698 = vector.extract_strided_slice %688 {offsets = [0, 4], sizes = [8, 4], strides = [1, 1]} : vector<8x12xf32> to vector<8x4xf32>
    %699 = arith.addf %697, %698 : vector<8x4xf32>
    %700 = arith.negf %699 : vector<8x4xf32>
    %701 = math.exp %700 : vector<8x4xf32>
    %cst_154 = arith.constant 1.000000e+00 : f32
    %702 = vector.broadcast %cst_154 : f32 to vector<8x4xf32>
    %703 = arith.addf %702, %701 : vector<8x4xf32>
    %704 = arith.divf %702, %703 : vector<8x4xf32>
    %705 = vector.extract_strided_slice %685 {offsets = [0, 8], sizes = [8, 4], strides = [1, 1]} : vector<8x12xf32> to vector<8x4xf32>
    %706 = vector.extract_strided_slice %688 {offsets = [0, 8], sizes = [8, 4], strides = [1, 1]} : vector<8x12xf32> to vector<8x4xf32>
    %707 = arith.mulf %696, %706 : vector<8x4xf32>
    %708 = arith.addf %705, %707 : vector<8x4xf32>
    %709 = math.tanh %708 : vector<8x4xf32>
    %710 = arith.subf %679, %709 : vector<8x4xf32>
    %711 = arith.mulf %704, %710 : vector<8x4xf32>
    %712 = arith.addf %709, %711 : vector<8x4xf32>
    %713 = arith.index_cast %683 : i32 to index
    %c0_155 = arith.constant 0 : index
    %714 = vector.load %arg10[%713, %c0_155] : memref<128x4xf32, #tpu.memory_space<vmem>>, vector<8x4xf32>
    tpu.vector_store %arg10[%713, %c0_155], %712 {strides = array<i32>} : memref<128x4xf32, #tpu.memory_space<vmem>>, vector<8x4xf32>,
    %c5_i32_156 = arith.constant 5 : i32
    %c8_i32_157 = arith.constant 8 : i32
    %715 = arith.muli %c5_i32_156, %c8_i32_157 : i32
    %716 = tpu.assume_multiple %715, 8 : i32
    %717 = arith.index_cast %716 : i32 to index
    %c0_158 = arith.constant 0 : index
    %718 = vector.load %arg8[%717, %c0_158] : memref<128x12xf32, #tpu.memory_space<vmem>>, vector<8x12xf32>
    %cst_159 = arith.constant dense<0.000000e+00> : vector<8x12xf32>
    %719 = tpu.matmul %712, %9, %cst_159 {dimension_numbers = #tpu.dot_dimension_numbers<[1], [0], [0], [1], [0, 0, 1, 1], [], []>} : vector<8x4xf32>, vector<4x12xf32>, vector<8x12xf32> -> vector<8x12xf32>
    %720 = vector.broadcast %3 : vector<1x12xf32> to vector<8x12xf32>
    %721 = arith.addf %719, %720 : vector<8x12xf32>
    %722 = vector.extract_strided_slice %718 {offsets = [0, 0], sizes = [8, 4], strides = [1, 1]} : vector<8x12xf32> to vector<8x4xf32>
    %723 = vector.extract_strided_slice %721 {offsets = [0, 0], sizes = [8, 4], strides = [1, 1]} : vector<8x12xf32> to vector<8x4xf32>
    %724 = arith.addf %722, %723 : vector<8x4xf32>
    %725 = arith.negf %724 : vector<8x4xf32>
    %726 = math.exp %725 : vector<8x4xf32>
    %cst_160 = arith.constant 1.000000e+00 : f32
    %727 = vector.broadcast %cst_160 : f32 to vector<8x4xf32>
    %728 = arith.addf %727, %726 : vector<8x4xf32>
    %729 = arith.divf %727, %728 : vector<8x4xf32>
    %730 = vector.extract_strided_slice %718 {offsets = [0, 4], sizes = [8, 4], strides = [1, 1]} : vector<8x12xf32> to vector<8x4xf32>
    %731 = vector.extract_strided_slice %721 {offsets = [0, 4], sizes = [8, 4], strides = [1, 1]} : vector<8x12xf32> to vector<8x4xf32>
    %732 = arith.addf %730, %731 : vector<8x4xf32>
    %733 = arith.negf %732 : vector<8x4xf32>
    %734 = math.exp %733 : vector<8x4xf32>
    %cst_161 = arith.constant 1.000000e+00 : f32
    %735 = vector.broadcast %cst_161 : f32 to vector<8x4xf32>
    %736 = arith.addf %735, %734 : vector<8x4xf32>
    %737 = arith.divf %735, %736 : vector<8x4xf32>
    %738 = vector.extract_strided_slice %718 {offsets = [0, 8], sizes = [8, 4], strides = [1, 1]} : vector<8x12xf32> to vector<8x4xf32>
    %739 = vector.extract_strided_slice %721 {offsets = [0, 8], sizes = [8, 4], strides = [1, 1]} : vector<8x12xf32> to vector<8x4xf32>
    %740 = arith.mulf %729, %739 : vector<8x4xf32>
    %741 = arith.addf %738, %740 : vector<8x4xf32>
    %742 = math.tanh %741 : vector<8x4xf32>
    %743 = arith.subf %712, %742 : vector<8x4xf32>
    %744 = arith.mulf %737, %743 : vector<8x4xf32>
    %745 = arith.addf %742, %744 : vector<8x4xf32>
    %746 = arith.index_cast %716 : i32 to index
    %c0_162 = arith.constant 0 : index
    %747 = vector.load %arg10[%746, %c0_162] : memref<128x4xf32, #tpu.memory_space<vmem>>, vector<8x4xf32>
    tpu.vector_store %arg10[%746, %c0_162], %745 {strides = array<i32>} : memref<128x4xf32, #tpu.memory_space<vmem>>, vector<8x4xf32>,
    %c6_i32_163 = arith.constant 6 : i32
    %c8_i32_164 = arith.constant 8 : i32
    %748 = arith.muli %c6_i32_163, %c8_i32_164 : i32
    %749 = tpu.assume_multiple %748, 8 : i32
    %750 = arith.index_cast %749 : i32 to index
    %c0_165 = arith.constant 0 : index
    %751 = vector.load %arg8[%750, %c0_165] : memref<128x12xf32, #tpu.memory_space<vmem>>, vector<8x12xf32>
    %cst_166 = arith.constant dense<0.000000e+00> : vector<8x12xf32>
    %752 = tpu.matmul %745, %9, %cst_166 {dimension_numbers = #tpu.dot_dimension_numbers<[1], [0], [0], [1], [0, 0, 1, 1], [], []>} : vector<8x4xf32>, vector<4x12xf32>, vector<8x12xf32> -> vector<8x12xf32>
    %753 = vector.broadcast %3 : vector<1x12xf32> to vector<8x12xf32>
    %754 = arith.addf %752, %753 : vector<8x12xf32>
    %755 = vector.extract_strided_slice %751 {offsets = [0, 0], sizes = [8, 4], strides = [1, 1]} : vector<8x12xf32> to vector<8x4xf32>
    %756 = vector.extract_strided_slice %754 {offsets = [0, 0], sizes = [8, 4], strides = [1, 1]} : vector<8x12xf32> to vector<8x4xf32>
    %757 = arith.addf %755, %756 : vector<8x4xf32>
    %758 = arith.negf %757 : vector<8x4xf32>
    %759 = math.exp %758 : vector<8x4xf32>
    %cst_167 = arith.constant 1.000000e+00 : f32
    %760 = vector.broadcast %cst_167 : f32 to vector<8x4xf32>
    %761 = arith.addf %760, %759 : vector<8x4xf32>
    %762 = arith.divf %760, %761 : vector<8x4xf32>
    %763 = vector.extract_strided_slice %751 {offsets = [0, 4], sizes = [8, 4], strides = [1, 1]} : vector<8x12xf32> to vector<8x4xf32>
    %764 = vector.extract_strided_slice %754 {offsets = [0, 4], sizes = [8, 4], strides = [1, 1]} : vector<8x12xf32> to vector<8x4xf32>
    %765 = arith.addf %763, %764 : vector<8x4xf32>
    %766 = arith.negf %765 : vector<8x4xf32>
    %767 = math.exp %766 : vector<8x4xf32>
    %cst_168 = arith.constant 1.000000e+00 : f32
    %768 = vector.broadcast %cst_168 : f32 to vector<8x4xf32>
    %769 = arith.addf %768, %767 : vector<8x4xf32>
    %770 = arith.divf %768, %769 : vector<8x4xf32>
    %771 = vector.extract_strided_slice %751 {offsets = [0, 8], sizes = [8, 4], strides = [1, 1]} : vector<8x12xf32> to vector<8x4xf32>
    %772 = vector.extract_strided_slice %754 {offsets = [0, 8], sizes = [8, 4], strides = [1, 1]} : vector<8x12xf32> to vector<8x4xf32>
    %773 = arith.mulf %762, %772 : vector<8x4xf32>
    %774 = arith.addf %771, %773 : vector<8x4xf32>
    %775 = math.tanh %774 : vector<8x4xf32>
    %776 = arith.subf %745, %775 : vector<8x4xf32>
    %777 = arith.mulf %770, %776 : vector<8x4xf32>
    %778 = arith.addf %775, %777 : vector<8x4xf32>
    %779 = arith.index_cast %749 : i32 to index
    %c0_169 = arith.constant 0 : index
    %780 = vector.load %arg10[%779, %c0_169] : memref<128x4xf32, #tpu.memory_space<vmem>>, vector<8x4xf32>
    tpu.vector_store %arg10[%779, %c0_169], %778 {strides = array<i32>} : memref<128x4xf32, #tpu.memory_space<vmem>>, vector<8x4xf32>,
    %c7_i32_170 = arith.constant 7 : i32
    %c8_i32_171 = arith.constant 8 : i32
    %781 = arith.muli %c7_i32_170, %c8_i32_171 : i32
    %782 = tpu.assume_multiple %781, 8 : i32
    %783 = arith.index_cast %782 : i32 to index
    %c0_172 = arith.constant 0 : index
    %784 = vector.load %arg8[%783, %c0_172] : memref<128x12xf32, #tpu.memory_space<vmem>>, vector<8x12xf32>
    %cst_173 = arith.constant dense<0.000000e+00> : vector<8x12xf32>
    %785 = tpu.matmul %778, %9, %cst_173 {dimension_numbers = #tpu.dot_dimension_numbers<[1], [0], [0], [1], [0, 0, 1, 1], [], []>} : vector<8x4xf32>, vector<4x12xf32>, vector<8x12xf32> -> vector<8x12xf32>
    %786 = vector.broadcast %3 : vector<1x12xf32> to vector<8x12xf32>
    %787 = arith.addf %785, %786 : vector<8x12xf32>
    %788 = vector.extract_strided_slice %784 {offsets = [0, 0], sizes = [8, 4], strides = [1, 1]} : vector<8x12xf32> to vector<8x4xf32>
    %789 = vector.extract_strided_slice %787 {offsets = [0, 0], sizes = [8, 4], strides = [1, 1]} : vector<8x12xf32> to vector<8x4xf32>
    %790 = arith.addf %788, %789 : vector<8x4xf32>
    %791 = arith.negf %790 : vector<8x4xf32>
    %792 = math.exp %791 : vector<8x4xf32>
    %cst_174 = arith.constant 1.000000e+00 : f32
    %793 = vector.broadcast %cst_174 : f32 to vector<8x4xf32>
    %794 = arith.addf %793, %792 : vector<8x4xf32>
    %795 = arith.divf %793, %794 : vector<8x4xf32>
    %796 = vector.extract_strided_slice %784 {offsets = [0, 4], sizes = [8, 4], strides = [1, 1]} : vector<8x12xf32> to vector<8x4xf32>
    %797 = vector.extract_strided_slice %787 {offsets = [0, 4], sizes = [8, 4], strides = [1, 1]} : vector<8x12xf32> to vector<8x4xf32>
    %798 = arith.addf %796, %797 : vector<8x4xf32>
    %799 = arith.negf %798 : vector<8x4xf32>
    %800 = math.exp %799 : vector<8x4xf32>
    %cst_175 = arith.constant 1.000000e+00 : f32
    %801 = vector.broadcast %cst_175 : f32 to vector<8x4xf32>
    %802 = arith.addf %801, %800 : vector<8x4xf32>
    %803 = arith.divf %801, %802 : vector<8x4xf32>
    %804 = vector.extract_strided_slice %784 {offsets = [0, 8], sizes = [8, 4], strides = [1, 1]} : vector<8x12xf32> to vector<8x4xf32>
    %805 = vector.extract_strided_slice %787 {offsets = [0, 8], sizes = [8, 4], strides = [1, 1]} : vector<8x12xf32> to vector<8x4xf32>
    %806 = arith.mulf %795, %805 : vector<8x4xf32>
    %807 = arith.addf %804, %806 : vector<8x4xf32>
    %808 = math.tanh %807 : vector<8x4xf32>
    %809 = arith.subf %778, %808 : vector<8x4xf32>
    %810 = arith.mulf %803, %809 : vector<8x4xf32>
    %811 = arith.addf %808, %810 : vector<8x4xf32>
    %812 = arith.index_cast %782 : i32 to index
    %c0_176 = arith.constant 0 : index
    %813 = vector.load %arg10[%812, %c0_176] : memref<128x4xf32, #tpu.memory_space<vmem>>, vector<8x4xf32>
    tpu.vector_store %arg10[%812, %c0_176], %811 {strides = array<i32>} : memref<128x4xf32, #tpu.memory_space<vmem>>, vector<8x4xf32>,
    %c8_i32_177 = arith.constant 8 : i32
    %c8_i32_178 = arith.constant 8 : i32
    %814 = arith.muli %c8_i32_177, %c8_i32_178 : i32
    %815 = tpu.assume_multiple %814, 8 : i32
    %816 = arith.index_cast %815 : i32 to index
    %c0_179 = arith.constant 0 : index
    %817 = vector.load %arg8[%816, %c0_179] : memref<128x12xf32, #tpu.memory_space<vmem>>, vector<8x12xf32>
    %cst_180 = arith.constant dense<0.000000e+00> : vector<8x12xf32>
    %818 = tpu.matmul %811, %9, %cst_180 {dimension_numbers = #tpu.dot_dimension_numbers<[1], [0], [0], [1], [0, 0, 1, 1], [], []>} : vector<8x4xf32>, vector<4x12xf32>, vector<8x12xf32> -> vector<8x12xf32>
    %819 = vector.broadcast %3 : vector<1x12xf32> to vector<8x12xf32>
    %820 = arith.addf %818, %819 : vector<8x12xf32>
    %821 = vector.extract_strided_slice %817 {offsets = [0, 0], sizes = [8, 4], strides = [1, 1]} : vector<8x12xf32> to vector<8x4xf32>
    %822 = vector.extract_strided_slice %820 {offsets = [0, 0], sizes = [8, 4], strides = [1, 1]} : vector<8x12xf32> to vector<8x4xf32>
    %823 = arith.addf %821, %822 : vector<8x4xf32>
    %824 = arith.negf %823 : vector<8x4xf32>
    %825 = math.exp %824 : vector<8x4xf32>
    %cst_181 = arith.constant 1.000000e+00 : f32
    %826 = vector.broadcast %cst_181 : f32 to vector<8x4xf32>
    %827 = arith.addf %826, %825 : vector<8x4xf32>
    %828 = arith.divf %826, %827 : vector<8x4xf32>
    %829 = vector.extract_strided_slice %817 {offsets = [0, 4], sizes = [8, 4], strides = [1, 1]} : vector<8x12xf32> to vector<8x4xf32>
    %830 = vector.extract_strided_slice %820 {offsets = [0, 4], sizes = [8, 4], strides = [1, 1]} : vector<8x12xf32> to vector<8x4xf32>
    %831 = arith.addf %829, %830 : vector<8x4xf32>
    %832 = arith.negf %831 : vector<8x4xf32>
    %833 = math.exp %832 : vector<8x4xf32>
    %cst_182 = arith.constant 1.000000e+00 : f32
    %834 = vector.broadcast %cst_182 : f32 to vector<8x4xf32>
    %835 = arith.addf %834, %833 : vector<8x4xf32>
    %836 = arith.divf %834, %835 : vector<8x4xf32>
    %837 = vector.extract_strided_slice %817 {offsets = [0, 8], sizes = [8, 4], strides = [1, 1]} : vector<8x12xf32> to vector<8x4xf32>
    %838 = vector.extract_strided_slice %820 {offsets = [0, 8], sizes = [8, 4], strides = [1, 1]} : vector<8x12xf32> to vector<8x4xf32>
    %839 = arith.mulf %828, %838 : vector<8x4xf32>
    %840 = arith.addf %837, %839 : vector<8x4xf32>
    %841 = math.tanh %840 : vector<8x4xf32>
    %842 = arith.subf %811, %841 : vector<8x4xf32>
    %843 = arith.mulf %836, %842 : vector<8x4xf32>
    %844 = arith.addf %841, %843 : vector<8x4xf32>
    %845 = arith.index_cast %815 : i32 to index
    %c0_183 = arith.constant 0 : index
    %846 = vector.load %arg10[%845, %c0_183] : memref<128x4xf32, #tpu.memory_space<vmem>>, vector<8x4xf32>
    tpu.vector_store %arg10[%845, %c0_183], %844 {strides = array<i32>} : memref<128x4xf32, #tpu.memory_space<vmem>>, vector<8x4xf32>,
    %c9_i32_184 = arith.constant 9 : i32
    %c8_i32_185 = arith.constant 8 : i32
    %847 = arith.muli %c9_i32_184, %c8_i32_185 : i32
    %848 = tpu.assume_multiple %847, 8 : i32
    %849 = arith.index_cast %848 : i32 to index
    %c0_186 = arith.constant 0 : index
    %850 = vector.load %arg8[%849, %c0_186] : memref<128x12xf32, #tpu.memory_space<vmem>>, vector<8x12xf32>
    %cst_187 = arith.constant dense<0.000000e+00> : vector<8x12xf32>
    %851 = tpu.matmul %844, %9, %cst_187 {dimension_numbers = #tpu.dot_dimension_numbers<[1], [0], [0], [1], [0, 0, 1, 1], [], []>} : vector<8x4xf32>, vector<4x12xf32>, vector<8x12xf32> -> vector<8x12xf32>
    %852 = vector.broadcast %3 : vector<1x12xf32> to vector<8x12xf32>
    %853 = arith.addf %851, %852 : vector<8x12xf32>
    %854 = vector.extract_strided_slice %850 {offsets = [0, 0], sizes = [8, 4], strides = [1, 1]} : vector<8x12xf32> to vector<8x4xf32>
    %855 = vector.extract_strided_slice %853 {offsets = [0, 0], sizes = [8, 4], strides = [1, 1]} : vector<8x12xf32> to vector<8x4xf32>
    %856 = arith.addf %854, %855 : vector<8x4xf32>
    %857 = arith.negf %856 : vector<8x4xf32>
    %858 = math.exp %857 : vector<8x4xf32>
    %cst_188 = arith.constant 1.000000e+00 : f32
    %859 = vector.broadcast %cst_188 : f32 to vector<8x4xf32>
    %860 = arith.addf %859, %858 : vector<8x4xf32>
    %861 = arith.divf %859, %860 : vector<8x4xf32>
    %862 = vector.extract_strided_slice %850 {offsets = [0, 4], sizes = [8, 4], strides = [1, 1]} : vector<8x12xf32> to vector<8x4xf32>
    %863 = vector.extract_strided_slice %853 {offsets = [0, 4], sizes = [8, 4], strides = [1, 1]} : vector<8x12xf32> to vector<8x4xf32>
    %864 = arith.addf %862, %863 : vector<8x4xf32>
    %865 = arith.negf %864 : vector<8x4xf32>
    %866 = math.exp %865 : vector<8x4xf32>
    %cst_189 = arith.constant 1.000000e+00 : f32
    %867 = vector.broadcast %cst_189 : f32 to vector<8x4xf32>
    %868 = arith.addf %867, %866 : vector<8x4xf32>
    %869 = arith.divf %867, %868 : vector<8x4xf32>
    %870 = vector.extract_strided_slice %850 {offsets = [0, 8], sizes = [8, 4], strides = [1, 1]} : vector<8x12xf32> to vector<8x4xf32>
    %871 = vector.extract_strided_slice %853 {offsets = [0, 8], sizes = [8, 4], strides = [1, 1]} : vector<8x12xf32> to vector<8x4xf32>
    %872 = arith.mulf %861, %871 : vector<8x4xf32>
    %873 = arith.addf %870, %872 : vector<8x4xf32>
    %874 = math.tanh %873 : vector<8x4xf32>
    %875 = arith.subf %844, %874 : vector<8x4xf32>
    %876 = arith.mulf %869, %875 : vector<8x4xf32>
    %877 = arith.addf %874, %876 : vector<8x4xf32>
    %878 = arith.index_cast %848 : i32 to index
    %c0_190 = arith.constant 0 : index
    %879 = vector.load %arg10[%878, %c0_190] : memref<128x4xf32, #tpu.memory_space<vmem>>, vector<8x4xf32>
    tpu.vector_store %arg10[%878, %c0_190], %877 {strides = array<i32>} : memref<128x4xf32, #tpu.memory_space<vmem>>, vector<8x4xf32>,
    %c10_i32_191 = arith.constant 10 : i32
    %c8_i32_192 = arith.constant 8 : i32
    %880 = arith.muli %c10_i32_191, %c8_i32_192 : i32
    %881 = tpu.assume_multiple %880, 8 : i32
    %882 = arith.index_cast %881 : i32 to index
    %c0_193 = arith.constant 0 : index
    %883 = vector.load %arg8[%882, %c0_193] : memref<128x12xf32, #tpu.memory_space<vmem>>, vector<8x12xf32>
    %cst_194 = arith.constant dense<0.000000e+00> : vector<8x12xf32>
    %884 = tpu.matmul %877, %9, %cst_194 {dimension_numbers = #tpu.dot_dimension_numbers<[1], [0], [0], [1], [0, 0, 1, 1], [], []>} : vector<8x4xf32>, vector<4x12xf32>, vector<8x12xf32> -> vector<8x12xf32>
    %885 = vector.broadcast %3 : vector<1x12xf32> to vector<8x12xf32>
    %886 = arith.addf %884, %885 : vector<8x12xf32>
    %887 = vector.extract_strided_slice %883 {offsets = [0, 0], sizes = [8, 4], strides = [1, 1]} : vector<8x12xf32> to vector<8x4xf32>
    %888 = vector.extract_strided_slice %886 {offsets = [0, 0], sizes = [8, 4], strides = [1, 1]} : vector<8x12xf32> to vector<8x4xf32>
    %889 = arith.addf %887, %888 : vector<8x4xf32>
    %890 = arith.negf %889 : vector<8x4xf32>
    %891 = math.exp %890 : vector<8x4xf32>
    %cst_195 = arith.constant 1.000000e+00 : f32
    %892 = vector.broadcast %cst_195 : f32 to vector<8x4xf32>
    %893 = arith.addf %892, %891 : vector<8x4xf32>
    %894 = arith.divf %892, %893 : vector<8x4xf32>
    %895 = vector.extract_strided_slice %883 {offsets = [0, 4], sizes = [8, 4], strides = [1, 1]} : vector<8x12xf32> to vector<8x4xf32>
    %896 = vector.extract_strided_slice %886 {offsets = [0, 4], sizes = [8, 4], strides = [1, 1]} : vector<8x12xf32> to vector<8x4xf32>
    %897 = arith.addf %895, %896 : vector<8x4xf32>
    %898 = arith.negf %897 : vector<8x4xf32>
    %899 = math.exp %898 : vector<8x4xf32>
    %cst_196 = arith.constant 1.000000e+00 : f32
    %900 = vector.broadcast %cst_196 : f32 to vector<8x4xf32>
    %901 = arith.addf %900, %899 : vector<8x4xf32>
    %902 = arith.divf %900, %901 : vector<8x4xf32>
    %903 = vector.extract_strided_slice %883 {offsets = [0, 8], sizes = [8, 4], strides = [1, 1]} : vector<8x12xf32> to vector<8x4xf32>
    %904 = vector.extract_strided_slice %886 {offsets = [0, 8], sizes = [8, 4], strides = [1, 1]} : vector<8x12xf32> to vector<8x4xf32>
    %905 = arith.mulf %894, %904 : vector<8x4xf32>
    %906 = arith.addf %903, %905 : vector<8x4xf32>
    %907 = math.tanh %906 : vector<8x4xf32>
    %908 = arith.subf %877, %907 : vector<8x4xf32>
    %909 = arith.mulf %902, %908 : vector<8x4xf32>
    %910 = arith.addf %907, %909 : vector<8x4xf32>
    %911 = arith.index_cast %881 : i32 to index
    %c0_197 = arith.constant 0 : index
    %912 = vector.load %arg10[%911, %c0_197] : memref<128x4xf32, #tpu.memory_space<vmem>>, vector<8x4xf32>
    tpu.vector_store %arg10[%911, %c0_197], %910 {strides = array<i32>} : memref<128x4xf32, #tpu.memory_space<vmem>>, vector<8x4xf32>,
    %c11_i32_198 = arith.constant 11 : i32
    %c8_i32_199 = arith.constant 8 : i32
    %913 = arith.muli %c11_i32_198, %c8_i32_199 : i32
    %914 = tpu.assume_multiple %913, 8 : i32
    %915 = arith.index_cast %914 : i32 to index
    %c0_200 = arith.constant 0 : index
    %916 = vector.load %arg8[%915, %c0_200] : memref<128x12xf32, #tpu.memory_space<vmem>>, vector<8x12xf32>
    %cst_201 = arith.constant dense<0.000000e+00> : vector<8x12xf32>
    %917 = tpu.matmul %910, %9, %cst_201 {dimension_numbers = #tpu.dot_dimension_numbers<[1], [0], [0], [1], [0, 0, 1, 1], [], []>} : vector<8x4xf32>, vector<4x12xf32>, vector<8x12xf32> -> vector<8x12xf32>
    %918 = vector.broadcast %3 : vector<1x12xf32> to vector<8x12xf32>
    %919 = arith.addf %917, %918 : vector<8x12xf32>
    %920 = vector.extract_strided_slice %916 {offsets = [0, 0], sizes = [8, 4], strides = [1, 1]} : vector<8x12xf32> to vector<8x4xf32>
    %921 = vector.extract_strided_slice %919 {offsets = [0, 0], sizes = [8, 4], strides = [1, 1]} : vector<8x12xf32> to vector<8x4xf32>
    %922 = arith.addf %920, %921 : vector<8x4xf32>
    %923 = arith.negf %922 : vector<8x4xf32>
    %924 = math.exp %923 : vector<8x4xf32>
    %cst_202 = arith.constant 1.000000e+00 : f32
    %925 = vector.broadcast %cst_202 : f32 to vector<8x4xf32>
    %926 = arith.addf %925, %924 : vector<8x4xf32>
    %927 = arith.divf %925, %926 : vector<8x4xf32>
    %928 = vector.extract_strided_slice %916 {offsets = [0, 4], sizes = [8, 4], strides = [1, 1]} : vector<8x12xf32> to vector<8x4xf32>
    %929 = vector.extract_strided_slice %919 {offsets = [0, 4], sizes = [8, 4], strides = [1, 1]} : vector<8x12xf32> to vector<8x4xf32>
    %930 = arith.addf %928, %929 : vector<8x4xf32>
    %931 = arith.negf %930 : vector<8x4xf32>
    %932 = math.exp %931 : vector<8x4xf32>
    %cst_203 = arith.constant 1.000000e+00 : f32
    %933 = vector.broadcast %cst_203 : f32 to vector<8x4xf32>
    %934 = arith.addf %933, %932 : vector<8x4xf32>
    %935 = arith.divf %933, %934 : vector<8x4xf32>
    %936 = vector.extract_strided_slice %916 {offsets = [0, 8], sizes = [8, 4], strides = [1, 1]} : vector<8x12xf32> to vector<8x4xf32>
    %937 = vector.extract_strided_slice %919 {offsets = [0, 8], sizes = [8, 4], strides = [1, 1]} : vector<8x12xf32> to vector<8x4xf32>
    %938 = arith.mulf %927, %937 : vector<8x4xf32>
    %939 = arith.addf %936, %938 : vector<8x4xf32>
    %940 = math.tanh %939 : vector<8x4xf32>
    %941 = arith.subf %910, %940 : vector<8x4xf32>
    %942 = arith.mulf %935, %941 : vector<8x4xf32>
    %943 = arith.addf %940, %942 : vector<8x4xf32>
    %944 = arith.index_cast %914 : i32 to index
    %c0_204 = arith.constant 0 : index
    %945 = vector.load %arg10[%944, %c0_204] : memref<128x4xf32, #tpu.memory_space<vmem>>, vector<8x4xf32>
    tpu.vector_store %arg10[%944, %c0_204], %943 {strides = array<i32>} : memref<128x4xf32, #tpu.memory_space<vmem>>, vector<8x4xf32>,
    %c12_i32_205 = arith.constant 12 : i32
    %c8_i32_206 = arith.constant 8 : i32
    %946 = arith.muli %c12_i32_205, %c8_i32_206 : i32
    %947 = tpu.assume_multiple %946, 8 : i32
    %948 = arith.index_cast %947 : i32 to index
    %c0_207 = arith.constant 0 : index
    %949 = vector.load %arg8[%948, %c0_207] : memref<128x12xf32, #tpu.memory_space<vmem>>, vector<8x12xf32>
    %cst_208 = arith.constant dense<0.000000e+00> : vector<8x12xf32>
    %950 = tpu.matmul %943, %9, %cst_208 {dimension_numbers = #tpu.dot_dimension_numbers<[1], [0], [0], [1], [0, 0, 1, 1], [], []>} : vector<8x4xf32>, vector<4x12xf32>, vector<8x12xf32> -> vector<8x12xf32>
    %951 = vector.broadcast %3 : vector<1x12xf32> to vector<8x12xf32>
    %952 = arith.addf %950, %951 : vector<8x12xf32>
    %953 = vector.extract_strided_slice %949 {offsets = [0, 0], sizes = [8, 4], strides = [1, 1]} : vector<8x12xf32> to vector<8x4xf32>
    %954 = vector.extract_strided_slice %952 {offsets = [0, 0], sizes = [8, 4], strides = [1, 1]} : vector<8x12xf32> to vector<8x4xf32>
    %955 = arith.addf %953, %954 : vector<8x4xf32>
    %956 = arith.negf %955 : vector<8x4xf32>
    %957 = math.exp %956 : vector<8x4xf32>
    %cst_209 = arith.constant 1.000000e+00 : f32
    %958 = vector.broadcast %cst_209 : f32 to vector<8x4xf32>
    %959 = arith.addf %958, %957 : vector<8x4xf32>
    %960 = arith.divf %958, %959 : vector<8x4xf32>
    %961 = vector.extract_strided_slice %949 {offsets = [0, 4], sizes = [8, 4], strides = [1, 1]} : vector<8x12xf32> to vector<8x4xf32>
    %962 = vector.extract_strided_slice %952 {offsets = [0, 4], sizes = [8, 4], strides = [1, 1]} : vector<8x12xf32> to vector<8x4xf32>
    %963 = arith.addf %961, %962 : vector<8x4xf32>
    %964 = arith.negf %963 : vector<8x4xf32>
    %965 = math.exp %964 : vector<8x4xf32>
    %cst_210 = arith.constant 1.000000e+00 : f32
    %966 = vector.broadcast %cst_210 : f32 to vector<8x4xf32>
    %967 = arith.addf %966, %965 : vector<8x4xf32>
    %968 = arith.divf %966, %967 : vector<8x4xf32>
    %969 = vector.extract_strided_slice %949 {offsets = [0, 8], sizes = [8, 4], strides = [1, 1]} : vector<8x12xf32> to vector<8x4xf32>
    %970 = vector.extract_strided_slice %952 {offsets = [0, 8], sizes = [8, 4], strides = [1, 1]} : vector<8x12xf32> to vector<8x4xf32>
    %971 = arith.mulf %960, %970 : vector<8x4xf32>
    %972 = arith.addf %969, %971 : vector<8x4xf32>
    %973 = math.tanh %972 : vector<8x4xf32>
    %974 = arith.subf %943, %973 : vector<8x4xf32>
    %975 = arith.mulf %968, %974 : vector<8x4xf32>
    %976 = arith.addf %973, %975 : vector<8x4xf32>
    %977 = arith.index_cast %947 : i32 to index
    %c0_211 = arith.constant 0 : index
    %978 = vector.load %arg10[%977, %c0_211] : memref<128x4xf32, #tpu.memory_space<vmem>>, vector<8x4xf32>
    tpu.vector_store %arg10[%977, %c0_211], %976 {strides = array<i32>} : memref<128x4xf32, #tpu.memory_space<vmem>>, vector<8x4xf32>,
    %c13_i32_212 = arith.constant 13 : i32
    %c8_i32_213 = arith.constant 8 : i32
    %979 = arith.muli %c13_i32_212, %c8_i32_213 : i32
    %980 = tpu.assume_multiple %979, 8 : i32
    %981 = arith.index_cast %980 : i32 to index
    %c0_214 = arith.constant 0 : index
    %982 = vector.load %arg8[%981, %c0_214] : memref<128x12xf32, #tpu.memory_space<vmem>>, vector<8x12xf32>
    %cst_215 = arith.constant dense<0.000000e+00> : vector<8x12xf32>
    %983 = tpu.matmul %976, %9, %cst_215 {dimension_numbers = #tpu.dot_dimension_numbers<[1], [0], [0], [1], [0, 0, 1, 1], [], []>} : vector<8x4xf32>, vector<4x12xf32>, vector<8x12xf32> -> vector<8x12xf32>
    %984 = vector.broadcast %3 : vector<1x12xf32> to vector<8x12xf32>
    %985 = arith.addf %983, %984 : vector<8x12xf32>
    %986 = vector.extract_strided_slice %982 {offsets = [0, 0], sizes = [8, 4], strides = [1, 1]} : vector<8x12xf32> to vector<8x4xf32>
    %987 = vector.extract_strided_slice %985 {offsets = [0, 0], sizes = [8, 4], strides = [1, 1]} : vector<8x12xf32> to vector<8x4xf32>
    %988 = arith.addf %986, %987 : vector<8x4xf32>
    %989 = arith.negf %988 : vector<8x4xf32>
    %990 = math.exp %989 : vector<8x4xf32>
    %cst_216 = arith.constant 1.000000e+00 : f32
    %991 = vector.broadcast %cst_216 : f32 to vector<8x4xf32>
    %992 = arith.addf %991, %990 : vector<8x4xf32>
    %993 = arith.divf %991, %992 : vector<8x4xf32>
    %994 = vector.extract_strided_slice %982 {offsets = [0, 4], sizes = [8, 4], strides = [1, 1]} : vector<8x12xf32> to vector<8x4xf32>
    %995 = vector.extract_strided_slice %985 {offsets = [0, 4], sizes = [8, 4], strides = [1, 1]} : vector<8x12xf32> to vector<8x4xf32>
    %996 = arith.addf %994, %995 : vector<8x4xf32>
    %997 = arith.negf %996 : vector<8x4xf32>
    %998 = math.exp %997 : vector<8x4xf32>
    %cst_217 = arith.constant 1.000000e+00 : f32
    %999 = vector.broadcast %cst_217 : f32 to vector<8x4xf32>
    %1000 = arith.addf %999, %998 : vector<8x4xf32>
    %1001 = arith.divf %999, %1000 : vector<8x4xf32>
    %1002 = vector.extract_strided_slice %982 {offsets = [0, 8], sizes = [8, 4], strides = [1, 1]} : vector<8x12xf32> to vector<8x4xf32>
    %1003 = vector.extract_strided_slice %985 {offsets = [0, 8], sizes = [8, 4], strides = [1, 1]} : vector<8x12xf32> to vector<8x4xf32>
    %1004 = arith.mulf %993, %1003 : vector<8x4xf32>
    %1005 = arith.addf %1002, %1004 : vector<8x4xf32>
    %1006 = math.tanh %1005 : vector<8x4xf32>
    %1007 = arith.subf %976, %1006 : vector<8x4xf32>
    %1008 = arith.mulf %1001, %1007 : vector<8x4xf32>
    %1009 = arith.addf %1006, %1008 : vector<8x4xf32>
    %1010 = arith.index_cast %980 : i32 to index
    %c0_218 = arith.constant 0 : index
    %1011 = vector.load %arg10[%1010, %c0_218] : memref<128x4xf32, #tpu.memory_space<vmem>>, vector<8x4xf32>
    tpu.vector_store %arg10[%1010, %c0_218], %1009 {strides = array<i32>} : memref<128x4xf32, #tpu.memory_space<vmem>>, vector<8x4xf32>,
    %c14_i32_219 = arith.constant 14 : i32
    %c8_i32_220 = arith.constant 8 : i32
    %1012 = arith.muli %c14_i32_219, %c8_i32_220 : i32
    %1013 = tpu.assume_multiple %1012, 8 : i32
    %1014 = arith.index_cast %1013 : i32 to index
    %c0_221 = arith.constant 0 : index
    %1015 = vector.load %arg8[%1014, %c0_221] : memref<128x12xf32, #tpu.memory_space<vmem>>, vector<8x12xf32>
    %cst_222 = arith.constant dense<0.000000e+00> : vector<8x12xf32>
    %1016 = tpu.matmul %1009, %9, %cst_222 {dimension_numbers = #tpu.dot_dimension_numbers<[1], [0], [0], [1], [0, 0, 1, 1], [], []>} : vector<8x4xf32>, vector<4x12xf32>, vector<8x12xf32> -> vector<8x12xf32>
    %1017 = vector.broadcast %3 : vector<1x12xf32> to vector<8x12xf32>
    %1018 = arith.addf %1016, %1017 : vector<8x12xf32>
    %1019 = vector.extract_strided_slice %1015 {offsets = [0, 0], sizes = [8, 4], strides = [1, 1]} : vector<8x12xf32> to vector<8x4xf32>
    %1020 = vector.extract_strided_slice %1018 {offsets = [0, 0], sizes = [8, 4], strides = [1, 1]} : vector<8x12xf32> to vector<8x4xf32>
    %1021 = arith.addf %1019, %1020 : vector<8x4xf32>
    %1022 = arith.negf %1021 : vector<8x4xf32>
    %1023 = math.exp %1022 : vector<8x4xf32>
    %cst_223 = arith.constant 1.000000e+00 : f32
    %1024 = vector.broadcast %cst_223 : f32 to vector<8x4xf32>
    %1025 = arith.addf %1024, %1023 : vector<8x4xf32>
    %1026 = arith.divf %1024, %1025 : vector<8x4xf32>
    %1027 = vector.extract_strided_slice %1015 {offsets = [0, 4], sizes = [8, 4], strides = [1, 1]} : vector<8x12xf32> to vector<8x4xf32>
    %1028 = vector.extract_strided_slice %1018 {offsets = [0, 4], sizes = [8, 4], strides = [1, 1]} : vector<8x12xf32> to vector<8x4xf32>
    %1029 = arith.addf %1027, %1028 : vector<8x4xf32>
    %1030 = arith.negf %1029 : vector<8x4xf32>
    %1031 = math.exp %1030 : vector<8x4xf32>
    %cst_224 = arith.constant 1.000000e+00 : f32
    %1032 = vector.broadcast %cst_224 : f32 to vector<8x4xf32>
    %1033 = arith.addf %1032, %1031 : vector<8x4xf32>
    %1034 = arith.divf %1032, %1033 : vector<8x4xf32>
    %1035 = vector.extract_strided_slice %1015 {offsets = [0, 8], sizes = [8, 4], strides = [1, 1]} : vector<8x12xf32> to vector<8x4xf32>
    %1036 = vector.extract_strided_slice %1018 {offsets = [0, 8], sizes = [8, 4], strides = [1, 1]} : vector<8x12xf32> to vector<8x4xf32>
    %1037 = arith.mulf %1026, %1036 : vector<8x4xf32>
    %1038 = arith.addf %1035, %1037 : vector<8x4xf32>
    %1039 = math.tanh %1038 : vector<8x4xf32>
    %1040 = arith.subf %1009, %1039 : vector<8x4xf32>
    %1041 = arith.mulf %1034, %1040 : vector<8x4xf32>
    %1042 = arith.addf %1039, %1041 : vector<8x4xf32>
    %1043 = arith.index_cast %1013 : i32 to index
    %c0_225 = arith.constant 0 : index
    %1044 = vector.load %arg10[%1043, %c0_225] : memref<128x4xf32, #tpu.memory_space<vmem>>, vector<8x4xf32>
    tpu.vector_store %arg10[%1043, %c0_225], %1042 {strides = array<i32>} : memref<128x4xf32, #tpu.memory_space<vmem>>, vector<8x4xf32>,
    %c15_i32_226 = arith.constant 15 : i32
    %c8_i32_227 = arith.constant 8 : i32
    %1045 = arith.muli %c15_i32_226, %c8_i32_227 : i32
    %1046 = tpu.assume_multiple %1045, 8 : i32
    %1047 = arith.index_cast %1046 : i32 to index
    %c0_228 = arith.constant 0 : index
    %1048 = vector.load %arg8[%1047, %c0_228] : memref<128x12xf32, #tpu.memory_space<vmem>>, vector<8x12xf32>
    %cst_229 = arith.constant dense<0.000000e+00> : vector<8x12xf32>
    %1049 = tpu.matmul %1042, %9, %cst_229 {dimension_numbers = #tpu.dot_dimension_numbers<[1], [0], [0], [1], [0, 0, 1, 1], [], []>} : vector<8x4xf32>, vector<4x12xf32>, vector<8x12xf32> -> vector<8x12xf32>
    %1050 = vector.broadcast %3 : vector<1x12xf32> to vector<8x12xf32>
    %1051 = arith.addf %1049, %1050 : vector<8x12xf32>
    %1052 = vector.extract_strided_slice %1048 {offsets = [0, 0], sizes = [8, 4], strides = [1, 1]} : vector<8x12xf32> to vector<8x4xf32>
    %1053 = vector.extract_strided_slice %1051 {offsets = [0, 0], sizes = [8, 4], strides = [1, 1]} : vector<8x12xf32> to vector<8x4xf32>
    %1054 = arith.addf %1052, %1053 : vector<8x4xf32>
    %1055 = arith.negf %1054 : vector<8x4xf32>
    %1056 = math.exp %1055 : vector<8x4xf32>
    %cst_230 = arith.constant 1.000000e+00 : f32
    %1057 = vector.broadcast %cst_230 : f32 to vector<8x4xf32>
    %1058 = arith.addf %1057, %1056 : vector<8x4xf32>
    %1059 = arith.divf %1057, %1058 : vector<8x4xf32>
    %1060 = vector.extract_strided_slice %1048 {offsets = [0, 4], sizes = [8, 4], strides = [1, 1]} : vector<8x12xf32> to vector<8x4xf32>
    %1061 = vector.extract_strided_slice %1051 {offsets = [0, 4], sizes = [8, 4], strides = [1, 1]} : vector<8x12xf32> to vector<8x4xf32>
    %1062 = arith.addf %1060, %1061 : vector<8x4xf32>
    %1063 = arith.negf %1062 : vector<8x4xf32>
    %1064 = math.exp %1063 : vector<8x4xf32>
    %cst_231 = arith.constant 1.000000e+00 : f32
    %1065 = vector.broadcast %cst_231 : f32 to vector<8x4xf32>
    %1066 = arith.addf %1065, %1064 : vector<8x4xf32>
    %1067 = arith.divf %1065, %1066 : vector<8x4xf32>
    %1068 = vector.extract_strided_slice %1048 {offsets = [0, 8], sizes = [8, 4], strides = [1, 1]} : vector<8x12xf32> to vector<8x4xf32>
    %1069 = vector.extract_strided_slice %1051 {offsets = [0, 8], sizes = [8, 4], strides = [1, 1]} : vector<8x12xf32> to vector<8x4xf32>
    %1070 = arith.mulf %1059, %1069 : vector<8x4xf32>
    %1071 = arith.addf %1068, %1070 : vector<8x4xf32>
    %1072 = math.tanh %1071 : vector<8x4xf32>
    %1073 = arith.subf %1042, %1072 : vector<8x4xf32>
    %1074 = arith.mulf %1067, %1073 : vector<8x4xf32>
    %1075 = arith.addf %1072, %1074 : vector<8x4xf32>
    %1076 = arith.index_cast %1046 : i32 to index
    %c0_232 = arith.constant 0 : index
    %1077 = vector.load %arg10[%1076, %c0_232] : memref<128x4xf32, #tpu.memory_space<vmem>>, vector<8x4xf32>
    tpu.vector_store %arg10[%1076, %c0_232], %1075 {strides = array<i32>} : memref<128x4xf32, #tpu.memory_space<vmem>>, vector<8x4xf32>,
    %c16_i32_233 = arith.constant 16 : i32
    %c0_234 = arith.constant 0 : index
    %c0_235 = arith.constant 0 : index
    %1078 = vector.load %arg10[%c0_234, %c0_235] : memref<128x4xf32, #tpu.memory_space<vmem>>, vector<128x4xf32>
    %1079 = vector.extract_strided_slice %1078 {offsets = [0, 0], sizes = [128, 1], strides = [1, 1]} : vector<128x4xf32> to vector<128x1xf32>
    %c0_236 = arith.constant 0 : index
    %c0_237 = arith.constant 0 : index
    %c0_238 = arith.constant 0 : index
    %1080 = vector.load %arg4[%c0_236, %c0_237, %c0_238] : memref<4x128x32xf32, #tpu.memory_space<vmem>>, vector<1x128x32xf32>
    %1081 = vector.shape_cast %1080 : vector<1x128x32xf32> to vector<128x32xf32>
    %1082 = vector.broadcast %1079 : vector<128x1xf32> to vector<128x32xf32>
    %1083 = arith.mulf %1082, %1081 : vector<128x32xf32>
    %1084 = vector.extract_strided_slice %1078 {offsets = [0, 1], sizes = [128, 1], strides = [1, 1]} : vector<128x4xf32> to vector<128x1xf32>
    %c1_239 = arith.constant 1 : index
    %c0_240 = arith.constant 0 : index
    %c0_241 = arith.constant 0 : index
    %1085 = vector.load %arg4[%c1_239, %c0_240, %c0_241] : memref<4x128x32xf32, #tpu.memory_space<vmem>>, vector<1x128x32xf32>
    %1086 = vector.shape_cast %1085 : vector<1x128x32xf32> to vector<128x32xf32>
    %1087 = vector.broadcast %1084 : vector<128x1xf32> to vector<128x32xf32>
    %1088 = arith.mulf %1087, %1086 : vector<128x32xf32>
    %1089 = arith.addf %1083, %1088 : vector<128x32xf32>
    %1090 = vector.extract_strided_slice %1078 {offsets = [0, 2], sizes = [128, 1], strides = [1, 1]} : vector<128x4xf32> to vector<128x1xf32>
    %c2_242 = arith.constant 2 : index
    %c0_243 = arith.constant 0 : index
    %c0_244 = arith.constant 0 : index
    %1091 = vector.load %arg4[%c2_242, %c0_243, %c0_244] : memref<4x128x32xf32, #tpu.memory_space<vmem>>, vector<1x128x32xf32>
    %1092 = vector.shape_cast %1091 : vector<1x128x32xf32> to vector<128x32xf32>
    %1093 = vector.broadcast %1090 : vector<128x1xf32> to vector<128x32xf32>
    %1094 = arith.mulf %1093, %1092 : vector<128x32xf32>
    %1095 = arith.addf %1089, %1094 : vector<128x32xf32>
    %1096 = vector.extract_strided_slice %1078 {offsets = [0, 3], sizes = [128, 1], strides = [1, 1]} : vector<128x4xf32> to vector<128x1xf32>
    %c3_245 = arith.constant 3 : index
    %c0_246 = arith.constant 0 : index
    %c0_247 = arith.constant 0 : index
    %1097 = vector.load %arg4[%c3_245, %c0_246, %c0_247] : memref<4x128x32xf32, #tpu.memory_space<vmem>>, vector<1x128x32xf32>
    %1098 = vector.shape_cast %1097 : vector<1x128x32xf32> to vector<128x32xf32>
    %1099 = vector.broadcast %1096 : vector<128x1xf32> to vector<128x32xf32>
    %1100 = arith.mulf %1099, %1098 : vector<128x32xf32>
    %1101 = arith.addf %1095, %1100 : vector<128x32xf32>
    %c0_248 = arith.constant 0 : index
    %c0_249 = arith.constant 0 : index
    %1102 = vector.load %arg5[%c0_248, %c0_249] : memref<1x32xf32, #tpu.memory_space<vmem>>, vector<1x32xf32>
    %cst_250 = arith.constant dense<0.000000e+00> : vector<32xf32>
    %1103 = vector.multi_reduction <add>, %1101, %cst_250 [0] : vector<128x32xf32> to vector<32xf32>
    %1104 = vector.shape_cast %1103 : vector<32xf32> to vector<1x32xf32>
    %1105 = arith.addf %1102, %1104 : vector<1x32xf32>
    %cst_251 = arith.constant 0.000000e+00 : f32
    %1106 = vector.broadcast %cst_251 : f32 to vector<1x32xf32>
    %1107 = arith.cmpf oge, %1105, %1106 : vector<1x32xf32>
    %cst_252 = arith.constant 0.00999999977 : f32
    %1108 = vector.broadcast %cst_252 : f32 to vector<1x32xf32>
    %1109 = arith.mulf %1108, %1105 : vector<1x32xf32>
    %1110 = arith.select %1107, %1105, %1109 : vector<1x32xi1>, vector<1x32xf32>
    %c0_253 = arith.constant 0 : index
    %c0_254 = arith.constant 0 : index
    %1111 = vector.load %arg6[%c0_253, %c0_254] : memref<1x32xf32, #tpu.memory_space<vmem>>, vector<1x32xf32>
    tpu.vector_store %arg6[%c0_253, %c0_254], %1110 {strides = array<i32>} : memref<1x32xf32, #tpu.memory_space<vmem>>, vector<1x32xf32>,
    return
  }
}

</mosaic_0001>

<bundles_post_ra>
// kernel: gru_nilm_forward.1
= control target key start
LH: loop header
LB: loop body
LE: loop exit
PB: predicated region body
PF: predicated region fallthrough
CT: control target
= control target key end

     0   :  { %vm273_vm0 = vcmask 1043456   ;;  %vm53_vm1 = vcmask 64512   ;;  %v5220_v0 = vmov 0.0   ;;  %vm5221_vm2 = vmmov 0   ;;  %s5222_s8 = smov 120   ;;  %s5223_s9 = smov 8   ;;  %s6279_s1 = inlined_call_operand.vmem [shape: f32[8,12], index: 1, kind: input, shape index: {}]   ;;  %s6280_s2 = inlined_call_operand.vmem [shape: f32[3,4,12], index: 2, kind: input, shape index: {}]   ;;  %s6281_s0 = inlined_call_operand.vmem [shape: f32[128,8], index: 0, kind: input, shape index: {}]   ;;  %s6282_s3 = inlined_call_operand.vmem [shape: f32[4,12], index: 3, kind: input, shape index: {}]   ;;  %s6283_s4 = inlined_call_operand.vmem [shape: f32[4,128,32], index: 4, kind: input, shape index: {}]   ;;  %s6284_s5 = inlined_call_operand.vmem [shape: f32[1,32], index: 5, kind: input, shape index: {}]   ;;  %s6285_s6 = inlined_call_operand.vmem [shape: f32[1,32], index: 6, kind: output, shape index: {}]  }
   0x1   :  { %4816 = vmatprep.subr.mxu1 %v5220_v0  ;;  %v48_v1 = vld [vmem:[%s6279_s1] sm:$0xff]  ;;  %4818 = vmatprep.mubr.msk.f32.mxu1 %vm5221_vm2, %v5220_v0  ;;  %v33_v4 = vld [vmem:[%s6281_s0 + $0x8] sm:$0xff]  ;;  %vm247_vm3 = vcmask 97280   ;;  %s5224_s10 = smov 124   ;;  %s5225_s11 = smov 4   ;;  %vm269_vm4 = vcmask 31744  }
   0x2   :  { %v5272_v2 = vld [vmem:[%s6280_s2] sm:$0xf]  ;;  %4790 = vmatprep.subr.mxu0 %v48_v1  ;;  %v34_v46 = vld [vmem:[%s6281_s0 + $0x10] sm:$0xff]  ;;  %v35_v47 = vld [vmem:[%s6281_s0 + $0x18] sm:$0xff]  ;;  %vm4463_vm5 = vcmask 261120   ;;  %vm4505_vm6 = vcmask 253952  }
   0x3   :  { %v32_v3 = vld [vmem:[%s6281_s0] sm:$0xff]  ;;  %4817 = vmatpush3.msk.msra.mxu1 %vm273_vm0, %v5272_v2  ;;  %4791 = vmatpush3.msra.mxu0 %v48_v1 }
   0x4   :  { %4792 = vmatprep.mubr.msk.f32.mxu0 %vm53_vm1, %v32_v3  ;;  %4819 = vmatmul.mubr.f32.vlgmr.msra.gmra.mxu1 %v5220_v0  ;;  %v5300_v5 = vld [vmem:[%s6282_s3 + $0x1] ss:$0 sm:$0xff]  ;;  %v5305_v8 = vld [vmem:[%s6282_s3] ss:$0 sm:$0xff] }
   0x5   :  { %4793 = vmatmul.mubr.msk.f32.vlgmr.msra.gmra.mxu0 %vm53_vm1, %v33_v4  ;;  %4821 = vmatprep.subr.mxu1 %v5220_v0 }
   0x6   :  { %4823 = vmatprep.mubr.msk.f32.mxu1 %vm5221_vm2, %v5220_v0  ;;  %4822 = vmatpush3.msk.msra.mxu1 %vm273_vm0, %v5272_v2 }
   0x7   :  { %4856 = vmatprep.subr.mxu0 %v5220_v0  ;;  %4826 = vmatprep.subr.mxu1 %v5220_v0 }
   0x8   :  { %4857 = vmatpush3.msk.msra.mxu0 %vm273_vm0, %v5272_v2  ;;  %4795 = vmatprep.mubr.msk.f32.mxu0 %vm53_vm1, %v34_v46 }
   0x9   :  { %4866 = vmatprep.subr.mxu0 %v5220_v0  ;;  %4796 = vmatmul.mubr.msk.f32.gmra.mxu0 %vm53_vm1, %v35_v47 }
  0xc4   :  { %v343_v6 = vpop.f32.mrf.mxu1 }
  0xc5   :  { %v4794_v7 = vpop.f32.mrf.mxu0  ;;  %v344_v9 = vadd.f32 %v5300_v5, %v343_v6 }
  0xc6   :  { %v174_v10 = vadd.f32 %v4794_v7, %v5305_v8  ;;  %v4820_v11 = vpop.f32.mrf.mxu1 }
  0xc7   :  { %v168_v12 = vpop.f32.mrf.mxu0  ;;  %355 = vrot.lane.b32.xlu0 %v344_v9, %s5222_s8 }
  0xc8   :  { %249 = vst.msk [vmem:[#allocation2 + $0x8] sm:$0xff] %vm247_vm3, %v174_v10  ;;  %v169_v13 = vadd.f32 %v5305_v8, %v168_v12 }
  0xc9   :  { %v4797_v52 = vpop.f32.mrf.mxu0 }
  0xca   :  { %248 = vst.msk [vmem:[#allocation2] sm:$0xff] %vm247_vm3, %v169_v13  ;;  %v184_v53 = vadd.f32 %v4797_v52, %v5305_v8 }
  0xcb   :  { %v178_v54 = vpop.f32.mrf.mxu0 }
  0xcc   :  { %251 = vst.msk [vmem:[#allocation2 + $0x18] sm:$0xff] %vm247_vm3, %v184_v53  ;;  %v179_v55 = vadd.f32 %v5305_v8, %v178_v54 }
  0xce   :  { %250 = vst.msk [vmem:[#allocation2 + $0x10] sm:$0xff] %vm247_vm3, %v179_v55 }
  0xcf   :  { %v382_v34 = vld [vmem:[#allocation2 + $0x8] sm:$0xff] }
  0xd1   :  { %v264_v14 = vld [vmem:[#allocation2] sm:$0xff] }
  0xd2   :  { %v347_v15 = vadd.f32 %v344_v9, %v264_v14 }
  0xd4   :  { %v4532_v16 = vmul.f32 -1.442695, %v347_v15 }
  0xd5   :  { %v491_v60 = vld [vmem:[#allocation2 + $0x10] sm:$0xff] }
  0xd6   :  { %5025 = vpow2.f32 %v4532_v16 }
  0xe3   :  { %v5026_v17 = vpop.eup %5025 }
  0xe4   :  { %v351_v18 = vadd.f32 1.0, %v5026_v17 }
  0xe6   :  { %5027 = vrcp.f32 %v351_v18 }
  0xf3   :  { %v5028_v19 = vpop.eup %5027 }
 0x139   :  { %v356_v20 = vpop.permute.xlu0 %355 }
 0x13a   :  { %v358_v21 = vmul.f32 %v5028_v19, %v356_v20  ;;  %v600_v20 = vld [vmem:[#allocation2 + $0x18] sm:$0xff] }
 0x13c   :  { %360 = vrot.lane.b32.xlu0 %v358_v21, %s5223_s9 }
 0x1ae   :  { %v361_v22 = vpop.permute.xlu0 %360 }
 0x1af   :  { %v363_v23 = vadd.f32 %v361_v22, %v264_v14 }
 0x1b1   :  { %5029 = vtanh.f32 %v363_v23 }
 0x1be   :  { %v5030_v24 = vpop.eup %5029 }
 0x1bf   :  { %v365_v25 = vsub.f32 0.0, %v5030_v24 }
 0x1c1   :  { %367 = vrot.lane.b32.xlu1 %v365_v25, %s5224_s10 }
 0x233   :  { %v368_v26 = vpop.permute.xlu1 %367 }
 0x234   :  { %v370_v27 = vmul.f32 %v5028_v19, %v368_v26 }
 0x236   :  { %372 = vrot.lane.b32.xlu1 %v370_v27, %s5225_s11 }
 0x2a8   :  { %v373_v28 = vpop.permute.xlu1 %372 }
 0x2a9   :  { %v375_v29 = vadd.f32 %v5030_v24, %v373_v28 }
 0x2ab   :  { %377 = vrot.lane.b32.xlu0 %v375_v29, %s5222_s8 }
 0x31d   :  { %v378_v30 = vpop.permute.xlu0 %377 }
 0x31e   :  { %380 = vst.msk [vmem:[#allocation4] sm:$0xff] %vm269_vm4, %v378_v30  ;;  %4824 = vmatmul.mubr.msk.f32.vlgmr.msra.gmra.mxu1 %vm269_vm4, %v378_v30 }
 0x31f   :  { %4827 = vmatpush3.msk.msra.mxu1 %vm273_vm0, %v5272_v2  ;;  %4828 = vmatprep.mubr.msk.f32.mxu1 %vm5221_vm2, %v5220_v0 }
 0x320   :  { %4831 = vmatprep.subr.mxu1 %v5220_v0 }
 0x3de   :  { %v451_v31 = vpop.f32.mrf.mxu1 }
 0x3df   :  { %v452_v32 = vadd.f32 %v5300_v5, %v451_v31 }
 0x3e0   :  { %v4825_v33 = vpop.f32.mrf.mxu1 }
 0x3e1   :  { %463 = vrot.lane.b32.xlu1 %v452_v32, %s5222_s8  ;;  %v455_v35 = vadd.f32 %v452_v32, %v382_v34  ;;  %v36_v32 = vld [vmem:[%s6281_s0 + $0x20] sm:$0xff]  ;;  %v37_v33 = vld [vmem:[%s6281_s0 + $0x28] sm:$0xff] }
 0x3e2   :  { %4798 = vmatprep.mubr.msk.f32.mxu0 %vm53_vm1, %v36_v32 }
 0x3e3   :  { %v4535_v36 = vmul.f32 -1.442695, %v455_v35  ;;  %4799 = vmatmul.mubr.msk.f32.gmra.mxu0 %vm53_vm1, %v37_v33 }
 0x3e5   :  { %5031 = vpow2.f32 %v4535_v36 }
 0x3f2   :  { %v5032_v37 = vpop.eup %5031 }
 0x3f3   :  { %v459_v38 = vadd.f32 1.0, %v5032_v37 }
 0x3f5   :  { %5033 = vrcp.f32 %v459_v38 }
 0x402   :  { %v5034_v39 = vpop.eup %5033 }
 0x453   :  { %v464_v40 = vpop.permute.xlu1 %463 }
 0x454   :  { %v466_v41 = vmul.f32 %v5034_v39, %v464_v40 }
 0x456   :  { %468 = vrot.lane.b32.xlu0 %v466_v41, %s5223_s9 }
 0x4a3   :  { %v4800_v38 = vpop.f32.mrf.mxu0 }
 0x4a5   :  { %v188_v40 = vpop.f32.mrf.mxu0 }
 0x4a6   :  { %v189_v41 = vadd.f32 %v5305_v8, %v188_v40 }
 0x4a8   :  { %252 = vst.msk [vmem:[#allocation2 + $0x20] sm:$0xff] %vm247_vm3, %v189_v41 }
 0x4af   :  { %v709_v46 = vld [vmem:[#allocation2 + $0x20] sm:$0xff] }
 0x4c8   :  { %v469_v42 = vpop.permute.xlu0 %468 }
 0x4c9   :  { %v471_v43 = vadd.f32 %v469_v42, %v382_v34 }
 0x4cb   :  { %5035 = vtanh.f32 %v471_v43 }
 0x4d8   :  { %v5036_v44 = vpop.eup %5035 }
 0x4d9   :  { %v473_v45 = vsub.f32 %v375_v29, %v5036_v44 }
 0x4db   :  { %475 = vrot.lane.b32.xlu1 %v473_v45, %s5224_s10 }
 0x54d   :  { %v476_v48 = vpop.permute.xlu1 %475 }
 0x54e   :  { %v478_v49 = vmul.f32 %v5034_v39, %v476_v48  ;;  %v194_v39 = vadd.f32 %v4800_v38, %v5305_v8 }
 0x550   :  { %480 = vrot.lane.b32.xlu0 %v478_v49, %s5225_s11  ;;  %253 = vst.msk [vmem:[#allocation2 + $0x28] sm:$0xff] %vm247_vm3, %v194_v39 }
 0x5c2   :  { %v481_v50 = vpop.permute.xlu0 %480 }
 0x5c3   :  { %v483_v51 = vadd.f32 %v5036_v44, %v481_v50 }
 0x5c5   :  { %485 = vrot.lane.b32.xlu1 %v483_v51, %s5222_s8 }
 0x637   :  { %v486_v56 = vpop.permute.xlu1 %485 }
 0x638   :  { %489 = vst.msk [vmem:[#allocation4 + $0x8] sm:$0xff] %vm269_vm4, %v486_v56  ;;  %4829 = vmatmul.mubr.msk.f32.vlgmr.msra.gmra.mxu1 %vm269_vm4, %v486_v56 }
 0x639   :  { %4832 = vmatpush3.msk.msra.mxu1 %vm273_vm0, %v5272_v2  ;;  %4833 = vmatprep.mubr.msk.f32.mxu1 %vm5221_vm2, %v5220_v0 }
 0x63a   :  { %4836 = vmatprep.subr.mxu1 %v5220_v0 }
 0x6f8   :  { %v560_v57 = vpop.f32.mrf.mxu1 }
 0x6f9   :  { %v561_v58 = vadd.f32 %v5300_v5, %v560_v57 }
 0x6fa   :  { %v4830_v59 = vpop.f32.mrf.mxu1 }
 0x6fb   :  { %572 = vrot.lane.b32.xlu0 %v561_v58, %s5222_s8  ;;  %v564_v61 = vadd.f32 %v561_v58, %v491_v60 }
 0x6fd   :  { %v4538_v62 = vmul.f32 -1.442695, %v564_v61 }
 0x6ff   :  { %5037 = vpow2.f32 %v4538_v62 }
 0x70c   :  { %v5038_v63 = vpop.eup %5037 }
 0x70d   :  { %v568_v1 = vadd.f32 1.0, %v5038_v63 }
 0x70f   :  { %5039 = vrcp.f32 %v568_v1 }
 0x71c   :  { %v5040_v3 = vpop.eup %5039 }
 0x76d   :  { %v573_v4 = vpop.permute.xlu0 %572 }
 0x76e   :  { %v575_v6 = vmul.f32 %v5040_v3, %v573_v4  ;;  %v818_v4 = vld [vmem:[#allocation2 + $0x28] sm:$0xff] }
 0x770   :  { %577 = vrot.lane.b32.xlu1 %v575_v6, %s5223_s9 }
 0x7e2   :  { %v578_v7 = vpop.permute.xlu1 %577 }
 0x7e3   :  { %v580_v9 = vadd.f32 %v578_v7, %v491_v60 }
 0x7e5   :  { %5041 = vtanh.f32 %v580_v9 }
 0x7f2   :  { %v5042_v10 = vpop.eup %5041 }
 0x7f3   :  { %v582_v11 = vsub.f32 %v483_v51, %v5042_v10 }
 0x7f5   :  { %584 = vrot.lane.b32.xlu0 %v582_v11, %s5224_s10 }
 0x867   :  { %v585_v12 = vpop.permute.xlu0 %584 }
 0x868   :  { %v587_v13 = vmul.f32 %v5040_v3, %v585_v12 }
 0x86a   :  { %589 = vrot.lane.b32.xlu1 %v587_v13, %s5225_s11 }
 0x8dc   :  { %v590_v14 = vpop.permute.xlu1 %589 }
 0x8dd   :  { %v592_v15 = vadd.f32 %v5042_v10, %v590_v14 }
 0x8df   :  { %594 = vrot.lane.b32.xlu0 %v592_v15, %s5222_s8 }
 0x951   :  { %v595_v16 = vpop.permute.xlu0 %594 }
 0x952   :  { %598 = vst.msk [vmem:[#allocation4 + $0x10] sm:$0xff] %vm269_vm4, %v595_v16  ;;  %4834 = vmatmul.mubr.msk.f32.vlgmr.msra.gmra.mxu1 %vm269_vm4, %v595_v16 }
 0x953   :  { %4837 = vmatpush3.msk.msra.mxu1 %vm273_vm0, %v5272_v2  ;;  %4838 = vmatprep.mubr.msk.f32.mxu1 %vm5221_vm2, %v5220_v0 }
 0x954   :  { %4841 = vmatprep.subr.mxu1 %v5220_v0 }
 0xa12   :  { %v669_v17 = vpop.f32.mrf.mxu1 }
 0xa13   :  { %v670_v18 = vadd.f32 %v5300_v5, %v669_v17 }
 0xa14   :  { %v4835_v19 = vpop.f32.mrf.mxu1 }
 0xa15   :  { %681 = vrot.lane.b32.xlu1 %v670_v18, %s5222_s8  ;;  %v673_v21 = vadd.f32 %v670_v18, %v600_v20  ;;  %v38_v18 = vld [vmem:[%s6281_s0 + $0x30] sm:$0xff]  ;;  %v39_v19 = vld [vmem:[%s6281_s0 + $0x38] sm:$0xff] }
 0xa16   :  { %4801 = vmatprep.mubr.msk.f32.mxu0 %vm53_vm1, %v38_v18 }
 0xa17   :  { %v4541_v22 = vmul.f32 -1.442695, %v673_v21  ;;  %4802 = vmatmul.mubr.msk.f32.gmra.mxu0 %vm53_vm1, %v39_v19 }
 0xa19   :  { %5043 = vpow2.f32 %v4541_v22 }
 0xa26   :  { %v5044_v23 = vpop.eup %5043 }
 0xa27   :  { %v677_v24 = vadd.f32 1.0, %v5044_v23 }
 0xa29   :  { %5045 = vrcp.f32 %v677_v24 }
 0xa36   :  { %v5046_v25 = vpop.eup %5045 }
 0xa87   :  { %v682_v26 = vpop.permute.xlu1 %681 }
 0xa88   :  { %v684_v27 = vmul.f32 %v5046_v25, %v682_v26 }
 0xa8a   :  { %686 = vrot.lane.b32.xlu0 %v684_v27, %s5223_s9 }
 0xad7   :  { %v4803_v24 = vpop.f32.mrf.mxu0 }
 0xad9   :  { %v198_v26 = vpop.f32.mrf.mxu0 }
 0xada   :  { %v199_v27 = vadd.f32 %v5305_v8, %v198_v26 }
 0xadc   :  { %254 = vst.msk [vmem:[#allocation2 + $0x30] sm:$0xff] %vm247_vm3, %v199_v27 }
 0xae3   :  { %v927_v32 = vld [vmem:[#allocation2 + $0x30] sm:$0xff] }
 0xafc   :  { %v687_v28 = vpop.permute.xlu0 %686 }
 0xafd   :  { %v689_v29 = vadd.f32 %v687_v28, %v600_v20 }
 0xaff   :  { %5047 = vtanh.f32 %v689_v29 }
 0xb0c   :  { %v5048_v30 = vpop.eup %5047 }
 0xb0d   :  { %v691_v31 = vsub.f32 %v592_v15, %v5048_v30 }
 0xb0f   :  { %693 = vrot.lane.b32.xlu1 %v691_v31, %s5224_s10 }
 0xb81   :  { %v694_v34 = vpop.permute.xlu1 %693 }
 0xb82   :  { %v696_v35 = vmul.f32 %v5046_v25, %v694_v34  ;;  %v204_v25 = vadd.f32 %v4803_v24, %v5305_v8 }
 0xb84   :  { %698 = vrot.lane.b32.xlu0 %v696_v35, %s5225_s11  ;;  %255 = vst.msk [vmem:[#allocation2 + $0x38] sm:$0xff] %vm247_vm3, %v204_v25 }
 0xbf6   :  { %v699_v36 = vpop.permute.xlu0 %698 }
 0xbf7   :  { %v701_v37 = vadd.f32 %v5048_v30, %v699_v36 }
 0xbf9   :  { %703 = vrot.lane.b32.xlu1 %v701_v37, %s5222_s8 }
 0xc6b   :  { %v704_v42 = vpop.permute.xlu1 %703 }
 0xc6c   :  { %707 = vst.msk [vmem:[#allocation4 + $0x18] sm:$0xff] %vm269_vm4, %v704_v42  ;;  %4839 = vmatmul.mubr.msk.f32.vlgmr.msra.gmra.mxu1 %vm269_vm4, %v704_v42 }
 0xc6d   :  { %4842 = vmatpush3.msk.msra.mxu1 %vm273_vm0, %v5272_v2  ;;  %4843 = vmatprep.mubr.msk.f32.mxu1 %vm5221_vm2, %v5220_v0 }
 0xc6e   :  { %4846 = vmatprep.subr.mxu1 %v5220_v0 }
 0xd2c   :  { %v778_v43 = vpop.f32.mrf.mxu1 }
 0xd2d   :  { %v779_v44 = vadd.f32 %v5300_v5, %v778_v43 }
 0xd2e   :  { %v4840_v45 = vpop.f32.mrf.mxu1 }
 0xd2f   :  { %790 = vrot.lane.b32.xlu0 %v779_v44, %s5222_s8  ;;  %v782_v47 = vadd.f32 %v779_v44, %v709_v46 }
 0xd31   :  { %v4544_v48 = vmul.f32 -1.442695, %v782_v47 }
 0xd33   :  { %5049 = vpow2.f32 %v4544_v48 }
 0xd40   :  { %v5050_v49 = vpop.eup %5049 }
 0xd41   :  { %v786_v50 = vadd.f32 1.0, %v5050_v49 }
 0xd43   :  { %5051 = vrcp.f32 %v786_v50 }
 0xd50   :  { %v5052_v51 = vpop.eup %5051 }
 0xda1   :  { %v791_v52 = vpop.permute.xlu0 %790 }
 0xda2   :  { %v793_v53 = vmul.f32 %v5052_v51, %v791_v52  ;;  %v1036_v52 = vld [vmem:[#allocation2 + $0x38] sm:$0xff] }
 0xda4   :  { %795 = vrot.lane.b32.xlu1 %v793_v53, %s5223_s9 }
 0xe16   :  { %v796_v54 = vpop.permute.xlu1 %795 }
 0xe17   :  { %v798_v55 = vadd.f32 %v796_v54, %v709_v46 }
 0xe19   :  { %5053 = vtanh.f32 %v798_v55 }
 0xe26   :  { %v5054_v56 = vpop.eup %5053 }
 0xe27   :  { %v800_v57 = vsub.f32 %v701_v37, %v5054_v56 }
 0xe29   :  { %802 = vrot.lane.b32.xlu0 %v800_v57, %s5224_s10 }
 0xe9b   :  { %v803_v58 = vpop.permute.xlu0 %802 }
 0xe9c   :  { %v805_v59 = vmul.f32 %v5052_v51, %v803_v58 }
 0xe9e   :  { %807 = vrot.lane.b32.xlu1 %v805_v59, %s5225_s11 }
 0xf10   :  { %v808_v60 = vpop.permute.xlu1 %807 }
 0xf11   :  { %v810_v61 = vadd.f32 %v5054_v56, %v808_v60 }
 0xf13   :  { %812 = vrot.lane.b32.xlu0 %v810_v61, %s5222_s8 }
 0xf85   :  { %v813_v62 = vpop.permute.xlu0 %812 }
 0xf86   :  { %816 = vst.msk [vmem:[#allocation4 + $0x20] sm:$0xff] %vm269_vm4, %v813_v62  ;;  %4844 = vmatmul.mubr.msk.f32.vlgmr.msra.gmra.mxu1 %vm269_vm4, %v813_v62 }
 0xf87   :  { %4847 = vmatpush3.msk.msra.mxu1 %vm273_vm0, %v5272_v2  ;;  %4848 = vmatprep.mubr.msk.f32.mxu1 %vm5221_vm2, %v5220_v0 }
 0xf88   :  { %4851 = vmatprep.subr.mxu1 %v5220_v0 }
0x1046   :  { %v887_v63 = vpop.f32.mrf.mxu1 }
0x1047   :  { %v888_v1 = vadd.f32 %v5300_v5, %v887_v63 }
0x1048   :  { %v4845_v3 = vpop.f32.mrf.mxu1 }
0x1049   :  { %899 = vrot.lane.b32.xlu1 %v888_v1, %s5222_s8  ;;  %v891_v6 = vadd.f32 %v888_v1, %v818_v4  ;;  %v40_v1 = vld [vmem:[%s6281_s0 + $0x40] sm:$0xff]  ;;  %v41_v3 = vld [vmem:[%s6281_s0 + $0x48] sm:$0xff] }
0x104a   :  { %4804 = vmatprep.mubr.msk.f32.mxu0 %vm53_vm1, %v40_v1 }
0x104b   :  { %v4547_v7 = vmul.f32 -1.442695, %v891_v6  ;;  %4805 = vmatmul.mubr.msk.f32.gmra.mxu0 %vm53_vm1, %v41_v3  ;;  %v43_v6 = vld [vmem:[%s6281_s0 + $0x58] sm:$0xff] }
0x104d   :  { %5055 = vpow2.f32 %v4547_v7  ;;  %v44_v7 = vld [vmem:[%s6281_s0 + $0x60] sm:$0xff] }
0x105a   :  { %v5056_v9 = vpop.eup %5055 }
0x105b   :  { %v895_v10 = vadd.f32 1.0, %v5056_v9  ;;  %v45_v9 = vld [vmem:[%s6281_s0 + $0x68] sm:$0xff] }
0x105d   :  { %5057 = vrcp.f32 %v895_v10 }
0x106a   :  { %v5058_v11 = vpop.eup %5057 }
0x10bb   :  { %v900_v12 = vpop.permute.xlu1 %899 }
0x10bc   :  { %v902_v13 = vmul.f32 %v5058_v11, %v900_v12 }
0x10be   :  { %904 = vrot.lane.b32.xlu0 %v902_v13, %s5223_s9  ;;  %v47_v13 = vld [vmem:[%s6281_s0 + $0x78] sm:$0xff] }
0x1130   :  { %v905_v14 = vpop.permute.xlu0 %904 }
0x1131   :  { %v907_v15 = vadd.f32 %v905_v14, %v818_v4  ;;  %v42_v4 = vld [vmem:[%s6281_s0 + $0x50] sm:$0xff] }
0x1132   :  { %4807 = vmatprep.mubr.msk.f32.mxu0 %vm53_vm1, %v42_v4 }
0x1133   :  { %5059 = vtanh.f32 %v907_v15  ;;  %4808 = vmatmul.mubr.msk.f32.gmra.mxu0 %vm53_vm1, %v43_v6 }
0x1134   :  { %4810 = vmatprep.mubr.msk.f32.mxu0 %vm53_vm1, %v44_v7 }
0x1137   :  { %4811 = vmatmul.mubr.msk.f32.gmra.mxu0 %vm53_vm1, %v45_v9 }
0x1140   :  { %v5060_v16 = vpop.eup %5059 }
0x1141   :  { %v909_v17 = vsub.f32 %v810_v61, %v5060_v16 }
0x1143   :  { %911 = vrot.lane.b32.xlu1 %v909_v17, %s5224_s10 }
0x11b5   :  { %v912_v20 = vpop.permute.xlu1 %911 }
0x11b6   :  { %v914_v21 = vmul.f32 %v5058_v11, %v912_v20  ;;  %v46_v11 = vld [vmem:[%s6281_s0 + $0x70] sm:$0xff] }
0x11b7   :  { %4813 = vmatprep.mubr.msk.f32.mxu0 %vm53_vm1, %v46_v11 }
0x11b8   :  { %916 = vrot.lane.b32.xlu0 %v914_v21, %s5225_s11  ;;  %4814 = vmatmul.mubr.msk.f32.gmra.mxu0 %vm53_vm1, %v47_v13 }
0x11b9   :  { %4858 = vmatprep.mubr.msk.f32.mxu0 %vm5221_vm2, %v5220_v0 }
0x122a   :  { %v917_v22 = vpop.permute.xlu0 %916 }
0x122b   :  { %v919_v23 = vadd.f32 %v5060_v16, %v917_v22  ;;  %v4806_v16 = vpop.f32.mrf.mxu0 }
0x122c   :  { %v214_v17 = vadd.f32 %v4806_v16, %v5305_v8 }
0x122d   :  { %921 = vrot.lane.b32.xlu1 %v919_v23, %s5222_s8  ;;  %v208_v18 = vpop.f32.mrf.mxu0 }
0x122e   :  { %257 = vst.msk [vmem:[#allocation2 + $0x48] sm:$0xff] %vm247_vm3, %v214_v17  ;;  %v209_v19 = vadd.f32 %v5305_v8, %v208_v18 }
0x122f   :  { %v4809_v20 = vpop.f32.mrf.mxu0 }
0x1230   :  { %256 = vst.msk [vmem:[#allocation2 + $0x40] sm:$0xff] %vm247_vm3, %v209_v19  ;;  %v224_v21 = vadd.f32 %v4809_v20, %v5305_v8 }
0x1231   :  { %v218_v22 = vpop.f32.mrf.mxu0 }
0x1232   :  { %259 = vst.msk [vmem:[#allocation2 + $0x58] sm:$0xff] %vm247_vm3, %v224_v21 }
0x1233   :  { %v4812_v24 = vpop.f32.mrf.mxu0 }
0x1234   :  { %v234_v25 = vadd.f32 %v4812_v24, %v5305_v8 }
0x1235   :  { %v228_v26 = vpop.f32.mrf.mxu0 }
0x1236   :  { %261 = vst.msk [vmem:[#allocation2 + $0x68] sm:$0xff] %vm247_vm3, %v234_v25  ;;  %v229_v27 = vadd.f32 %v5305_v8, %v228_v26 }
0x1238   :  { %260 = vst.msk [vmem:[#allocation2 + $0x60] sm:$0xff] %vm247_vm3, %v229_v27 }
0x129f   :  { %v922_v28 = vpop.permute.xlu1 %921 }
0x12a0   :  { %925 = vst.msk [vmem:[#allocation4 + $0x28] sm:$0xff] %vm269_vm4, %v922_v28  ;;  %4849 = vmatmul.mubr.msk.f32.vlgmr.msra.gmra.mxu1 %vm269_vm4, %v922_v28  ;;  %v4815_v28 = vpop.f32.mrf.mxu0 }
0x12a1   :  { %4852 = vmatpush3.msk.msra.mxu1 %vm273_vm0, %v5272_v2  ;;  %4853 = vmatprep.mubr.msk.f32.mxu1 %vm5221_vm2, %v5220_v0 }
0x12a2   :  { %4861 = vmatprep.subr.mxu1 %v5220_v0 }
0x1360   :  { %v996_v29 = vpop.f32.mrf.mxu1 }
0x1361   :  { %v997_v30 = vadd.f32 %v5300_v5, %v996_v29  ;;  %v244_v29 = vadd.f32 %v4815_v28, %v5305_v8 }
0x1362   :  { %v4850_v31 = vpop.f32.mrf.mxu1 }
0x1363   :  { %1008 = vrot.lane.b32.xlu0 %v997_v30, %s5222_s8  ;;  %v1000_v33 = vadd.f32 %v997_v30, %v927_v32  ;;  %v238_v30 = vpop.f32.mrf.mxu0  ;;  %263 = vst.msk [vmem:[#allocation2 + $0x78] sm:$0xff] %vm247_vm3, %v244_v29 }
0x1364   :  { %v239_v31 = vadd.f32 %v5305_v8, %v238_v30 }
0x1365   :  { %v4550_v34 = vmul.f32 -1.442695, %v1000_v33 }
0x1366   :  { %262 = vst.msk [vmem:[#allocation2 + $0x70] sm:$0xff] %vm247_vm3, %v239_v31 }
0x1367   :  { %5061 = vpow2.f32 %v4550_v34 }
0x1374   :  { %v5062_v35 = vpop.eup %5061 }
0x1375   :  { %v1004_v36 = vadd.f32 1.0, %v5062_v35 }
0x1377   :  { %5063 = vrcp.f32 %v1004_v36 }
0x1384   :  { %v5064_v37 = vpop.eup %5063 }
0x13d5   :  { %v1009_v38 = vpop.permute.xlu0 %1008 }
0x13d6   :  { %v1011_v39 = vmul.f32 %v5064_v37, %v1009_v38 }
0x13d8   :  { %1013 = vrot.lane.b32.xlu1 %v1011_v39, %s5223_s9 }
0x144a   :  { %v1014_v40 = vpop.permute.xlu1 %1013 }
0x144b   :  { %v1016_v41 = vadd.f32 %v1014_v40, %v927_v32 }
0x144d   :  { %5065 = vtanh.f32 %v1016_v41 }
0x145a   :  { %v5066_v42 = vpop.eup %5065 }
0x145b   :  { %v1018_v43 = vsub.f32 %v919_v23, %v5066_v42  ;;  %v219_v23 = vadd.f32 %v5305_v8, %v218_v22  ;;  %v1145_v8 = vld [vmem:[#allocation2 + $0x40] sm:$0xff] }
0x145d   :  { %1020 = vrot.lane.b32.xlu0 %v1018_v43, %s5224_s10  ;;  %258 = vst.msk [vmem:[#allocation2 + $0x50] sm:$0xff] %vm247_vm3, %v219_v23 }
0x14cf   :  { %v1021_v44 = vpop.permute.xlu0 %1020 }
0x14d0   :  { %v1023_v45 = vmul.f32 %v5064_v37, %v1021_v44 }
0x14d2   :  { %1025 = vrot.lane.b32.xlu1 %v1023_v45, %s5225_s11 }
0x1544   :  { %v1026_v46 = vpop.permute.xlu1 %1025 }
0x1545   :  { %v1028_v47 = vadd.f32 %v5066_v42, %v1026_v46 }
0x1547   :  { %1030 = vrot.lane.b32.xlu0 %v1028_v47, %s5222_s8 }
0x15b9   :  { %v1031_v48 = vpop.permute.xlu0 %1030 }
0x15ba   :  { %1034 = vst.msk [vmem:[#allocation4 + $0x30] sm:$0xff] %vm269_vm4, %v1031_v48  ;;  %4854 = vmatmul.mubr.msk.f32.vlgmr.msra.gmra.mxu1 %vm269_vm4, %v1031_v48 }
0x15bb   :  { %4862 = vmatpush3.msk.msra.mxu1 %vm273_vm0, %v5272_v2  ;;  %4863 = vmatprep.mubr.msk.f32.mxu1 %vm5221_vm2, %v5220_v0 }
0x15bc   :  { %4871 = vmatprep.subr.mxu1 %v5220_v0 }
0x167a   :  { %v1105_v49 = vpop.f32.mrf.mxu1 }
0x167b   :  { %v1106_v50 = vadd.f32 %v5300_v5, %v1105_v49 }
0x167c   :  { %v4855_v51 = vpop.f32.mrf.mxu1 }
0x167d   :  { %1117 = vrot.lane.b32.xlu1 %v1106_v50, %s5222_s8  ;;  %v1109_v53 = vadd.f32 %v1106_v50, %v1036_v52 }
0x167f   :  { %v4553_v54 = vmul.f32 -1.442695, %v1109_v53 }
0x1681   :  { %5067 = vpow2.f32 %v4553_v54 }
0x168e   :  { %v5068_v55 = vpop.eup %5067 }
0x168f   :  { %v1113_v56 = vadd.f32 1.0, %v5068_v55  ;;  %v1254_v55 = vld [vmem:[#allocation2 + $0x48] sm:$0xff] }
0x1691   :  { %5069 = vrcp.f32 %v1113_v56 }
0x169e   :  { %v5070_v57 = vpop.eup %5069 }
0x16ef   :  { %v1118_v58 = vpop.permute.xlu1 %1117 }
0x16f0   :  { %v1120_v59 = vmul.f32 %v5070_v57, %v1118_v58 }
0x16f2   :  { %1122 = vrot.lane.b32.xlu0 %v1120_v59, %s5223_s9 }
0x1764   :  { %v1123_v60 = vpop.permute.xlu0 %1122 }
0x1765   :  { %v1125_v61 = vadd.f32 %v1123_v60, %v1036_v52 }
0x1767   :  { %5071 = vtanh.f32 %v1125_v61 }
0x1774   :  { %v5072_v62 = vpop.eup %5071 }
0x1775   :  { %v1127_v63 = vsub.f32 %v1028_v47, %v5072_v62 }
0x1777   :  { %1129 = vrot.lane.b32.xlu1 %v1127_v63, %s5224_s10 }
0x17e9   :  { %v1130_v10 = vpop.permute.xlu1 %1129 }
0x17ea   :  { %v1132_v12 = vmul.f32 %v5070_v57, %v1130_v10 }
0x17ec   :  { %1134 = vrot.lane.b32.xlu0 %v1132_v12, %s5225_s11 }
0x185e   :  { %v1135_v14 = vpop.permute.xlu0 %1134 }
0x185f   :  { %v1137_v15 = vadd.f32 %v5072_v62, %v1135_v14 }
0x1861   :  { %1139 = vrot.lane.b32.xlu1 %v1137_v15, %s5222_s8 }
0x18d3   :  { %v1140_v32 = vpop.permute.xlu1 %1139 }
0x18d4   :  { %1143 = vst.msk [vmem:[#allocation4 + $0x38] sm:$0xff] %vm269_vm4, %v1140_v32  ;;  %4859 = vmatmul.mubr.msk.f32.vlgmr.msra.gmra.mxu0 %vm269_vm4, %v1140_v32 }
0x18d5   :  { %4867 = vmatpush3.msk.msra.mxu0 %vm273_vm0, %v5272_v2  ;;  %4868 = vmatprep.mubr.msk.f32.mxu0 %vm5221_vm2, %v5220_v0 }
0x18d6   :  { %4876 = vmatprep.subr.mxu0 %v5220_v0 }
0x1994   :  { %v1214_v33 = vpop.f32.mrf.mxu0 }
0x1995   :  { %v1215_v34 = vadd.f32 %v5300_v5, %v1214_v33 }
0x1996   :  { %v4860_v35 = vpop.f32.mrf.mxu0 }
0x1997   :  { %1226 = vrot.lane.b32.xlu0 %v1215_v34, %s5222_s8  ;;  %v1218_v36 = vadd.f32 %v1215_v34, %v1145_v8  ;;  %v1472_v35 = vld [vmem:[#allocation2 + $0x58] sm:$0xff] }
0x1999   :  { %v4556_v37 = vmul.f32 -1.442695, %v1218_v36 }
0x199b   :  { %5073 = vpow2.f32 %v4556_v37 }
0x19a8   :  { %v5074_v38 = vpop.eup %5073 }
0x19a9   :  { %v1222_v39 = vadd.f32 1.0, %v5074_v38 }
0x19ab   :  { %5075 = vrcp.f32 %v1222_v39 }
0x19b8   :  { %v5076_v40 = vpop.eup %5075 }
0x1a09   :  { %v1227_v41 = vpop.permute.xlu0 %1226 }
0x1a0a   :  { %v1229_v42 = vmul.f32 %v5076_v40, %v1227_v41 }
0x1a0c   :  { %1231 = vrot.lane.b32.xlu1 %v1229_v42, %s5223_s9 }
0x1a7e   :  { %v1232_v43 = vpop.permute.xlu1 %1231 }
0x1a7f   :  { %v1234_v44 = vadd.f32 %v1232_v43, %v1145_v8 }
0x1a81   :  { %5077 = vtanh.f32 %v1234_v44 }
0x1a8e   :  { %v5078_v45 = vpop.eup %5077 }
0x1a8f   :  { %v1236_v46 = vsub.f32 %v1137_v15, %v5078_v45  ;;  %v1363_v15 = vld [vmem:[#allocation2 + $0x50] sm:$0xff] }
0x1a91   :  { %1238 = vrot.lane.b32.xlu0 %v1236_v46, %s5224_s10 }
0x1b03   :  { %v1239_v47 = vpop.permute.xlu0 %1238 }
0x1b04   :  { %v1241_v48 = vmul.f32 %v5076_v40, %v1239_v47 }
0x1b06   :  { %1243 = vrot.lane.b32.xlu1 %v1241_v48, %s5225_s11 }
0x1b78   :  { %v1244_v49 = vpop.permute.xlu1 %1243 }
0x1b79   :  { %v1246_v50 = vadd.f32 %v5078_v45, %v1244_v49 }
0x1b7b   :  { %1248 = vrot.lane.b32.xlu0 %v1246_v50, %s5222_s8 }
0x1bed   :  { %v1249_v51 = vpop.permute.xlu0 %1248 }
0x1bee   :  { %1252 = vst.msk [vmem:[#allocation4 + $0x40] sm:$0xff] %vm269_vm4, %v1249_v51  ;;  %4864 = vmatmul.mubr.msk.f32.vlgmr.msra.gmra.mxu1 %vm269_vm4, %v1249_v51 }
0x1bef   :  { %4872 = vmatpush3.msk.msra.mxu1 %vm273_vm0, %v5272_v2  ;;  %4873 = vmatprep.mubr.msk.f32.mxu1 %vm5221_vm2, %v5220_v0 }
0x1bf0   :  { %4881 = vmatprep.subr.mxu1 %v5220_v0 }
0x1cae   :  { %v1323_v52 = vpop.f32.mrf.mxu1 }
0x1caf   :  { %v1324_v53 = vadd.f32 %v5300_v5, %v1323_v52 }
0x1cb0   :  { %v4865_v54 = vpop.f32.mrf.mxu1 }
0x1cb1   :  { %1335 = vrot.lane.b32.xlu1 %v1324_v53, %s5222_s8  ;;  %v1327_v56 = vadd.f32 %v1324_v53, %v1254_v55  ;;  %v1581_v54 = vld [vmem:[#allocation2 + $0x60] sm:$0xff] }
0x1cb3   :  { %v4559_v57 = vmul.f32 -1.442695, %v1327_v56 }
0x1cb5   :  { %5079 = vpow2.f32 %v4559_v57 }
0x1cc2   :  { %v5080_v58 = vpop.eup %5079 }
0x1cc3   :  { %v1331_v59 = vadd.f32 1.0, %v5080_v58 }
0x1cc5   :  { %5081 = vrcp.f32 %v1331_v59 }
0x1cd2   :  { %v5082_v60 = vpop.eup %5081 }
0x1d23   :  { %v1336_v61 = vpop.permute.xlu1 %1335 }
0x1d24   :  { %v1338_v62 = vmul.f32 %v5082_v60, %v1336_v61 }
0x1d26   :  { %1340 = vrot.lane.b32.xlu0 %v1338_v62, %s5223_s9 }
0x1d98   :  { %v1341_v63 = vpop.permute.xlu0 %1340 }
0x1d99   :  { %v1343_v1 = vadd.f32 %v1341_v63, %v1254_v55 }
0x1d9b   :  { %5083 = vtanh.f32 %v1343_v1 }
0x1da8   :  { %v5084_v3 = vpop.eup %5083 }
0x1da9   :  { %v1345_v4 = vsub.f32 %v1246_v50, %v5084_v3 }
0x1dab   :  { %1347 = vrot.lane.b32.xlu1 %v1345_v4, %s5224_s10 }
0x1e1d   :  { %v1348_v6 = vpop.permute.xlu1 %1347 }
0x1e1e   :  { %v1350_v7 = vmul.f32 %v5082_v60, %v1348_v6 }
0x1e20   :  { %1352 = vrot.lane.b32.xlu0 %v1350_v7, %s5225_s11 }
0x1e92   :  { %v1353_v9 = vpop.permute.xlu0 %1352 }
0x1e93   :  { %v1355_v10 = vadd.f32 %v5084_v3, %v1353_v9  ;;  %v5217_v9 = vld [vmem:[%s6280_s2] sm:$0xf] }
0x1e95   :  { %1357 = vrot.lane.b32.xlu1 %v1355_v10, %s5222_s8 }
0x1f07   :  { %v1358_v11 = vpop.permute.xlu1 %1357 }
0x1f08   :  { %1361 = vst.msk [vmem:[#allocation4 + $0x48] sm:$0xff] %vm269_vm4, %v1358_v11  ;;  %4869 = vmatmul.mubr.msk.f32.vlgmr.msra.gmra.mxu0 %vm269_vm4, %v1358_v11  ;;  %v5570_v11 = vld [vmem:[%s6282_s3 + $0x1] ss:$0 sm:$0xff] }
0x1f09   :  { %4877 = vmatpush3.msk.msra.mxu0 %vm273_vm0, %v5272_v2  ;;  %4878 = vmatprep.mubr.msk.f32.mxu0 %vm5221_vm2, %v5220_v0 }
0x1f0a   :  { %4886 = vmatprep.subr.mxu0 %v5220_v0 }
0x1fc8   :  { %v1432_v12 = vpop.f32.mrf.mxu0 }
0x1fc9   :  { %v1433_v13 = vadd.f32 %v5300_v5, %v1432_v12 }
0x1fca   :  { %v4870_v14 = vpop.f32.mrf.mxu0 }
0x1fcb   :  { %1444 = vrot.lane.b32.xlu0 %v1433_v13, %s5222_s8  ;;  %v1436_v16 = vadd.f32 %v1433_v13, %v1363_v15  ;;  %v1690_v14 = vld [vmem:[#allocation2 + $0x68] sm:$0xff] }
0x1fcd   :  { %v4562_v17 = vmul.f32 -1.442695, %v1436_v16 }
0x1fcf   :  { %5085 = vpow2.f32 %v4562_v17 }
0x1fdc   :  { %v5086_v18 = vpop.eup %5085 }
0x1fdd   :  { %v1440_v19 = vadd.f32 1.0, %v5086_v18 }
0x1fdf   :  { %5087 = vrcp.f32 %v1440_v19 }
0x1fec   :  { %v5088_v20 = vpop.eup %5087 }
0x203d   :  { %v1445_v21 = vpop.permute.xlu0 %1444 }
0x203e   :  { %v1447_v22 = vmul.f32 %v5088_v20, %v1445_v21 }
0x2040   :  { %1449 = vrot.lane.b32.xlu1 %v1447_v22, %s5223_s9 }
0x20b2   :  { %v1450_v23 = vpop.permute.xlu1 %1449 }
0x20b3   :  { %v1452_v24 = vadd.f32 %v1450_v23, %v1363_v15 }
0x20b5   :  { %5089 = vtanh.f32 %v1452_v24 }
0x20c2   :  { %v5090_v25 = vpop.eup %5089 }
0x20c3   :  { %v1454_v26 = vsub.f32 %v1355_v10, %v5090_v25 }
0x20c5   :  { %1456 = vrot.lane.b32.xlu0 %v1454_v26, %s5224_s10 }
0x2137   :  { %v1457_v27 = vpop.permute.xlu0 %1456 }
0x2138   :  { %v1459_v28 = vmul.f32 %v5088_v20, %v1457_v27 }
0x213a   :  { %1461 = vrot.lane.b32.xlu1 %v1459_v28, %s5225_s11  ;;  %v4511_v28 = vld [vmem:[%s6280_s2 + $0x4] sm:$0xf] }
0x21ac   :  { %v1462_v29 = vpop.permute.xlu1 %1461 }
0x21ad   :  { %v1464_v30 = vadd.f32 %v5090_v25, %v1462_v29 }
0x21af   :  { %1466 = vrot.lane.b32.xlu0 %v1464_v30, %s5222_s8 }
0x2221   :  { %v1467_v31 = vpop.permute.xlu0 %1466 }
0x2222   :  { %1470 = vst.msk [vmem:[#allocation4 + $0x50] sm:$0xff] %vm269_vm4, %v1467_v31  ;;  %4874 = vmatmul.mubr.msk.f32.vlgmr.msra.gmra.mxu1 %vm269_vm4, %v1467_v31 }
0x2223   :  { %4882 = vmatpush3.msk.msra.mxu1 %vm273_vm0, %v5272_v2  ;;  %4883 = vmatprep.mubr.msk.f32.mxu1 %vm5221_vm2, %v5220_v0 }
0x2224   :  { %4891 = vmatprep.subr.mxu1 %v5220_v0 }
0x22e2   :  { %v1541_v32 = vpop.f32.mrf.mxu1 }
0x22e3   :  { %v1542_v33 = vadd.f32 %v5300_v5, %v1541_v32  ;;  %v2016_v32 = vld [vmem:[#allocation4] sm:$0xff] }
0x22e4   :  { %v4875_v34 = vpop.f32.mrf.mxu1 }
0x22e5   :  { %1553 = vrot.lane.b32.xlu1 %v1542_v33, %s5222_s8  ;;  %v1545_v8 = vadd.f32 %v1542_v33, %v1472_v35  ;;  %v2017_v33 = vld [vmem:[#allocation4 + $0x8] sm:$0xff]  ;;  %v2018_v34 = vld [vmem:[#allocation4 + $0x10] sm:$0xff] }
0x22e7   :  { %v4565_v36 = vmul.f32 -1.442695, %v1545_v8  ;;  %v2020_v8 = vld [vmem:[#allocation4 + $0x20] sm:$0xff] }
0x22e9   :  { %5091 = vpow2.f32 %v4565_v36  ;;  %v2021_v36 = vld [vmem:[#allocation4 + $0x28] sm:$0xff] }
0x22f6   :  { %v5092_v37 = vpop.eup %5091 }
0x22f7   :  { %v1549_v38 = vadd.f32 1.0, %v5092_v37  ;;  %v2022_v37 = vld [vmem:[#allocation4 + $0x30] sm:$0xff] }
0x22f9   :  { %5093 = vrcp.f32 %v1549_v38  ;;  %v2023_v38 = vld [vmem:[#allocation4 + $0x38] sm:$0xff] }
0x2306   :  { %v5094_v39 = vpop.eup %5093 }
0x2357   :  { %v1554_v40 = vpop.permute.xlu1 %1553 }
0x2358   :  { %v1556_v41 = vmul.f32 %v5094_v39, %v1554_v40  ;;  %v2025_v40 = vld [vmem:[#allocation4 + $0x48] sm:$0xff] }
0x235a   :  { %1558 = vrot.lane.b32.xlu0 %v1556_v41, %s5223_s9  ;;  %v2026_v41 = vld [vmem:[#allocation4 + $0x50] sm:$0xff] }
0x23cc   :  { %v1559_v42 = vpop.permute.xlu0 %1558 }
0x23cd   :  { %v1561_v43 = vadd.f32 %v1559_v42, %v1472_v35  ;;  %v2019_v35 = vld [vmem:[#allocation4 + $0x18] sm:$0xff] }
0x23cf   :  { %5095 = vtanh.f32 %v1561_v43 }
0x23dc   :  { %v5096_v44 = vpop.eup %5095 }
0x23dd   :  { %v1563_v45 = vsub.f32 %v1464_v30, %v5096_v44 }
0x23df   :  { %1565 = vrot.lane.b32.xlu1 %v1563_v45, %s5224_s10 }
0x2451   :  { %v1566_v46 = vpop.permute.xlu1 %1565 }
0x2452   :  { %v1568_v47 = vmul.f32 %v5094_v39, %v1566_v46  ;;  %v2024_v39 = vld [vmem:[#allocation4 + $0x40] sm:$0xff] }
0x2454   :  { %1570 = vrot.lane.b32.xlu0 %v1568_v47, %s5225_s11 }
0x24c6   :  { %v1571_v48 = vpop.permute.xlu0 %1570 }
0x24c7   :  { %v1573_v49 = vadd.f32 %v5096_v44, %v1571_v48  ;;  %v5607_v48 = vld [vmem:[%s6282_s3 + $0x2] ss:$0 sm:$0xff] }
0x24c9   :  { %1575 = vrot.lane.b32.xlu1 %v1573_v49, %s5222_s8 }
0x253b   :  { %v1576_v50 = vpop.permute.xlu1 %1575 }
0x253c   :  { %1579 = vst.msk [vmem:[#allocation4 + $0x58] sm:$0xff] %vm269_vm4, %v1576_v50  ;;  %4879 = vmatmul.mubr.msk.f32.vlgmr.msra.gmra.mxu0 %vm269_vm4, %v1576_v50 }
0x253d   :  { %4887 = vmatpush3.msk.msra.mxu0 %vm273_vm0, %v5272_v2  ;;  %4888 = vmatprep.mubr.msk.f32.mxu0 %vm5221_vm2, %v5220_v0 }
0x253e   :  { %4896 = vmatprep.subr.msk.mxu0 %vm273_vm0, %v4511_v28 }
0x2543   :  { %v2027_v42 = vld [vmem:[#allocation4 + $0x58] sm:$0xff] }
0x25fc   :  { %v1650_v51 = vpop.f32.mrf.mxu0 }
0x25fd   :  { %v1651_v52 = vadd.f32 %v5300_v5, %v1650_v51 }
0x25fe   :  { %v4880_v53 = vpop.f32.mrf.mxu0 }
0x25ff   :  { %1662 = vrot.lane.b32.xlu0 %v1651_v52, %s5222_s8  ;;  %v1654_v55 = vadd.f32 %v1651_v52, %v1581_v54 }
0x2601   :  { %v4568_v56 = vmul.f32 -1.442695, %v1654_v55 }
0x2603   :  { %5097 = vpow2.f32 %v4568_v56 }
0x2610   :  { %v5098_v57 = vpop.eup %5097 }
0x2611   :  { %v1658_v58 = vadd.f32 1.0, %v5098_v57 }
0x2613   :  { %5099 = vrcp.f32 %v1658_v58 }
0x2620   :  { %v5100_v59 = vpop.eup %5099 }
0x2671   :  { %v1663_v60 = vpop.permute.xlu0 %1662 }
0x2672   :  { %v1665_v61 = vmul.f32 %v5100_v59, %v1663_v60 }
0x2674   :  { %1667 = vrot.lane.b32.xlu1 %v1665_v61, %s5223_s9 }
0x26e6   :  { %v1668_v2 = vpop.permute.xlu1 %1667 }
0x26e7   :  { %v1670_v62 = vadd.f32 %v1668_v2, %v1581_v54 }
0x26e9   :  { %5101 = vtanh.f32 %v1670_v62 }
0x26f6   :  { %v5102_v63 = vpop.eup %5101 }
0x26f7   :  { %v1672_v5 = vsub.f32 %v1573_v49, %v5102_v63 }
0x26f9   :  { %1674 = vrot.lane.b32.xlu0 %v1672_v5, %s5224_s10 }
0x276b   :  { %v1675_v1 = vpop.permute.xlu0 %1674 }
0x276c   :  { %v1677_v3 = vmul.f32 %v5100_v59, %v1675_v1 }
0x276e   :  { %1679 = vrot.lane.b32.xlu1 %v1677_v3, %s5225_s11 }
0x27e0   :  { %v1680_v4 = vpop.permute.xlu1 %1679 }
0x27e1   :  { %v1682_v6 = vadd.f32 %v5102_v63, %v1680_v4 }
0x27e3   :  { %1684 = vrot.lane.b32.xlu0 %v1682_v6, %s5222_s8 }
0x2855   :  { %v1685_v7 = vpop.permute.xlu0 %1684 }
0x2856   :  { %1688 = vst.msk [vmem:[#allocation4 + $0x60] sm:$0xff] %vm269_vm4, %v1685_v7  ;;  %4884 = vmatmul.mubr.msk.f32.vlgmr.msra.gmra.mxu1 %vm269_vm4, %v1685_v7 }
0x2857   :  { %4892 = vmatpush3.msk.msra.mxu1 %vm273_vm0, %v5217_v9  ;;  %4893 = vmatprep.mubr.msk.f32.mxu1 %vm5221_vm2, %v5220_v0 }
0x2858   :  { %4922 = vmatprep.subr.mxu1 %v5220_v0 }
0x285d   :  { %v2028_v43 = vld [vmem:[#allocation4 + $0x60] sm:$0xff] }
0x2916   :  { %v1759_v10 = vpop.f32.mrf.mxu1 }
0x2917   :  { %v1760_v12 = vadd.f32 %v5570_v11, %v1759_v10 }
0x2918   :  { %v4885_v13 = vpop.f32.mrf.mxu1 }
0x2919   :  { %1771 = vrot.lane.b32.xlu1 %v1760_v12, %s5222_s8  ;;  %v1763_v15 = vadd.f32 %v1760_v12, %v1690_v14 }
0x291b   :  { %v4571_v16 = vmul.f32 -1.442695, %v1763_v15 }
0x291d   :  { %5103 = vpow2.f32 %v4571_v16  ;;  %v1799_v16 = vld [vmem:[#allocation2 + $0x70] sm:$0xff] }
0x292a   :  { %v5104_v17 = vpop.eup %5103 }
0x292b   :  { %v1767_v18 = vadd.f32 1.0, %v5104_v17 }
0x292d   :  { %5105 = vrcp.f32 %v1767_v18 }
0x293a   :  { %v5106_v19 = vpop.eup %5105 }
0x298b   :  { %v1772_v20 = vpop.permute.xlu1 %1771 }
0x298c   :  { %v1774_v21 = vmul.f32 %v5106_v19, %v1772_v20 }
0x298e   :  { %1776 = vrot.lane.b32.xlu0 %v1774_v21, %s5223_s9 }
0x2a00   :  { %v1777_v22 = vpop.permute.xlu0 %1776 }
0x2a01   :  { %v1779_v23 = vadd.f32 %v1777_v22, %v1690_v14 }
0x2a03   :  { %5107 = vtanh.f32 %v1779_v23 }
0x2a10   :  { %v5108_v24 = vpop.eup %5107 }
0x2a11   :  { %v1781_v25 = vsub.f32 %v1682_v6, %v5108_v24 }
0x2a13   :  { %1783 = vrot.lane.b32.xlu1 %v1781_v25, %s5224_s10 }
0x2a85   :  { %v1784_v26 = vpop.permute.xlu1 %1783 }
0x2a86   :  { %v1786_v27 = vmul.f32 %v5106_v19, %v1784_v26 }
0x2a88   :  { %1788 = vrot.lane.b32.xlu0 %v1786_v27, %s5225_s11 }
0x2afa   :  { %v1789_v29 = vpop.permute.xlu0 %1788 }
0x2afb   :  { %v5581_v30 = vadd.f32 %v5108_v24, %v1789_v29 }
0x2afd   :  { %1793 = vrot.lane.b32.xlu1 %v5581_v30, %s5222_s8 }
0x2b6f   :  { %v1794_v31 = vpop.permute.xlu1 %1793 }
0x2b70   :  { %1797 = vst.msk [vmem:[#allocation4 + $0x68] sm:$0xff] %vm269_vm4, %v1794_v31  ;;  %4889 = vmatmul.mubr.msk.f32.vlgmr.msra.gmra.mxu0 %vm269_vm4, %v1794_v31  ;;  %v5645_v31 = vld [vmem:[%s6280_s2 + $0x8] sm:$0xf] }
0x2b71   :  { %4898 = vmatprep.mubr.msk.f32.mxu0 %vm269_vm4, %v2016_v32  ;;  %4897 = vmatpush3.msk.msra.mxu0 %vm273_vm0, %v4511_v28 }
0x2b72   :  { %4962 = vmatprep.subr.mxu0 %v5220_v0 }
0x2b74   :  { %4899 = vmatmul.mubr.msk.f32.vlgmr.msra.gmra.mxu0 %vm269_vm4, %v2017_v33 }
0x2b75   :  { %4901 = vmatprep.mubr.msk.f32.mxu0 %vm269_vm4, %v2018_v34  ;;  %4963 = vmatpush3.msk.msra.mxu0 %vm273_vm0, %v5645_v31 }
0x2b76   :  { %4972 = vmatprep.subr.mxu0 %v5220_v0 }
0x2b77   :  { %v2029_v44 = vld [vmem:[#allocation4 + $0x68] sm:$0xff] }
0x2b78   :  { %4902 = vmatmul.mubr.msk.f32.gmra.mxu0 %vm269_vm4, %v2019_v35 }
0x2b79   :  { %4904 = vmatprep.mubr.msk.f32.mxu0 %vm269_vm4, %v2020_v8 }
0x2b7c   :  { %4905 = vmatmul.mubr.msk.f32.gmra.mxu0 %vm269_vm4, %v2021_v36  ;;  %v5673_v36 = vld [vmem:[%s6282_s3 + $0x3] ss:$0 sm:$0xff] }
0x2b7d   :  { %4907 = vmatprep.mubr.msk.f32.mxu0 %vm269_vm4, %v2022_v37 }
0x2b80   :  { %4908 = vmatmul.mubr.msk.f32.gmra.mxu0 %vm269_vm4, %v2023_v38 }
0x2b81   :  { %4910 = vmatprep.mubr.msk.f32.mxu0 %vm269_vm4, %v2024_v39 }
0x2b84   :  { %4911 = vmatmul.mubr.msk.f32.gmra.mxu0 %vm269_vm4, %v2025_v40 }
0x2b85   :  { %4913 = vmatprep.mubr.msk.f32.mxu0 %vm269_vm4, %v2026_v41 }
0x2b88   :  { %4914 = vmatmul.mubr.msk.f32.gmra.mxu0 %vm269_vm4, %v2027_v42 }
0x2b89   :  { %4916 = vmatprep.mubr.msk.f32.mxu0 %vm269_vm4, %v2028_v43 }
0x2b8c   :  { %4917 = vmatmul.mubr.msk.f32.gmra.mxu0 %vm269_vm4, %v2029_v44 }
0x2c30   :  { %v1868_v45 = vpop.f32.mrf.mxu0 }
0x2c31   :  { %v1869_v46 = vadd.f32 %v5570_v11, %v1868_v45 }
0x2c32   :  { %v4890_v47 = vpop.f32.mrf.mxu0 }
0x2c33   :  { %1880 = vrot.lane.b32.xlu0 %v1869_v46, %s5222_s8  ;;  %v1872_v17 = vadd.f32 %v1869_v46, %v1799_v16 }
0x2c34   :  { %v4900_v49 = vpop.f32.mrf.mxu0 }
0x2c35   :  { %v2159_v50 = vadd.f32 %v4900_v49, %v5607_v48  ;;  %v4574_v18 = vmul.f32 -1.442695, %v1872_v17 }
0x2c36   :  { %v2153_v51 = vpop.f32.mrf.mxu0 }
0x2c37   :  { %2233 = vst.msk [vmem:[#allocation3 + $0x8] sm:$0xff] %vm247_vm3, %v2159_v50  ;;  %v2154_v52 = vadd.f32 %v5607_v48, %v2153_v51  ;;  %5109 = vpow2.f32 %v4574_v18 }
0x2c38   :  { %v4903_v53 = vpop.f32.mrf.mxu0 }
0x2c39   :  { %2232 = vst.msk [vmem:[#allocation3] sm:$0xff] %vm247_vm3, %v2154_v52  ;;  %v2169_v54 = vadd.f32 %v4903_v53, %v5607_v48 }
0x2c3a   :  { %v2163_v55 = vpop.f32.mrf.mxu0 }
0x2c3b   :  { %2235 = vst.msk [vmem:[#allocation3 + $0x18] sm:$0xff] %vm247_vm3, %v2169_v54  ;;  %v2164_v56 = vadd.f32 %v5607_v48, %v2163_v55 }
0x2c3c   :  { %v4906_v57 = vpop.f32.mrf.mxu0 }
0x2c3d   :  { %2234 = vst.msk [vmem:[#allocation3 + $0x10] sm:$0xff] %vm247_vm3, %v2164_v56  ;;  %v2179_v58 = vadd.f32 %v4906_v57, %v5607_v48 }
0x2c3e   :  { %v2173_v59 = vpop.f32.mrf.mxu0 }
0x2c3f   :  { %2237 = vst.msk [vmem:[#allocation3 + $0x28] sm:$0xff] %vm247_vm3, %v2179_v58  ;;  %v2174_v60 = vadd.f32 %v5607_v48, %v2173_v59 }
0x2c40   :  { %v4909_v61 = vpop.f32.mrf.mxu0  ;;  %v2248_v40 = vld [vmem:[#allocation3] sm:$0xff] }
0x2c41   :  { %2236 = vst.msk [vmem:[#allocation3 + $0x20] sm:$0xff] %vm247_vm3, %v2174_v60  ;;  %v2189_v2 = vadd.f32 %v4909_v61, %v5607_v48  ;;  %v2361_v61 = vld [vmem:[#allocation3 + $0x8] sm:$0xff] }
0x2c42   :  { %v2183_v62 = vpop.f32.mrf.mxu0 }
0x2c43   :  { %2239 = vst.msk [vmem:[#allocation3 + $0x38] sm:$0xff] %vm247_vm3, %v2189_v2  ;;  %v2184_v63 = vadd.f32 %v5607_v48, %v2183_v62 }
0x2c44   :  { %v4912_v5 = vpop.f32.mrf.mxu0  ;;  %v5110_v19 = vpop.eup %5109 }
0x2c45   :  { %2238 = vst.msk [vmem:[#allocation3 + $0x30] sm:$0xff] %vm247_vm3, %v2184_v63  ;;  %v2199_v1 = vadd.f32 %v4912_v5, %v5607_v48  ;;  %v1876_v20 = vadd.f32 1.0, %v5110_v19 }
0x2c46   :  { %v2193_v3 = vpop.f32.mrf.mxu0 }
0x2c47   :  { %2241 = vst.msk [vmem:[#allocation3 + $0x48] sm:$0xff] %vm247_vm3, %v2199_v1  ;;  %v2194_v4 = vadd.f32 %v5607_v48, %v2193_v3  ;;  %5111 = vrcp.f32 %v1876_v20  ;;  %v2470_v20 = vld [vmem:[#allocation3 + $0x10] sm:$0xff] }
0x2c48   :  { %v4915_v6 = vpop.f32.mrf.mxu0 }
0x2c49   :  { %2240 = vst.msk [vmem:[#allocation3 + $0x40] sm:$0xff] %vm247_vm3, %v2194_v4  ;;  %v2209_v7 = vadd.f32 %v4915_v6, %v5607_v48 }
0x2c4a   :  { %v2203_v9 = vpop.f32.mrf.mxu0 }
0x2c4b   :  { %2243 = vst.msk [vmem:[#allocation3 + $0x58] sm:$0xff] %vm247_vm3, %v2209_v7  ;;  %v2204_v10 = vadd.f32 %v5607_v48, %v2203_v9 }
0x2c4c   :  { %v4918_v12 = vpop.f32.mrf.mxu0 }
0x2c4d   :  { %2242 = vst.msk [vmem:[#allocation3 + $0x50] sm:$0xff] %vm247_vm3, %v2204_v10  ;;  %v2219_v13 = vadd.f32 %v4918_v12, %v5607_v48 }
0x2c4e   :  { %v2213_v14 = vpop.f32.mrf.mxu0 }
0x2c4f   :  { %2245 = vst.msk [vmem:[#allocation3 + $0x68] sm:$0xff] %vm247_vm3, %v2219_v13  ;;  %v2214_v15 = vadd.f32 %v5607_v48, %v2213_v14 }
0x2c51   :  { %2244 = vst.msk [vmem:[#allocation3 + $0x60] sm:$0xff] %vm247_vm3, %v2214_v15 }
0x2c54   :  { %v5112_v21 = vpop.eup %5111 }
0x2ca5   :  { %v1881_v22 = vpop.permute.xlu0 %1880 }
0x2ca6   :  { %v1883_v23 = vmul.f32 %v5112_v21, %v1881_v22 }
0x2ca8   :  { %1885 = vrot.lane.b32.xlu1 %v1883_v23, %s5223_s9 }
0x2d1a   :  { %v1886_v24 = vpop.permute.xlu1 %1885 }
0x2d1b   :  { %v1888_v25 = vadd.f32 %v1886_v24, %v1799_v16 }
0x2d1d   :  { %5113 = vtanh.f32 %v1888_v25 }
0x2d2a   :  { %v5114_v26 = vpop.eup %5113 }
0x2d2b   :  { %v1890_v27 = vsub.f32 %v5581_v30, %v5114_v26 }
0x2d2d   :  { %1892 = vrot.lane.b32.xlu0 %v1890_v27, %s5224_s10 }
0x2d9f   :  { %v1893_v28 = vpop.permute.xlu0 %1892 }
0x2da0   :  { %v1895_v29 = vmul.f32 %v5112_v21, %v1893_v28 }
0x2da2   :  { %1897 = vrot.lane.b32.xlu1 %v1895_v29, %s5225_s11 }
0x2e14   :  { %v1898_v32 = vpop.permute.xlu1 %1897 }
0x2e15   :  { %v5650_v33 = vadd.f32 %v5114_v26, %v1898_v32 }
0x2e17   :  { %1902 = vrot.lane.b32.xlu0 %v5650_v33, %s5222_s8 }
0x2e89   :  { %v1903_v30 = vpop.permute.xlu0 %1902 }
0x2e8a   :  { %1906 = vst.msk [vmem:[#allocation4 + $0x70] sm:$0xff] %vm269_vm4, %v1903_v30  ;;  %4894 = vmatmul.mubr.msk.f32.vlgmr.msra.gmra.mxu1 %vm269_vm4, %v1903_v30 }
0x2e8b   :  { %4923 = vmatpush3.msk.msra.mxu1 %vm273_vm0, %v5645_v31  ;;  %4924 = vmatprep.mubr.msk.f32.mxu1 %vm5221_vm2, %v5220_v0 }
0x2e8c   :  { %4927 = vmatprep.subr.mxu1 %v5220_v0 }
0x2e8e   :  { %4925 = vmatmul.mubr.f32.vlgmr.msra.gmra.mxu1 %v5220_v0 }
0x2e8f   :  { %4928 = vmatpush3.msk.msra.mxu1 %vm273_vm0, %v5645_v31  ;;  %4929 = vmatprep.mubr.msk.f32.mxu1 %vm5221_vm2, %v5220_v0 }
0x2e90   :  { %4932 = vmatprep.subr.mxu1 %v5220_v0 }
0x2e91   :  { %v2030_v34 = vld [vmem:[#allocation4 + $0x70] sm:$0xff] }
0x2e92   :  { %4919 = vmatprep.mubr.msk.f32.mxu0 %vm269_vm4, %v2030_v34 }
0x2f4a   :  { %v5668_v35 = vpop.f32.mrf.mxu1 }
0x2f4c   :  { %v4895_v8 = vpop.f32.mrf.mxu1 }
0x2f4e   :  { %v2322_v37 = vpop.f32.mrf.mxu1 }
0x2f4f   :  { %v2323_v38 = vadd.f32 %v5673_v36, %v2322_v37 }
0x2f50   :  { %v4926_v39 = vpop.f32.mrf.mxu1 }
0x2f51   :  { %2334 = vrot.lane.b32.xlu1 %v2323_v38, %s5222_s8  ;;  %v2326_v41 = vadd.f32 %v2323_v38, %v2248_v40 }
0x2f53   :  { %v4598_v42 = vmul.f32 -1.442695, %v2326_v41 }
0x2f55   :  { %5115 = vpow2.f32 %v4598_v42 }
0x2f62   :  { %v5116_v43 = vpop.eup %5115 }
0x2f63   :  { %v2330_v44 = vadd.f32 1.0, %v5116_v43  ;;  %v2579_v43 = vld [vmem:[#allocation3 + $0x18] sm:$0xff] }
0x2f65   :  { %5117 = vrcp.f32 %v2330_v44 }
0x2f72   :  { %v5118_v45 = vpop.eup %5117 }
0x2fc3   :  { %v2335_v46 = vpop.permute.xlu1 %2334 }
0x2fc4   :  { %v2337_v47 = vmul.f32 %v5118_v45, %v2335_v46 }
0x2fc6   :  { %2339 = vrot.lane.b32.xlu0 %v2337_v47, %s5223_s9 }
0x3038   :  { %v2340_v49 = vpop.permute.xlu0 %2339 }
0x3039   :  { %v2342_v50 = vadd.f32 %v2340_v49, %v2248_v40 }
0x303b   :  { %5119 = vtanh.f32 %v2342_v50 }
0x3048   :  { %v5120_v51 = vpop.eup %5119 }
0x3049   :  { %v2344_v52 = vsub.f32 0.0, %v5120_v51 }
0x304b   :  { %2346 = vrot.lane.b32.xlu1 %v2344_v52, %s5224_s10 }
0x30bd   :  { %v2347_v53 = vpop.permute.xlu1 %2346 }
0x30be   :  { %v2349_v54 = vmul.f32 %v5118_v45, %v2347_v53 }
0x30c0   :  { %2351 = vrot.lane.b32.xlu0 %v2349_v54, %s5225_s11 }
0x3132   :  { %v2352_v55 = vpop.permute.xlu0 %2351 }
0x3133   :  { %v2354_v56 = vadd.f32 %v5120_v51, %v2352_v55 }
0x3135   :  { %2356 = vrot.lane.b32.xlu1 %v2354_v56, %s5222_s8 }
0x31a7   :  { %v2357_v57 = vpop.permute.xlu1 %2356 }
0x31a8   :  { %2359 = vst.msk [vmem:[#allocation5] sm:$0xff] %vm269_vm4, %v2357_v57  ;;  %4930 = vmatmul.mubr.msk.f32.vlgmr.msra.gmra.mxu1 %vm269_vm4, %v2357_v57 }
0x31a9   :  { %4933 = vmatpush3.msk.msra.mxu1 %vm273_vm0, %v5645_v31  ;;  %4934 = vmatprep.mubr.msk.f32.mxu1 %vm5221_vm2, %v5220_v0 }
0x31aa   :  { %4937 = vmatprep.subr.mxu1 %v5220_v0 }
0x3268   :  { %v2430_v58 = vpop.f32.mrf.mxu1 }
0x3269   :  { %v2431_v59 = vadd.f32 %v5673_v36, %v2430_v58 }
0x326a   :  { %v4931_v60 = vpop.f32.mrf.mxu1 }
0x326b   :  { %2442 = vrot.lane.b32.xlu0 %v2431_v59, %s5222_s8  ;;  %v2434_v2 = vadd.f32 %v2431_v59, %v2361_v61 }
0x326d   :  { %v4601_v62 = vmul.f32 -1.442695, %v2434_v2 }
0x326f   :  { %5121 = vpow2.f32 %v4601_v62 }
0x327c   :  { %v5122_v63 = vpop.eup %5121 }
0x327d   :  { %v2438_v5 = vadd.f32 1.0, %v5122_v63  ;;  %v2688_v63 = vld [vmem:[#allocation3 + $0x20] sm:$0xff] }
0x327f   :  { %5123 = vrcp.f32 %v2438_v5 }
0x328c   :  { %v5124_v1 = vpop.eup %5123 }
0x32dd   :  { %v2443_v3 = vpop.permute.xlu0 %2442 }
0x32de   :  { %v2445_v4 = vmul.f32 %v5124_v1, %v2443_v3 }
0x32e0   :  { %2447 = vrot.lane.b32.xlu1 %v2445_v4, %s5223_s9 }
0x3352   :  { %v2448_v6 = vpop.permute.xlu1 %2447 }
0x3353   :  { %v2450_v7 = vadd.f32 %v2448_v6, %v2361_v61 }
0x3355   :  { %5125 = vtanh.f32 %v2450_v7 }
0x3362   :  { %v5126_v9 = vpop.eup %5125 }
0x3363   :  { %v2452_v10 = vsub.f32 %v2354_v56, %v5126_v9 }
0x3365   :  { %2454 = vrot.lane.b32.xlu0 %v2452_v10, %s5224_s10 }
0x33d7   :  { %v2455_v12 = vpop.permute.xlu0 %2454 }
0x33d8   :  { %v2457_v13 = vmul.f32 %v5124_v1, %v2455_v12 }
0x33da   :  { %2459 = vrot.lane.b32.xlu1 %v2457_v13, %s5225_s11 }
0x344c   :  { %v2460_v14 = vpop.permute.xlu1 %2459 }
0x344d   :  { %v2462_v15 = vadd.f32 %v5126_v9, %v2460_v14 }
0x344f   :  { %2464 = vrot.lane.b32.xlu0 %v2462_v15, %s5222_s8 }
0x34c1   :  { %v2465_v16 = vpop.permute.xlu0 %2464 }
0x34c2   :  { %2468 = vst.msk [vmem:[#allocation5 + $0x8] sm:$0xff] %vm269_vm4, %v2465_v16  ;;  %4935 = vmatmul.mubr.msk.f32.vlgmr.msra.gmra.mxu1 %vm269_vm4, %v2465_v16 }
0x34c3   :  { %4938 = vmatpush3.msk.msra.mxu1 %vm273_vm0, %v5645_v31  ;;  %4939 = vmatprep.mubr.msk.f32.mxu1 %vm5221_vm2, %v5220_v0 }
0x34c4   :  { %4942 = vmatprep.subr.mxu1 %v5220_v0 }
0x3582   :  { %v2539_v17 = vpop.f32.mrf.mxu1 }
0x3583   :  { %v2540_v18 = vadd.f32 %v5673_v36, %v2539_v17 }
0x3584   :  { %v4936_v19 = vpop.f32.mrf.mxu1 }
0x3585   :  { %2551 = vrot.lane.b32.xlu1 %v2540_v18, %s5222_s8  ;;  %v2543_v21 = vadd.f32 %v2540_v18, %v2470_v20 }
0x3587   :  { %v4604_v22 = vmul.f32 -1.442695, %v2543_v21 }
0x3589   :  { %5127 = vpow2.f32 %v4604_v22 }
0x3596   :  { %v5128_v23 = vpop.eup %5127 }
0x3597   :  { %v2547_v24 = vadd.f32 1.0, %v5128_v23  ;;  %v2797_v23 = vld [vmem:[#allocation3 + $0x28] sm:$0xff] }
0x3599   :  { %5129 = vrcp.f32 %v2547_v24 }
0x35a6   :  { %v5130_v25 = vpop.eup %5129 }
0x35f7   :  { %v2552_v26 = vpop.permute.xlu1 %2551 }
0x35f8   :  { %v2554_v27 = vmul.f32 %v5130_v25, %v2552_v26 }
0x35fa   :  { %2556 = vrot.lane.b32.xlu0 %v2554_v27, %s5223_s9 }
0x366c   :  { %v2557_v28 = vpop.permute.xlu0 %2556 }
0x366d   :  { %v2559_v29 = vadd.f32 %v2557_v28, %v2470_v20 }
0x366f   :  { %5131 = vtanh.f32 %v2559_v29 }
0x367c   :  { %v5132_v32 = vpop.eup %5131 }
0x367d   :  { %v2561_v30 = vsub.f32 %v2462_v15, %v5132_v32 }
0x367f   :  { %2563 = vrot.lane.b32.xlu1 %v2561_v30, %s5224_s10 }
0x36f1   :  { %v2564_v34 = vpop.permute.xlu1 %2563 }
0x36f2   :  { %v2566_v8 = vmul.f32 %v5130_v25, %v2564_v34 }
0x36f4   :  { %2568 = vrot.lane.b32.xlu0 %v2566_v8, %s5225_s11 }
0x3766   :  { %v2569_v37 = vpop.permute.xlu0 %2568 }
0x3767   :  { %v2571_v38 = vadd.f32 %v5132_v32, %v2569_v37 }
0x3769   :  { %2573 = vrot.lane.b32.xlu1 %v2571_v38, %s5222_s8 }
0x37db   :  { %v2574_v39 = vpop.permute.xlu1 %2573 }
0x37dc   :  { %2577 = vst.msk [vmem:[#allocation5 + $0x10] sm:$0xff] %vm269_vm4, %v2574_v39  ;;  %4940 = vmatmul.mubr.msk.f32.vlgmr.msra.gmra.mxu1 %vm269_vm4, %v2574_v39 }
0x37dd   :  { %4943 = vmatpush3.msk.msra.mxu1 %vm273_vm0, %v5645_v31  ;;  %4944 = vmatprep.mubr.msk.f32.mxu1 %vm5221_vm2, %v5220_v0 }
0x37de   :  { %4947 = vmatprep.subr.mxu1 %v5220_v0 }
0x389c   :  { %v2648_v40 = vpop.f32.mrf.mxu1 }
0x389d   :  { %v2649_v41 = vadd.f32 %v5673_v36, %v2648_v40 }
0x389e   :  { %v4941_v42 = vpop.f32.mrf.mxu1 }
0x389f   :  { %2660 = vrot.lane.b32.xlu0 %v2649_v41, %s5222_s8  ;;  %v2652_v44 = vadd.f32 %v2649_v41, %v2579_v43 }
0x38a1   :  { %v4607_v45 = vmul.f32 -1.442695, %v2652_v44 }
0x38a3   :  { %5133 = vpow2.f32 %v4607_v45 }
0x38b0   :  { %v5134_v46 = vpop.eup %5133 }
0x38b1   :  { %v2656_v47 = vadd.f32 1.0, %v5134_v46  ;;  %v2906_v46 = vld [vmem:[#allocation3 + $0x30] sm:$0xff] }
0x38b3   :  { %5135 = vrcp.f32 %v2656_v47 }
0x38c0   :  { %v5136_v49 = vpop.eup %5135 }
0x3911   :  { %v2661_v50 = vpop.permute.xlu0 %2660 }
0x3912   :  { %v2663_v51 = vmul.f32 %v5136_v49, %v2661_v50 }
0x3914   :  { %2665 = vrot.lane.b32.xlu1 %v2663_v51, %s5223_s9 }
0x3986   :  { %v2666_v52 = vpop.permute.xlu1 %2665 }
0x3987   :  { %v2668_v53 = vadd.f32 %v2666_v52, %v2579_v43 }
0x3989   :  { %5137 = vtanh.f32 %v2668_v53 }
0x3996   :  { %v5138_v54 = vpop.eup %5137 }
0x3997   :  { %v2670_v55 = vsub.f32 %v2571_v38, %v5138_v54 }
0x3999   :  { %2672 = vrot.lane.b32.xlu0 %v2670_v55, %s5224_s10 }
0x3a0b   :  { %v2673_v56 = vpop.permute.xlu0 %2672 }
0x3a0c   :  { %v2675_v57 = vmul.f32 %v5136_v49, %v2673_v56 }
0x3a0e   :  { %2677 = vrot.lane.b32.xlu1 %v2675_v57, %s5225_s11 }
0x3a80   :  { %v2678_v58 = vpop.permute.xlu1 %2677 }
0x3a81   :  { %v2680_v59 = vadd.f32 %v5138_v54, %v2678_v58 }
0x3a83   :  { %2682 = vrot.lane.b32.xlu0 %v2680_v59, %s5222_s8 }
0x3af5   :  { %v2683_v60 = vpop.permute.xlu0 %2682 }
0x3af6   :  { %2686 = vst.msk [vmem:[#allocation5 + $0x18] sm:$0xff] %vm269_vm4, %v2683_v60  ;;  %4945 = vmatmul.mubr.msk.f32.vlgmr.msra.gmra.mxu1 %vm269_vm4, %v2683_v60 }
0x3af7   :  { %4948 = vmatpush3.msk.msra.mxu1 %vm273_vm0, %v5645_v31  ;;  %4949 = vmatprep.mubr.msk.f32.mxu1 %vm5221_vm2, %v5220_v0 }
0x3af8   :  { %4952 = vmatprep.subr.mxu1 %v5220_v0 }
0x3bb6   :  { %v2757_v61 = vpop.f32.mrf.mxu1 }
0x3bb7   :  { %v2758_v2 = vadd.f32 %v5673_v36, %v2757_v61  ;;  %v1978_v61 = vadd.f32 %v5570_v11, %v5668_v35 }
0x3bb8   :  { %v4946_v62 = vpop.f32.mrf.mxu1 }
0x3bb9   :  { %2769 = vrot.lane.b32.xlu1 %v2758_v2, %s5222_s8  ;;  %v2761_v5 = vadd.f32 %v2758_v2, %v2688_v63  ;;  %v1908_v2 = vld [vmem:[#allocation2 + $0x78] sm:$0xff] }
0x3bba   :  { %v1981_v62 = vadd.f32 %v1978_v61, %v1908_v2 }
0x3bbb   :  { %v4610_v1 = vmul.f32 -1.442695, %v2761_v5 }
0x3bbd   :  { %5139 = vpow2.f32 %v4610_v1 }
0x3bca   :  { %v5140_v3 = vpop.eup %5139 }
0x3bcb   :  { %v2765_v4 = vadd.f32 1.0, %v5140_v3 }
0x3bcd   :  { %5141 = vrcp.f32 %v2765_v4 }
0x3bda   :  { %v5142_v6 = vpop.eup %5141 }
0x3c2b   :  { %v2770_v7 = vpop.permute.xlu1 %2769 }
0x3c2c   :  { %v2772_v9 = vmul.f32 %v5142_v6, %v2770_v7 }
0x3c2e   :  { %2774 = vrot.lane.b32.xlu0 %v2772_v9, %s5223_s9 }
0x3ca0   :  { %v2775_v10 = vpop.permute.xlu0 %2774 }
0x3ca1   :  { %v2777_v12 = vadd.f32 %v2775_v10, %v2688_v63  ;;  %v4577_v63 = vmul.f32 -1.442695, %v1981_v62 }
0x3ca3   :  { %5143 = vtanh.f32 %v2777_v12 }
0x3cb0   :  { %v5144_v13 = vpop.eup %5143 }
0x3cb1   :  { %v2779_v14 = vsub.f32 %v2680_v59, %v5144_v13 }
0x3cb3   :  { %2781 = vrot.lane.b32.xlu1 %v2779_v14, %s5224_s10 }
0x3d25   :  { %v2782_v15 = vpop.permute.xlu1 %2781 }
0x3d26   :  { %v2784_v16 = vmul.f32 %v5142_v6, %v2782_v15 }
0x3d28   :  { %2786 = vrot.lane.b32.xlu0 %v2784_v16, %s5225_s11 }
0x3d9a   :  { %v2787_v17 = vpop.permute.xlu0 %2786 }
0x3d9b   :  { %v2789_v18 = vadd.f32 %v5144_v13, %v2787_v17 }
0x3d9d   :  { %2791 = vrot.lane.b32.xlu1 %v2789_v18, %s5222_s8 }
0x3e0f   :  { %v2792_v19 = vpop.permute.xlu1 %2791 }
0x3e10   :  { %2795 = vst.msk [vmem:[#allocation5 + $0x20] sm:$0xff] %vm269_vm4, %v2792_v19  ;;  %4950 = vmatmul.mubr.msk.f32.vlgmr.msra.gmra.mxu1 %vm269_vm4, %v2792_v19 }
0x3e11   :  { %4953 = vmatpush3.msk.msra.mxu1 %vm273_vm0, %v5645_v31  ;;  %4954 = vmatprep.mubr.msk.f32.mxu1 %vm5221_vm2, %v5220_v0 }
0x3e12   :  { %4957 = vmatprep.subr.mxu1 %v5220_v0 }
0x3ed0   :  { %v2866_v20 = vpop.f32.mrf.mxu1 }
0x3ed1   :  { %v2867_v21 = vadd.f32 %v5673_v36, %v2866_v20 }
0x3ed2   :  { %v4951_v22 = vpop.f32.mrf.mxu1 }
0x3ed3   :  { %2878 = vrot.lane.b32.xlu0 %v2867_v21, %s5222_s8  ;;  %v2870_v24 = vadd.f32 %v2867_v21, %v2797_v23  ;;  %v3015_v21 = vld [vmem:[#allocation3 + $0x38] sm:$0xff] }
0x3ed5   :  { %v4613_v25 = vmul.f32 -1.442695, %v2870_v24 }
0x3ed7   :  { %5145 = vpow2.f32 %v4613_v25 }
0x3ee4   :  { %v5146_v26 = vpop.eup %5145 }
0x3ee5   :  { %v2874_v27 = vadd.f32 1.0, %v5146_v26 }
0x3ee7   :  { %5147 = vrcp.f32 %v2874_v27 }
0x3ef4   :  { %v5148_v28 = vpop.eup %5147 }
0x3f45   :  { %v2879_v29 = vpop.permute.xlu0 %2878 }
0x3f46   :  { %v2881_v32 = vmul.f32 %v5148_v28, %v2879_v29 }
0x3f48   :  { %2883 = vrot.lane.b32.xlu1 %v2881_v32, %s5223_s9 }
0x3fba   :  { %v2884_v30 = vpop.permute.xlu1 %2883 }
0x3fbb   :  { %v2886_v34 = vadd.f32 %v2884_v30, %v2797_v23 }
0x3fbd   :  { %5149 = vtanh.f32 %v2886_v34 }
0x3fca   :  { %v5150_v8 = vpop.eup %5149 }
0x3fcb   :  { %v2888_v37 = vsub.f32 %v2789_v18, %v5150_v8 }
0x3fcd   :  { %2890 = vrot.lane.b32.xlu0 %v2888_v37, %s5224_s10 }
0x403f   :  { %v2891_v38 = vpop.permute.xlu0 %2890 }
0x4040   :  { %v2893_v39 = vmul.f32 %v5148_v28, %v2891_v38 }
0x4042   :  { %2895 = vrot.lane.b32.xlu1 %v2893_v39, %s5225_s11 }
0x40b4   :  { %v2896_v40 = vpop.permute.xlu1 %2895 }
0x40b5   :  { %v2898_v41 = vadd.f32 %v5150_v8, %v2896_v40 }
0x40b7   :  { %2900 = vrot.lane.b32.xlu0 %v2898_v41, %s5222_s8 }
0x4129   :  { %v2901_v42 = vpop.permute.xlu0 %2900 }
0x412a   :  { %2904 = vst.msk [vmem:[#allocation5 + $0x28] sm:$0xff] %vm269_vm4, %v2901_v42  ;;  %4955 = vmatmul.mubr.msk.f32.vlgmr.msra.gmra.mxu1 %vm269_vm4, %v2901_v42 }
0x412b   :  { %4958 = vmatpush3.msk.msra.mxu1 %vm273_vm0, %v5645_v31  ;;  %4959 = vmatprep.mubr.msk.f32.mxu1 %vm5221_vm2, %v5220_v0 }
0x412c   :  { %4967 = vmatprep.subr.mxu1 %v5220_v0 }
0x41ea   :  { %v2975_v43 = vpop.f32.mrf.mxu1 }
0x41eb   :  { %v2976_v44 = vadd.f32 %v5673_v36, %v2975_v43 }
0x41ec   :  { %v4956_v45 = vpop.f32.mrf.mxu1 }
0x41ed   :  { %2987 = vrot.lane.b32.xlu1 %v2976_v44, %s5222_s8  ;;  %v2979_v47 = vadd.f32 %v2976_v44, %v2906_v46 }
0x41ef   :  { %v4616_v49 = vmul.f32 -1.442695, %v2979_v47 }
0x41f1   :  { %5151 = vpow2.f32 %v4616_v49  ;;  %v3124_v49 = vld [vmem:[#allocation3 + $0x40] sm:$0xff] }
0x41fe   :  { %v5152_v50 = vpop.eup %5151 }
0x41ff   :  { %v2983_v51 = vadd.f32 1.0, %v5152_v50 }
0x4201   :  { %5153 = vrcp.f32 %v2983_v51 }
0x420e   :  { %v5154_v52 = vpop.eup %5153 }
0x425f   :  { %v2988_v53 = vpop.permute.xlu1 %2987 }
0x4260   :  { %v2990_v54 = vmul.f32 %v5154_v52, %v2988_v53 }
0x4262   :  { %2992 = vrot.lane.b32.xlu0 %v2990_v54, %s5223_s9 }
0x42d4   :  { %v2993_v55 = vpop.permute.xlu0 %2992 }
0x42d5   :  { %v2995_v56 = vadd.f32 %v2993_v55, %v2906_v46 }
0x42d7   :  { %5155 = vtanh.f32 %v2995_v56 }
0x42d8   :  { %5157 = vpow2.f32 %v4577_v63 }
0x42e4   :  { %v5156_v57 = vpop.eup %5155 }
0x42e5   :  { %v2997_v58 = vsub.f32 %v2898_v41, %v5156_v57  ;;  %v5158_v5 = vpop.eup %5157 }
0x42e6   :  { %v1985_v1 = vadd.f32 1.0, %v5158_v5 }
0x42e7   :  { %2999 = vrot.lane.b32.xlu1 %v2997_v58, %s5224_s10 }
0x42e8   :  { %5159 = vrcp.f32 %v1985_v1 }
0x42f5   :  { %v5160_v6 = vpop.eup %5159 }
0x4359   :  { %v3000_v59 = vpop.permute.xlu1 %2999 }
0x435a   :  { %v3002_v60 = vmul.f32 %v5154_v52, %v3000_v59 }
0x435c   :  { %3004 = vrot.lane.b32.xlu0 %v3002_v60, %s5225_s11 }
0x4360   :  { %1989 = vrot.lane.b32.xlu0 %v1978_v61, %s5222_s8 }
0x43ce   :  { %v3005_v3 = vpop.permute.xlu0 %3004 }
0x43cf   :  { %v3007_v4 = vadd.f32 %v5156_v57, %v3005_v3 }
0x43d1   :  { %3009 = vrot.lane.b32.xlu1 %v3007_v4, %s5222_s8 }
0x43d2   :  { %v1990_v7 = vpop.permute.xlu0 %1989 }
0x43d3   :  { %v1992_v9 = vmul.f32 %v5160_v6, %v1990_v7 }
0x43d5   :  { %1994 = vrot.lane.b32.xlu0 %v1992_v9, %s5223_s9 }
0x4443   :  { %v3010_v10 = vpop.permute.xlu1 %3009 }
0x4444   :  { %3013 = vst.msk [vmem:[#allocation5 + $0x30] sm:$0xff] %vm269_vm4, %v3010_v10  ;;  %4960 = vmatmul.mubr.msk.f32.vlgmr.msra.gmra.mxu1 %vm269_vm4, %v3010_v10 }
0x4445   :  { %4968 = vmatpush3.msk.msra.mxu1 %vm273_vm0, %v5645_v31  ;;  %4969 = vmatprep.mubr.msk.f32.mxu1 %vm5221_vm2, %v5220_v0 }
0x4446   :  { %4977 = vmatprep.subr.mxu1 %v5220_v0 }
0x4447   :  { %v1995_v11 = vpop.permute.xlu0 %1994 }
0x4448   :  { %v1997_v35 = vadd.f32 %v1995_v11, %v1908_v2 }
0x444a   :  { %5161 = vtanh.f32 %v1997_v35 }
0x4457   :  { %v5162_v12 = vpop.eup %5161 }
0x4458   :  { %v1999_v13 = vsub.f32 %v5650_v33, %v5162_v12 }
0x445a   :  { %2001 = vrot.lane.b32.xlu0 %v1999_v13, %s5224_s10 }
0x44cc   :  { %v2002_v14 = vpop.permute.xlu0 %2001 }
0x44cd   :  { %v2004_v15 = vmul.f32 %v5160_v6, %v2002_v14  ;;  %v3233_v6 = vld [vmem:[#allocation3 + $0x48] sm:$0xff] }
0x44cf   :  { %2006 = vrot.lane.b32.xlu0 %v2004_v15, %s5225_s11 }
0x4504   :  { %v3084_v16 = vpop.f32.mrf.mxu1 }
0x4505   :  { %v3085_v17 = vadd.f32 %v5673_v36, %v3084_v16 }
0x4506   :  { %v4961_v18 = vpop.f32.mrf.mxu1 }
0x4507   :  { %3096 = vrot.lane.b32.xlu1 %v3085_v17, %s5222_s8  ;;  %v3088_v22 = vadd.f32 %v3085_v17, %v3015_v21 }
0x4509   :  { %v4619_v23 = vmul.f32 -1.442695, %v3088_v22 }
0x450b   :  { %5163 = vpow2.f32 %v4619_v23 }
0x4518   :  { %v5164_v33 = vpop.eup %5163 }
0x4519   :  { %v3092_v24 = vadd.f32 1.0, %v5164_v33 }
0x451b   :  { %5165 = vrcp.f32 %v3092_v24 }
0x4528   :  { %v5166_v25 = vpop.eup %5165 }
0x4541   :  { %v2007_v19 = vpop.permute.xlu0 %2006 }
0x4542   :  { %v2009_v20 = vadd.f32 %v5162_v12, %v2007_v19 }
0x4544   :  { %2011 = vrot.lane.b32.xlu0 %v2009_v20, %s5222_s8 }
0x4579   :  { %v3097_v26 = vpop.permute.xlu1 %3096 }
0x457a   :  { %v3099_v27 = vmul.f32 %v5166_v25, %v3097_v26 }
0x457c   :  { %3101 = vrot.lane.b32.xlu1 %v3099_v27, %s5223_s9 }
0x45b6   :  { %v2012_v28 = vpop.permute.xlu0 %2011 }
0x45b7   :  { %2015 = vst.msk [vmem:[#allocation4 + $0x78] sm:$0xff] %vm269_vm4, %v2012_v28 }
0x45be   :  { %v2031_v29 = vld [vmem:[#allocation4 + $0x78] sm:$0xff] }
0x45bf   :  { %4920 = vmatmul.mubr.msk.f32.gmra.mxu0 %vm269_vm4, %v2031_v29 }
0x45c0   :  { %4964 = vmatprep.mubr.msk.f32.mxu0 %vm5221_vm2, %v5220_v0 }
0x45ee   :  { %v3102_v32 = vpop.permute.xlu1 %3101 }
0x45ef   :  { %v3104_v30 = vadd.f32 %v3102_v32, %v3015_v21 }
0x45f1   :  { %5167 = vtanh.f32 %v3104_v30 }
0x45fe   :  { %v5168_v34 = vpop.eup %5167 }
0x45ff   :  { %v3106_v8 = vsub.f32 %v3007_v4, %v5168_v34 }
0x4601   :  { %3108 = vrot.lane.b32.xlu1 %v3106_v8, %s5224_s10 }
0x4673   :  { %v3109_v37 = vpop.permute.xlu1 %3108 }
0x4674   :  { %v3111_v38 = vmul.f32 %v5166_v25, %v3109_v37  ;;  %v3342_v25 = vld [vmem:[#allocation3 + $0x50] sm:$0xff] }
0x4676   :  { %3113 = vrot.lane.b32.xlu1 %v3111_v38, %s5225_s11 }
0x467f   :  { %v4921_v39 = vpop.f32.mrf.mxu0 }
0x4680   :  { %v2229_v40 = vadd.f32 %v4921_v39, %v5607_v48 }
0x4681   :  { %v2223_v41 = vpop.f32.mrf.mxu0 }
0x4682   :  { %2247 = vst.msk [vmem:[#allocation3 + $0x78] sm:$0xff] %vm247_vm3, %v2229_v40  ;;  %v2224_v42 = vadd.f32 %v5607_v48, %v2223_v41 }
0x4684   :  { %2246 = vst.msk [vmem:[#allocation3 + $0x70] sm:$0xff] %vm247_vm3, %v2224_v42 }
0x46e8   :  { %v3114_v43 = vpop.permute.xlu1 %3113 }
0x46e9   :  { %v3116_v44 = vadd.f32 %v5168_v34, %v3114_v43 }
0x46eb   :  { %3118 = vrot.lane.b32.xlu1 %v3116_v44, %s5222_s8 }
0x475d   :  { %v3119_v45 = vpop.permute.xlu1 %3118 }
0x475e   :  { %3122 = vst.msk [vmem:[#allocation5 + $0x38] sm:$0xff] %vm269_vm4, %v3119_v45  ;;  %4965 = vmatmul.mubr.msk.f32.vlgmr.msra.gmra.mxu0 %vm269_vm4, %v3119_v45 }
0x475f   :  { %4973 = vmatpush3.msk.msra.mxu0 %vm273_vm0, %v5645_v31  ;;  %4974 = vmatprep.mubr.msk.f32.mxu0 %vm5221_vm2, %v5220_v0 }
0x4760   :  { %4982 = vmatprep.subr.mxu0 %v5220_v0 }
0x481e   :  { %v3193_v48 = vpop.f32.mrf.mxu0 }
0x481f   :  { %v3194_v46 = vadd.f32 %v5673_v36, %v3193_v48 }
0x4820   :  { %v4966_v47 = vpop.f32.mrf.mxu0 }
0x4821   :  { %3205 = vrot.lane.b32.xlu0 %v3194_v46, %s5222_s8  ;;  %v3197_v50 = vadd.f32 %v3194_v46, %v3124_v49  ;;  %v3451_v47 = vld [vmem:[#allocation3 + $0x58] sm:$0xff] }
0x4823   :  { %v4622_v51 = vmul.f32 -1.442695, %v3197_v50 }
0x4825   :  { %5169 = vpow2.f32 %v4622_v51 }
0x4832   :  { %v5170_v52 = vpop.eup %5169 }
0x4833   :  { %v3201_v53 = vadd.f32 1.0, %v5170_v52 }
0x4835   :  { %5171 = vrcp.f32 %v3201_v53 }
0x4842   :  { %v5172_v54 = vpop.eup %5171 }
0x4893   :  { %v3206_v55 = vpop.permute.xlu0 %3205 }
0x4894   :  { %v3208_v56 = vmul.f32 %v5172_v54, %v3206_v55 }
0x4896   :  { %3210 = vrot.lane.b32.xlu1 %v3208_v56, %s5223_s9 }
0x4908   :  { %v3211_v57 = vpop.permute.xlu1 %3210 }
0x4909   :  { %v3213_v58 = vadd.f32 %v3211_v57, %v3124_v49 }
0x490b   :  { %5173 = vtanh.f32 %v3213_v58 }
0x4918   :  { %v5174_v59 = vpop.eup %5173 }
0x4919   :  { %v3215_v60 = vsub.f32 %v3116_v44, %v5174_v59 }
0x491b   :  { %3217 = vrot.lane.b32.xlu0 %v3215_v60, %s5224_s10 }
0x498d   :  { %v3218_v61 = vpop.permute.xlu0 %3217 }
0x498e   :  { %v3220_v2 = vmul.f32 %v5172_v54, %v3218_v61 }
0x4990   :  { %3222 = vrot.lane.b32.xlu1 %v3220_v2, %s5225_s11 }
0x4a02   :  { %v3223_v62 = vpop.permute.xlu1 %3222 }
0x4a03   :  { %v3225_v63 = vadd.f32 %v5174_v59, %v3223_v62 }
0x4a05   :  { %3227 = vrot.lane.b32.xlu0 %v3225_v63, %s5222_s8 }
0x4a77   :  { %v3228_v5 = vpop.permute.xlu0 %3227 }
0x4a78   :  { %3231 = vst.msk [vmem:[#allocation5 + $0x40] sm:$0xff] %vm269_vm4, %v3228_v5  ;;  %4970 = vmatmul.mubr.msk.f32.vlgmr.msra.gmra.mxu1 %vm269_vm4, %v3228_v5 }
0x4a79   :  { %4978 = vmatpush3.msk.msra.mxu1 %vm273_vm0, %v5645_v31  ;;  %4979 = vmatprep.mubr.msk.f32.mxu1 %vm5221_vm2, %v5220_v0 }
0x4a7a   :  { %4987 = vmatprep.subr.mxu1 %v5220_v0 }
0x4b38   :  { %v3302_v1 = vpop.f32.mrf.mxu1 }
0x4b39   :  { %v3303_v3 = vadd.f32 %v5673_v36, %v3302_v1 }
0x4b3a   :  { %v4971_v4 = vpop.f32.mrf.mxu1 }
0x4b3b   :  { %3314 = vrot.lane.b32.xlu1 %v3303_v3, %s5222_s8  ;;  %v3306_v7 = vadd.f32 %v3303_v3, %v3233_v6  ;;  %v3560_v4 = vld [vmem:[#allocation3 + $0x60] sm:$0xff] }
0x4b3d   :  { %v4625_v9 = vmul.f32 -1.442695, %v3306_v7 }
0x4b3f   :  { %5175 = vpow2.f32 %v4625_v9 }
0x4b4c   :  { %v5176_v10 = vpop.eup %5175 }
0x4b4d   :  { %v3310_v11 = vadd.f32 1.0, %v5176_v10 }
0x4b4f   :  { %5177 = vrcp.f32 %v3310_v11 }
0x4b5c   :  { %v5178_v35 = vpop.eup %5177 }
0x4bad   :  { %v3315_v12 = vpop.permute.xlu1 %3314 }
0x4bae   :  { %v3317_v13 = vmul.f32 %v5178_v35, %v3315_v12 }
0x4bb0   :  { %3319 = vrot.lane.b32.xlu0 %v3317_v13, %s5223_s9 }
0x4c22   :  { %v3320_v14 = vpop.permute.xlu0 %3319 }
0x4c23   :  { %v3322_v15 = vadd.f32 %v3320_v14, %v3233_v6 }
0x4c25   :  { %5179 = vtanh.f32 %v3322_v15 }
0x4c32   :  { %v5180_v16 = vpop.eup %5179 }
0x4c33   :  { %v3324_v17 = vsub.f32 %v3225_v63, %v5180_v16 }
0x4c35   :  { %3326 = vrot.lane.b32.xlu1 %v3324_v17, %s5224_s10 }
0x4ca7   :  { %v3327_v18 = vpop.permute.xlu1 %3326 }
0x4ca8   :  { %v3329_v19 = vmul.f32 %v5178_v35, %v3327_v18 }
0x4caa   :  { %3331 = vrot.lane.b32.xlu0 %v3329_v19, %s5225_s11 }
0x4d1c   :  { %v3332_v20 = vpop.permute.xlu0 %3331 }
0x4d1d   :  { %v3334_v21 = vadd.f32 %v5180_v16, %v3332_v20 }
0x4d1f   :  { %3336 = vrot.lane.b32.xlu1 %v3334_v21, %s5222_s8 }
0x4d91   :  { %v3337_v22 = vpop.permute.xlu1 %3336 }
0x4d92   :  { %3340 = vst.msk [vmem:[#allocation5 + $0x48] sm:$0xff] %vm269_vm4, %v3337_v22  ;;  %4975 = vmatmul.mubr.msk.f32.vlgmr.msra.gmra.mxu0 %vm269_vm4, %v3337_v22 }
0x4d93   :  { %4983 = vmatpush3.msk.msra.mxu0 %vm273_vm0, %v5645_v31  ;;  %4984 = vmatprep.mubr.msk.f32.mxu0 %vm5221_vm2, %v5220_v0 }
0x4d94   :  { %4992 = vmatprep.subr.mxu0 %v5220_v0 }
0x4e52   :  { %v3411_v23 = vpop.f32.mrf.mxu0 }
0x4e53   :  { %v3412_v33 = vadd.f32 %v5673_v36, %v3411_v23 }
0x4e54   :  { %v4976_v24 = vpop.f32.mrf.mxu0 }
0x4e55   :  { %3423 = vrot.lane.b32.xlu0 %v3412_v33, %s5222_s8  ;;  %v3415_v26 = vadd.f32 %v3412_v33, %v3342_v25  ;;  %v3669_v24 = vld [vmem:[#allocation3 + $0x68] sm:$0xff] }
0x4e57   :  { %v4628_v27 = vmul.f32 -1.442695, %v3415_v26 }
0x4e59   :  { %5181 = vpow2.f32 %v4628_v27 }
0x4e66   :  { %v5182_v28 = vpop.eup %5181 }
0x4e67   :  { %v3419_v29 = vadd.f32 1.0, %v5182_v28 }
0x4e69   :  { %5183 = vrcp.f32 %v3419_v29 }
0x4e76   :  { %v5184_v32 = vpop.eup %5183 }
0x4ec7   :  { %v3424_v30 = vpop.permute.xlu0 %3423 }
0x4ec8   :  { %v3426_v34 = vmul.f32 %v5184_v32, %v3424_v30 }
0x4eca   :  { %3428 = vrot.lane.b32.xlu1 %v3426_v34, %s5223_s9 }
0x4f3c   :  { %v3429_v8 = vpop.permute.xlu1 %3428 }
0x4f3d   :  { %v3431_v37 = vadd.f32 %v3429_v8, %v3342_v25 }
0x4f3f   :  { %5185 = vtanh.f32 %v3431_v37 }
0x4f4c   :  { %v5186_v38 = vpop.eup %5185 }
0x4f4d   :  { %v3433_v39 = vsub.f32 %v3334_v21, %v5186_v38 }
0x4f4f   :  { %3435 = vrot.lane.b32.xlu0 %v3433_v39, %s5224_s10 }
0x4fc1   :  { %v3436_v40 = vpop.permute.xlu0 %3435 }
0x4fc2   :  { %v3438_v41 = vmul.f32 %v5184_v32, %v3436_v40 }
0x4fc4   :  { %3440 = vrot.lane.b32.xlu1 %v3438_v41, %s5225_s11 }
0x5036   :  { %v3441_v42 = vpop.permute.xlu1 %3440 }
0x5037   :  { %v3443_v43 = vadd.f32 %v5186_v38, %v3441_v42 }
0x5039   :  { %3445 = vrot.lane.b32.xlu0 %v3443_v43, %s5222_s8 }
0x50ab   :  { %v3446_v44 = vpop.permute.xlu0 %3445 }
0x50ac   :  { %3449 = vst.msk [vmem:[#allocation5 + $0x50] sm:$0xff] %vm269_vm4, %v3446_v44  ;;  %4980 = vmatmul.mubr.msk.f32.vlgmr.msra.gmra.mxu1 %vm269_vm4, %v3446_v44 }
0x50ad   :  { %4988 = vmatpush3.msk.msra.mxu1 %vm273_vm0, %v5645_v31  ;;  %4989 = vmatprep.mubr.msk.f32.mxu1 %vm5221_vm2, %v5220_v0 }
0x50ae   :  { %4997 = vmatprep.subr.mxu1 %v5220_v0 }
0x516c   :  { %v3520_v45 = vpop.f32.mrf.mxu1 }
0x516d   :  { %v3521_v48 = vadd.f32 %v5673_v36, %v3520_v45  ;;  %v3778_v45 = vld [vmem:[#allocation3 + $0x70] sm:$0xff] }
0x516e   :  { %v4981_v46 = vpop.f32.mrf.mxu1 }
0x516f   :  { %3532 = vrot.lane.b32.xlu1 %v3521_v48, %s5222_s8  ;;  %v3524_v49 = vadd.f32 %v3521_v48, %v3451_v47 }
0x5171   :  { %v4631_v50 = vmul.f32 -1.442695, %v3524_v49 }
0x5173   :  { %5187 = vpow2.f32 %v4631_v50 }
0x5180   :  { %v5188_v51 = vpop.eup %5187 }
0x5181   :  { %v3528_v52 = vadd.f32 1.0, %v5188_v51 }
0x5183   :  { %5189 = vrcp.f32 %v3528_v52 }
0x5190   :  { %v5190_v53 = vpop.eup %5189 }
0x51e1   :  { %v3533_v54 = vpop.permute.xlu1 %3532 }
0x51e2   :  { %v3535_v55 = vmul.f32 %v5190_v53, %v3533_v54 }
0x51e4   :  { %3537 = vrot.lane.b32.xlu0 %v3535_v55, %s5223_s9 }
0x5256   :  { %v3538_v56 = vpop.permute.xlu0 %3537 }
0x5257   :  { %v3540_v57 = vadd.f32 %v3538_v56, %v3451_v47 }
0x5259   :  { %5191 = vtanh.f32 %v3540_v57 }
0x5266   :  { %v5192_v58 = vpop.eup %5191 }
0x5267   :  { %v3542_v59 = vsub.f32 %v3443_v43, %v5192_v58 }
0x5269   :  { %3544 = vrot.lane.b32.xlu1 %v3542_v59, %s5224_s10 }
0x52db   :  { %v3545_v60 = vpop.permute.xlu1 %3544 }
0x52dc   :  { %v3547_v61 = vmul.f32 %v5190_v53, %v3545_v60 }
0x52de   :  { %3549 = vrot.lane.b32.xlu0 %v3547_v61, %s5225_s11  ;;  %v5226_v61 = vmov 1  }
0x52df   :  { %5014 = vset.pattern.permute.xlu0 %v5226_v61 }
0x5350   :  { %v3550_v2 = vpop.permute.xlu0 %3549 }
0x5351   :  { %v3552_v62 = vadd.f32 %v5192_v58, %v3550_v2 }
0x5353   :  { %3554 = vrot.lane.b32.xlu1 %v3552_v62, %s5222_s8 }
0x53c5   :  { %v3555_v63 = vpop.permute.xlu1 %3554 }
0x53c6   :  { %3558 = vst.msk [vmem:[#allocation5 + $0x58] sm:$0xff] %vm269_vm4, %v3555_v63  ;;  %4985 = vmatmul.mubr.msk.f32.vlgmr.msra.gmra.mxu0 %vm269_vm4, %v3555_v63 }
0x53c7   :  { %4993 = vmatpush3.msk.msra.mxu0 %vm273_vm0, %v5645_v31  ;;  %4994 = vmatprep.mubr.msk.f32.mxu0 %vm5221_vm2, %v5220_v0 }
0x5486   :  { %v3629_v5 = vpop.f32.mrf.mxu0 }
0x5487   :  { %v3630_v1 = vadd.f32 %v5673_v36, %v3629_v5 }
0x5488   :  { %v4986_v3 = vpop.f32.mrf.mxu0 }
0x5489   :  { %3641 = vrot.lane.b32.xlu0 %v3630_v1, %s5222_s8  ;;  %v3633_v6 = vadd.f32 %v3630_v1, %v3560_v4  ;;  %v3887_v1 = vld [vmem:[#allocation3 + $0x78] sm:$0xff] }
0x548b   :  { %v4634_v7 = vmul.f32 -1.442695, %v3633_v6 }
0x548d   :  { %5193 = vpow2.f32 %v4634_v7 }
0x549a   :  { %v5194_v9 = vpop.eup %5193 }
0x549b   :  { %v3637_v10 = vadd.f32 1.0, %v5194_v9 }
0x549d   :  { %5195 = vrcp.f32 %v3637_v10 }
0x54aa   :  { %v5196_v11 = vpop.eup %5195 }
0x54fb   :  { %v3642_v35 = vpop.permute.xlu0 %3641 }
0x54fc   :  { %v3644_v12 = vmul.f32 %v5196_v11, %v3642_v35  ;;  %v5880_v35 = vld [vmem:[#allocation5 + $0x8] sm:$0xff] }
0x54fe   :  { %3646 = vrot.lane.b32.xlu1 %v3644_v12, %s5223_s9  ;;  %v5227_v12 = vmov 0  }
0x54ff   :  { %5012 = vset.pattern.permute.xlu1 %v5227_v12 }
0x5570   :  { %v3647_v13 = vpop.permute.xlu1 %3646 }
0x5571   :  { %v3649_v14 = vadd.f32 %v3647_v13, %v3560_v4  ;;  %v5884_v13 = vld [vmem:[#allocation5 + $0x20] sm:$0xff] }
0x5573   :  { %5197 = vtanh.f32 %v3649_v14 }
0x5580   :  { %v5198_v15 = vpop.eup %5197 }
0x5581   :  { %v3651_v16 = vsub.f32 %v3552_v62, %v5198_v15  ;;  %v5219_v62 = vld [vmem:[%s6282_s3 + $0x3] ss:$0 sm:$0xff] }
0x5583   :  { %3653 = vrot.lane.b32.xlu0 %v3651_v16, %s5224_s10 }
0x55f5   :  { %v3654_v17 = vpop.permute.xlu0 %3653 }
0x55f6   :  { %v3656_v18 = vmul.f32 %v5196_v11, %v3654_v17 }
0x55f8   :  { %3658 = vrot.lane.b32.xlu1 %v3656_v18, %s5225_s11  ;;  %v5892_v18 = vld [vmem:[#allocation5 + $0x10] sm:$0xff] }
0x566a   :  { %v3659_v19 = vpop.permute.xlu1 %3658 }
0x566b   :  { %v3661_v20 = vadd.f32 %v5198_v15, %v3659_v19  ;;  %v5896_v19 = vld [vmem:[#allocation5 + $0x30] sm:$0xff] }
0x566d   :  { %3663 = vrot.lane.b32.xlu0 %v3661_v20, %s5222_s8 }
0x56df   :  { %v3664_v21 = vpop.permute.xlu0 %3663 }
0x56e0   :  { %3667 = vst.msk [vmem:[#allocation5 + $0x60] sm:$0xff] %vm269_vm4, %v3664_v21  ;;  %4990 = vmatmul.mubr.msk.f32.vlgmr.msra.gmra.mxu1 %vm269_vm4, %v3664_v21  ;;  %v5902_v21 = vld [vmem:[#allocation5 + $0x50] sm:$0xff] }
0x56e1   :  { %4998 = vmatpush3.msk.msra.mxu1 %vm273_vm0, %v5645_v31  ;;  %4999 = vmatprep.mubr.msk.f32.mxu1 %vm5221_vm2, %v5220_v0 }
0x57a0   :  { %v3738_v22 = vpop.f32.mrf.mxu1 }
0x57a1   :  { %v3739_v23 = vadd.f32 %v5673_v36, %v3738_v22  ;;  %v5905_v22 = vld [vmem:[#allocation5 + $0x60] sm:$0xff] }
0x57a2   :  { %v4991_v33 = vpop.f32.mrf.mxu1 }
0x57a3   :  { %3750 = vrot.lane.b32.xlu1 %v3739_v23, %s5222_s8  ;;  %v3742_v25 = vadd.f32 %v3739_v23, %v3669_v24  ;;  %v5912_v33 = vld [vmem:[#allocation5] sm:$0xff] }
0x57a5   :  { %v4637_v26 = vmul.f32 -1.442695, %v3742_v25  ;;  %v5916_v25 = vld [vmem:[#allocation5 + $0x28] sm:$0xff] }
0x57a7   :  { %5199 = vpow2.f32 %v4637_v26  ;;  %v5919_v26 = vld [vmem:[#allocation5 + $0x38] sm:$0xff] }
0x57b4   :  { %v5200_v27 = vpop.eup %5199 }
0x57b5   :  { %v3746_v28 = vadd.f32 1.0, %v5200_v27  ;;  %v5922_v27 = vld [vmem:[#allocation5 + $0x48] sm:$0xff] }
0x57b7   :  { %5201 = vrcp.f32 %v3746_v28  ;;  %v5925_v28 = vld [vmem:[#allocation5 + $0x58] sm:$0xff] }
0x57c4   :  { %v5202_v29 = vpop.eup %5201 }
0x5815   :  { %v3751_v32 = vpop.permute.xlu1 %3750 }
0x5816   :  { %v3753_v30 = vmul.f32 %v5202_v29, %v3751_v32  ;;  %v5228_v32 = vmov 2  }
0x5818   :  { %3755 = vrot.lane.b32.xlu0 %v3753_v30, %s5223_s9 }
0x588a   :  { %v3756_v31 = vpop.permute.xlu0 %3755 }
0x588b   :  { %v3758_v0 = vadd.f32 %v3756_v31, %v3669_v24  ;;  %v3998_v24 = vld [vmem:[#allocation5 + $0x18] sm:$0xff] }
0x588d   :  { %5203 = vtanh.f32 %v3758_v0  ;;  %v4645_v0 = vld [vmem:[%s6283_s4 + $0x88] sm:$0xff] }
0x589a   :  { %v5204_v34 = vpop.eup %5203 }
0x589b   :  { %v3760_v8 = vsub.f32 %v3661_v20, %v5204_v34  ;;  %v5899_v20 = vld [vmem:[#allocation5 + $0x40] sm:$0xff] }
0x589d   :  { %3762 = vrot.lane.b32.xlu1 %v3760_v8, %s5224_s10  ;;  %v4012_v8 = vld [vmem:[%s6283_s4 + $0x8] sm:$0xff] }
0x590f   :  { %v3763_v37 = vpop.permute.xlu1 %3762 }
0x5910   :  { %v3765_v38 = vmul.f32 %v5202_v29, %v3763_v37 }
0x5912   :  { %3767 = vrot.lane.b32.xlu0 %v3765_v38, %s5225_s11 }
0x5984   :  { %v3768_v39 = vpop.permute.xlu0 %3767 }
0x5985   :  { %v3770_v40 = vadd.f32 %v5204_v34, %v3768_v39 }
0x5987   :  { %3772 = vrot.lane.b32.xlu1 %v3770_v40, %s5222_s8 }
0x59f9   :  { %v3773_v41 = vpop.permute.xlu1 %3772 }
0x59fa   :  { %3776 = vst.msk [vmem:[#allocation5 + $0x68] sm:$0xff] %vm269_vm4, %v3773_v41  ;;  %4995 = vmatmul.mubr.msk.f32.vlgmr.msra.gmra.mxu0 %vm269_vm4, %v3773_v41 }
0x5a01   :  { %v5928_v29 = vld [vmem:[#allocation5 + $0x68] sm:$0xff] }
0x5aba   :  { %v3847_v42 = vpop.f32.mrf.mxu0 }
0x5abb   :  { %v3848_v43 = vadd.f32 %v5673_v36, %v3847_v42 }
0x5abc   :  { %v4996_v44 = vpop.f32.mrf.mxu0 }
0x5abd   :  { %3859 = vrot.lane.b32.xlu0 %v3848_v43, %s5222_s8  ;;  %v3851_v48 = vadd.f32 %v3848_v43, %v3778_v45 }
0x5abf   :  { %v4640_v46 = vmul.f32 -1.442695, %v3851_v48  ;;  %v5229_v48 = vmov 3  }
0x5ac1   :  { %5205 = vpow2.f32 %v4640_v46 }
0x5ace   :  { %v5206_v47 = vpop.eup %5205 }
0x5acf   :  { %v3855_v49 = vadd.f32 1.0, %v5206_v47 }
0x5ad1   :  { %5207 = vrcp.f32 %v3855_v49 }
0x5ade   :  { %v5208_v50 = vpop.eup %5207 }
0x5b2f   :  { %v3860_v51 = vpop.permute.xlu0 %3859 }
0x5b30   :  { %v3862_v52 = vmul.f32 %v5208_v50, %v3860_v51  ;;  %v4646_v51 = vld [vmem:[%s6283_s4 + $0x90] sm:$0xff] }
0x5b32   :  { %3864 = vrot.lane.b32.xlu1 %v3862_v52, %s5223_s9 }
0x5ba4   :  { %v3865_v53 = vpop.permute.xlu1 %3864 }
0x5ba5   :  { %v3867_v54 = vadd.f32 %v3865_v53, %v3778_v45 }
0x5ba7   :  { %5209 = vtanh.f32 %v3867_v54 }
0x5bb4   :  { %v5210_v55 = vpop.eup %5209 }
0x5bb5   :  { %v3869_v36 = vsub.f32 %v3770_v40, %v5210_v55 }
0x5bb7   :  { %3871 = vrot.lane.b32.xlu0 %v3869_v36, %s5224_s10 }
0x5c29   :  { %v3872_v56 = vpop.permute.xlu0 %3871 }
0x5c2a   :  { %v3874_v57 = vmul.f32 %v5208_v50, %v3872_v56  ;;  %v4013_v50 = vld [vmem:[%s6283_s4 + $0x10] sm:$0xff] }
0x5c2c   :  { %3876 = vrot.lane.b32.xlu1 %v3874_v57, %s5225_s11 }
0x5c9e   :  { %v3877_v58 = vpop.permute.xlu1 %3876 }
0x5c9f   :  { %v3879_v59 = vadd.f32 %v5210_v55, %v3877_v58  ;;  %v4017_v58 = vld [vmem:[%s6283_s4 + $0x30] sm:$0xff] }
0x5ca1   :  { %3881 = vrot.lane.b32.xlu0 %v3879_v59, %s5222_s8 }
0x5d13   :  { %v3882_v60 = vpop.permute.xlu0 %3881 }
0x5d14   :  { %3885 = vst.msk [vmem:[#allocation5 + $0x70] sm:$0xff] %vm269_vm4, %v3882_v60  ;;  %5000 = vmatmul.mubr.msk.f32.vlgmr.msra.gmra.mxu1 %vm269_vm4, %v3882_v60 }
0x5d1b   :  { %v5908_v23 = vld [vmem:[#allocation5 + $0x70] sm:$0xff] }
0x5dd4   :  { %v3956_v2 = vpop.f32.mrf.mxu1 }
0x5dd5   :  { %v3957_v63 = vadd.f32 %v5219_v62, %v3956_v2 }
0x5dd6   :  { %v5001_v5 = vpop.f32.mrf.mxu1 }
0x5dd7   :  { %3968 = vrot.lane.b32.xlu1 %v3957_v63, %s5222_s8  ;;  %v3960_v3 = vadd.f32 %v3957_v63, %v3887_v1  ;;  %v4019_v63 = vld [vmem:[%s6283_s4 + $0x40] sm:$0xff] }
0x5dd8   :  { %v4652_v5 = vld [vmem:[%s6283_s4 + $0xc0] sm:$0xff] }
0x5dd9   :  { %v4643_v4 = vmul.f32 -1.442695, %v3960_v3 }
0x5ddb   :  { %5211 = vpow2.f32 %v4643_v4 }
0x5de8   :  { %v5212_v6 = vpop.eup %5211 }
0x5de9   :  { %v3964_v7 = vadd.f32 1.0, %v5212_v6 }
0x5deb   :  { %5213 = vrcp.f32 %v3964_v7  ;;  %v4021_v7 = vld [vmem:[%s6283_s4 + $0x50] sm:$0xff] }
0x5df8   :  { %v5214_v9 = vpop.eup %5213 }
0x5e49   :  { %v3969_v10 = vpop.permute.xlu1 %3968 }
0x5e4a   :  { %v3971_v11 = vmul.f32 %v5214_v9, %v3969_v10 }
0x5e4c   :  { %3973 = vrot.lane.b32.xlu0 %v3971_v11, %s5223_s9 }
0x5e50   :  { %4145 = vperm.xlu0 %5014, %v5880_v35  }
0x5e54   :  { %4157 = vperm.xlu0 %5014, %v5884_v13  }
0x5ebe   :  { %v3974_v14 = vpop.permute.xlu0 %3973 }
0x5ebf   :  { %v3976_v15 = vadd.f32 %v3974_v14, %v3887_v1  ;;  %v4023_v14 = vld [vmem:[%s6283_s4 + $0x60] sm:$0xff] }
0x5ec1   :  { %5215 = vtanh.f32 %v3976_v15  ;;  %v4656_v15 = vld [vmem:[%s6283_s4 + $0xe0] sm:$0xff] }
0x5ecb   :  { %v4146_v34 = vpop.permute.xlu0 %4145 }
0x5ecc   :  { %v4205_v38 = vmul.f32 %v4645_v0, %v4146_v34 }
0x5ece   :  { %v5887_v16 = vpop.eup %5215 }
0x5ecf   :  { %v3978_v17 = vsub.f32 %v3879_v59, %v5887_v16  ;;  %v5981_v36 = vpop.permute.xlu0 %4157  ;;  %v4650_v59 = vld [vmem:[%s6283_s4 + $0xb0] sm:$0xff] }
0x5ed1   :  { %3980 = vrot.lane.b32.xlu1 %v3978_v17, %s5224_s10 }
0x5ed5   :  { %4034 = vperm.xlu1 %5012, %v5880_v35  }
0x5ed9   :  { %4039 = vperm.xlu1 %5012, %v5892_v18  }
0x5edd   :  { %4049 = vperm.xlu1 %5012, %v5884_v13  }
0x5ee1   :  { %4059 = vperm.xlu1 %5012, %v5896_v19  }
0x5ee5   :  { %4069 = vperm.xlu1 %5012, %v5899_v20  }
0x5ee9   :  { %4079 = vperm.xlu1 %5012, %v5902_v21  }
0x5eed   :  { %4089 = vperm.xlu1 %5012, %v5905_v22  }
0x5ef1   :  { %4099 = vperm.xlu1 %5012, %v5908_v23  }
0x5ef5   :  { %5013 = vset.pattern.permute.xlu1 %v5226_v61 }
0x5ef6   :  { %4141 = vperm.xlu1 %5013, %v5912_v33  }
0x5efa   :  { %4149 = vperm.xlu1 %5013, %v5892_v18  }
0x5efe   :  { %4153 = vperm.xlu1 %5013, %v3998_v24  }
0x5f02   :  { %4161 = vperm.xlu1 %5013, %v5916_v25  }
0x5f06   :  { %4169 = vperm.xlu1 %5013, %v5919_v26  }
0x5f0a   :  { %4177 = vperm.xlu1 %5013, %v5922_v27  }
0x5f0e   :  { %4185 = vperm.xlu1 %5013, %v5925_v28  }
0x5f12   :  { %4193 = vperm.xlu1 %5013, %v5928_v29  }
0x5f16   :  { %5016 = vset.pattern.permute.xlu1 %v5228_v32 }
0x5f43   :  { %v3981_v30 = vpop.permute.xlu1 %3980 }
0x5f44   :  { %v3983_v31 = vmul.f32 %v5214_v9, %v3981_v30  ;;  %v4654_v9 = vld [vmem:[%s6283_s4 + $0xd0] sm:$0xff] }
0x5f45   :  { %v4658_v30 = vld [vmem:[%s6283_s4 + $0xf0] sm:$0xff] }
0x5f46   :  { %3985 = vrot.lane.b32.xlu0 %v3983_v31, %s5225_s11 }
0x5f4a   :  { %4165 = vperm.xlu0 %5014, %v5896_v19  }
0x5f4e   :  { %4173 = vperm.xlu0 %5014, %v5899_v20  }
0x5f50   :  { %v4035_v37 = vpop.permute.xlu1 %4034 }
0x5f51   :  { %v4108_v39 = vmul.f32 %v4035_v37, %v4012_v8 }
0x5f52   :  { %4181 = vperm.xlu0 %5014, %v5902_v21  }
0x5f53   :  { %v5942_v40 = vadd.f32 %v4205_v38, %v4108_v39 }
0x5f54   :  { %v4040_v41 = vpop.permute.xlu1 %4039 }
0x5f55   :  { %v4109_v53 = vmul.f32 %v4040_v41, %v4013_v50 }
0x5f56   :  { %4189 = vperm.xlu0 %5014, %v5905_v22  }
0x5f58   :  { %v5945_v42 = vpop.permute.xlu1 %4049 }
0x5f5a   :  { %4197 = vperm.xlu0 %5014, %v5908_v23  }
0x5f5c   :  { %v4060_v43 = vpop.permute.xlu1 %4059 }
0x5f5d   :  { %v4113_v2 = vmul.f32 %v4060_v43, %v4017_v58  ;;  %v4644_v58 = vld [vmem:[%s6283_s4 + $0x80] sm:$0xff] }
0x5f5e   :  { %5015 = vset.pattern.permute.xlu0 %v5228_v32 }
0x5f5f   :  { %4254 = vperm.xlu0 %5015, %v5912_v33  }
0x5f60   :  { %v4070_v44 = vpop.permute.xlu1 %4069 }
0x5f61   :  { %v4115_v4 = vmul.f32 %v4070_v44, %v4019_v63 }
0x5f63   :  { %4266 = vperm.xlu0 %5015, %v3998_v24  }
0x5f64   :  { %v4080_v45 = vpop.permute.xlu1 %4079 }
0x5f67   :  { %5018 = vset.pattern.permute.xlu0 %v5229_v48 }
0x5f68   :  { %v4090_v46 = vpop.permute.xlu1 %4089  ;;  %4371 = vperm.xlu0 %5018, %v5880_v35  }
0x5f6c   :  { %v5952_v47 = vpop.permute.xlu1 %4099  ;;  %4379 = vperm.xlu0 %5018, %v3998_v24  }
0x5f70   :  { %4383 = vperm.xlu0 %5018, %v5884_v13  }
0x5f71   :  { %v5955_v49 = vpop.permute.xlu1 %4141 }
0x5f72   :  { %v4204_v63 = vmul.f32 %v4644_v58, %v5955_v49 }
0x5f74   :  { %4387 = vperm.xlu0 %5018, %v5916_v25  }
0x5f75   :  { %v4150_v52 = vpop.permute.xlu1 %4149 }
0x5f76   :  { %v4206_v54 = vmul.f32 %v4646_v51, %v4150_v52 }
0x5f78   :  { %v5964_v55 = vadd.f32 %v4206_v54, %v4109_v53  ;;  %4391 = vperm.xlu0 %5018, %v5896_v19   ;;  %v4011_v54 = vld [vmem:[%s6283_s4] sm:$0xff] }
0x5f7c   :  { %4395 = vperm.xlu0 %5018, %v5919_v26  }
0x5f80   :  { %4399 = vperm.xlu0 %5018, %v5899_v20  }
0x5f84   :  { %4403 = vperm.xlu0 %5018, %v5922_v27  }
0x5f88   :  { %4407 = vperm.xlu0 %5018, %v5902_v21  }
0x5f8c   :  { %4411 = vperm.xlu0 %5018, %v5925_v28  }
0x5f90   :  { %4415 = vperm.xlu0 %5018, %v5905_v22  }
0x5f94   :  { %4419 = vperm.xlu0 %5018, %v5928_v29  }
0x5f98   :  { %5020 = vset.pattern.permute.xlu0 %v5227_v12 }
0x5f99   :  { %4029 = vperm.xlu0 %5020, %v5912_v33  }
0x5f9d   :  { %4044 = vperm.xlu0 %5020, %v3998_v24   ;;  %v4025_v24 = vld [vmem:[%s6283_s4 + $0x70] sm:$0xff] }
0x5f9e   :  { %v4121_v34 = vmul.f32 %v5952_v47, %v4025_v24 }
0x5fa1   :  { %4054 = vperm.xlu0 %5020, %v5916_v25  }
0x5fa5   :  { %4064 = vperm.xlu0 %5020, %v5919_v26  }
0x5fa9   :  { %4074 = vperm.xlu0 %5020, %v5922_v27  }
0x5fad   :  { %4084 = vperm.xlu0 %5020, %v5925_v28  }
0x5fb1   :  { %4094 = vperm.xlu0 %5020, %v5928_v29  }
0x5fb8   :  { %v3986_v56 = vpop.permute.xlu0 %3985 }
0x5fb9   :  { %v3988_v57 = vadd.f32 %v5887_v16, %v3986_v56  ;;  %v4661_v56 = vld [vmem:[%s6283_s4 + $0x108] sm:$0xff] }
0x5fbb   :  { %3990 = vrot.lane.b32.xlu1 %v3988_v57, %s5222_s8 }
0x5fbf   :  { %4258 = vperm.xlu1 %5016, %v5880_v35   ;;  %v4117_v35 = vmul.f32 %v4080_v45, %v4021_v7  ;;  %v4663_v7 = vld [vmem:[%s6283_s4 + $0x118] sm:$0xff] }
0x5fc3   :  { %4262 = vperm.xlu1 %5016, %v5892_v18  }
0x5fc5   :  { %v4166_v60 = vpop.permute.xlu0 %4165 }
0x5fc6   :  { %v4210_v62 = vmul.f32 %v4650_v59, %v4166_v60  ;;  %v4014_v59 = vld [vmem:[%s6283_s4 + $0x18] sm:$0xff] }
0x5fc7   :  { %5017 = vset.pattern.permute.xlu1 %v5229_v48 }
0x5fc8   :  { %v6000_v1 = vadd.f32 %v4210_v62, %v4113_v2  ;;  %4367 = vperm.xlu1 %5017, %v5912_v33   ;;  %v4119_v33 = vmul.f32 %v4090_v46, %v4023_v14 }
0x5fc9   :  { %v4174_v3 = vpop.permute.xlu0 %4173 }
0x5fca   :  { %v4212_v6 = vmul.f32 %v4652_v5, %v4174_v3 }
0x5fcc   :  { %v6009_v10 = vadd.f32 %v4212_v6, %v4115_v4  ;;  %4375 = vperm.xlu1 %5017, %v5892_v18   ;;  %v4660_v4 = vld [vmem:[%s6283_s4 + $0x100] sm:$0xff]  ;;  %v4677_v6 = vld [vmem:[%s6283_s4 + $0x188] sm:$0xff] }
0x5fcd   :  { %v4182_v11 = vpop.permute.xlu0 %4181 }
0x5fce   :  { %v4214_v12 = vmul.f32 %v4654_v9, %v4182_v11  ;;  %v4662_v11 = vld [vmem:[%s6283_s4 + $0x110] sm:$0xff] }
0x5fd0   :  { %v6018_v16 = vadd.f32 %v4214_v12, %v4117_v35  ;;  %5019 = vset.pattern.permute.xlu1 %v5228_v32  ;;  %v4676_v35 = vld [vmem:[%s6283_s4 + $0x180] sm:$0xff] }
0x5fd1   :  { %v4190_v17 = vpop.permute.xlu0 %4189  ;;  %4270 = vperm.xlu1 %5019, %v5884_v13  }
0x5fd2   :  { %v4216_v18 = vmul.f32 %v4656_v15, %v4190_v17 }
0x5fd4   :  { %v6028_v31 = vadd.f32 %v4216_v18, %v4119_v33  ;;  %v4679_v33 = vld [vmem:[%s6283_s4 + $0x198] sm:$0xff] }
0x5fd5   :  { %v4198_v0 = vpop.permute.xlu0 %4197  ;;  %4274 = vperm.xlu1 %5019, %v5916_v25  }
0x5fd6   :  { %v4218_v8 = vmul.f32 %v4658_v30, %v4198_v0  ;;  %v4678_v0 = vld [vmem:[%s6283_s4 + $0x190] sm:$0xff] }
0x5fd8   :  { %v6032_v37 = vadd.f32 %v4218_v8, %v4121_v34  ;;  %v4015_v34 = vld [vmem:[%s6283_s4 + $0x20] sm:$0xff] }
0x5fd9   :  { %4278 = vperm.xlu1 %5019, %v5896_v19  }
0x5fda   :  { %v4255_v13 = vpop.permute.xlu0 %4254 }
0x5fdb   :  { %v4317_v12 = vmul.f32 %v4660_v4, %v4255_v13 }
0x5fdd   :  { %4282 = vperm.xlu1 %5019, %v5919_v26  }
0x5fde   :  { %v4267_v38 = vpop.permute.xlu0 %4266 }
0x5fdf   :  { %v4320_v15 = vmul.f32 %v4663_v7, %v4267_v38 }
0x5fe1   :  { %4286 = vperm.xlu1 %5019, %v5899_v20  }
0x5fe3   :  { %v4372_v39 = vpop.permute.xlu0 %4371 }
0x5fe4   :  { %v4431_v14 = vmul.f32 %v4677_v6, %v4372_v39 }
0x5fe5   :  { %4290 = vperm.xlu1 %5019, %v5922_v27  }
0x5fe7   :  { %v6041_v25 = vpop.permute.xlu0 %4379 }
0x5fe8   :  { %v4433_v38 = vmul.f32 %v4679_v33, %v6041_v25  ;;  %v4016_v25 = vld [vmem:[%s6283_s4 + $0x28] sm:$0xff] }
0x5fe9   :  { %4294 = vperm.xlu1 %5019, %v5902_v21   ;;  %v4154_v21 = vpop.permute.xlu1 %4153 }
0x5feb   :  { %v6044_v19 = vpop.permute.xlu0 %4383 }
0x5fed   :  { %4298 = vperm.xlu1 %5019, %v5925_v28   ;;  %v6054_v28 = vpop.permute.xlu1 %4161 }
0x5fef   :  { %v6048_v20 = vpop.permute.xlu0 %4387 }
0x5ff1   :  { %4302 = vperm.xlu1 %5019, %v5905_v22   ;;  %v6058_v41 = vpop.permute.xlu1 %4169 }
0x5ff3   :  { %v6050_v26 = vpop.permute.xlu0 %4391 }
0x5ff5   :  { %4306 = vperm.xlu1 %5019, %v5928_v29   ;;  %v6062_v43 = vpop.permute.xlu1 %4177 }
0x5ff7   :  { %v6052_v27 = vpop.permute.xlu0 %4395 }
0x5ff9   :  { %4310 = vperm.xlu1 %5019, %v5908_v23  }
0x5ffb   :  { %v6056_v22 = vpop.permute.xlu0 %4399 }
0x5ffd   :  { %5021 = vset.pattern.permute.xlu1 %v5226_v61  ;;  %v6066_v61 = vpop.permute.xlu1 %4185 }
0x5fff   :  { %v6060_v29 = vpop.permute.xlu0 %4403 }
0x6001   :  { %v6070_v46 = vpop.permute.xlu1 %4193 }
0x6003   :  { %v6064_v44 = vpop.permute.xlu0 %4407 }
0x6007   :  { %v6068_v45 = vpop.permute.xlu0 %4411 }
0x600b   :  { %v6072_v47 = vpop.permute.xlu0 %4415 }
0x600f   :  { %v6075_v51 = vpop.permute.xlu0 %4419 }
0x6014   :  { %v4030_v52 = vpop.permute.xlu0 %4029 }
0x6015   :  { %v4107_v2 = vmul.f32 %v4030_v52, %v4011_v54 }
0x6017   :  { %v4220_v9 = vadd.f32 %v4204_v63, %v4107_v2  ;;  %v4664_v2 = vld [vmem:[%s6283_s4 + $0x120] sm:$0xff] }
0x6018   :  { %v4045_v60 = vpop.permute.xlu0 %4044 }
0x6019   :  { %v4110_v5 = vmul.f32 %v4045_v60, %v4014_v59  ;;  %v4333_v24 = vadd.f32 %v4317_v12, %v4220_v9 }
0x601c   :  { %v4055_v59 = vpop.permute.xlu0 %4054 }
0x6020   :  { %v4065_v33 = vpop.permute.xlu0 %4064 }
0x602d   :  { %v3991_v50 = vpop.permute.xlu1 %3990 }
0x602e   :  { %3994 = vst.msk [vmem:[#allocation5 + $0x78] sm:$0xff] %vm269_vm4, %v3991_v50 }
0x6035   :  { %v4010_v53 = vld [vmem:[#allocation5 + $0x78] sm:$0xff] }
0x6036   :  { %4201 = vperm.xlu1 %5021, %v4010_v53   ;;  %4104 = vperm.xlu0 %5020, %v4010_v53  }
0x603a   :  { %5022 = vset.pattern.permute.xlu1 %v5228_v32  ;;  %5023 = vset.pattern.permute.xlu0 %v5229_v48  ;;  %v4259_v57 = vpop.permute.xlu1 %4258  ;;  %v4647_v32 = vld [vmem:[%s6283_s4 + $0x98] sm:$0xff] }
0x603b   :  { %4314 = vperm.xlu1 %5022, %v4010_v53   ;;  %4423 = vperm.xlu0 %5023, %v5908_v23   ;;  %v4318_v62 = vmul.f32 %v4661_v56, %v4259_v57  ;;  %v4207_v23 = vmul.f32 %v4647_v32, %v4154_v21  ;;  %v4648_v21 = vld [vmem:[%s6283_s4 + $0xa0] sm:$0xff]  ;;  %v4111_v56 = vmul.f32 %v5945_v42, %v4015_v34 }
0x603c   :  { %v4680_v42 = vld [vmem:[%s6283_s4 + $0x1a0] sm:$0xff] }
0x603d   :  { %v4334_v49 = vadd.f32 %v4318_v62, %v5942_v40  ;;  %v4649_v62 = vld [vmem:[%s6283_s4 + $0xa8] sm:$0xff]  ;;  %v4434_v9 = vmul.f32 %v4680_v42, %v6044_v19 }
0x603e   :  { %v4263_v3 = vpop.permute.xlu1 %4262  ;;  %v4209_v7 = vmul.f32 %v4649_v62, %v6054_v28  ;;  %v4666_v28 = vld [vmem:[%s6283_s4 + $0x130] sm:$0xff]  ;;  %v4684_v62 = vld [vmem:[%s6283_s4 + $0x1c0] sm:$0xff] }
0x603f   :  { %5024 = vset.pattern.permute.xlu1 %v5229_v48  ;;  %v4223_v48 = vadd.f32 %v4207_v23, %v4110_v5  ;;  %v4447_v18 = vadd.f32 %v4431_v14, %v4334_v49  ;;  %v4319_v40 = vmul.f32 %v4662_v11, %v4263_v3  ;;  %v4112_v3 = vmul.f32 %v4055_v59, %v4016_v25  ;;  %v4020_v59 = vld [vmem:[%s6283_s4 + $0x48] sm:$0xff] }
0x6040   :  { %4427 = vperm.xlu1 %5024, %v4010_v53  }
0x6041   :  { %v4336_v8 = vadd.f32 %v4320_v15, %v4223_v48  ;;  %v4335_v50 = vadd.f32 %v4319_v40, %v5964_v55  ;;  %v4465_v52 = vsel %vm4463_vm5, %v4447_v18, 0.0  ;;  %v4208_v55 = vmul.f32 %v4648_v21, %v5981_v36  ;;  %v4665_v36 = vld [vmem:[%s6283_s4 + $0x128] sm:$0xff] }
0x6042   :  { %v4225_v14 = vadd.f32 %v4209_v7, %v4112_v3  ;;  %v4685_v7 = vld [vmem:[%s6283_s4 + $0x1c8] sm:$0xff] }
0x6043   :  { %v4368_v17 = vpop.permute.xlu1 %4367  ;;  %v4449_v58 = vadd.f32 %v4433_v38, %v4336_v8  ;;  %v4224_v5 = vadd.f32 %v4208_v55, %v4111_v56  ;;  %v4653_v55 = vld [vmem:[%s6283_s4 + $0xc8] sm:$0xff] }
0x6044   :  { %v4430_v30 = vmul.f32 %v4676_v35, %v4368_v17  ;;  %v4681_v35 = vld [vmem:[%s6283_s4 + $0x1a8] sm:$0xff]  ;;  %v4018_v17 = vld [vmem:[%s6283_s4 + $0x38] sm:$0xff] }
0x6045   :  { %v4469_v23 = vsel %vm4463_vm5, %v4449_v58, 0.0  ;;  %v4435_v19 = vmul.f32 %v4681_v35, %v6048_v20  ;;  %v4114_v8 = vmul.f32 %v4065_v33, %v4018_v17  ;;  %v4667_v20 = vld [vmem:[%s6283_s4 + $0x138] sm:$0xff]  ;;  %v4686_v33 = vld [vmem:[%s6283_s4 + $0x1d0] sm:$0xff] }
0x6046   :  { %v4446_v13 = vadd.f32 %v4430_v30, %v4333_v24  ;;  %v4651_v24 = vld [vmem:[%s6283_s4 + $0xb8] sm:$0xff]  ;;  %v4682_v30 = vld [vmem:[%s6283_s4 + $0x1b0] sm:$0xff] }
0x6047   :  { %v4376_v39 = vpop.permute.xlu1 %4375  ;;  %v4436_v21 = vmul.f32 %v4682_v30, %v6050_v26  ;;  %v4668_v26 = vld [vmem:[%s6283_s4 + $0x140] sm:$0xff]  ;;  %v4655_v17 = vld [vmem:[%s6283_s4 + $0xd8] sm:$0xff] }
0x6048   :  { %v4464_v53 = vsel %vm4463_vm5, %v4446_v13, 0.0  ;;  %v4432_v54 = vmul.f32 %v4678_v0, %v4376_v39  ;;  %v4211_v39 = vmul.f32 %v4651_v24, %v6058_v41  ;;  %v4075_v41 = vpop.permute.xlu0 %4074  ;;  %v4215_v30 = vmul.f32 %v4655_v17, %v6066_v61 }
0x6049   :  { %v4466_v57 = vadd.f32 %v4465_v52, %v4464_v53  ;;  %v4683_v53 = vld [vmem:[%s6283_s4 + $0x1b8] sm:$0xff] }
0x604a   :  { %v4448_v60 = vadd.f32 %v4432_v54, %v4335_v50 }
0x604c   :  { %v4467_v32 = vsel %vm4463_vm5, %v4448_v60, 0.0  ;;  %v4271_v63 = vpop.permute.xlu1 %4270 }
0x604d   :  { %v4468_v4 = vadd.f32 %v4467_v32, %v4466_v57  ;;  %v4321_v6 = vmul.f32 %v4664_v2, %v4271_v63  ;;  %v4227_v57 = vadd.f32 %v4211_v39, %v4114_v8  ;;  %v4116_v63 = vmul.f32 %v4075_v41, %v4020_v59 }
0x604f   :  { %v4470_v49 = vadd.f32 %v4469_v23, %v4468_v4  ;;  %v4337_v11 = vadd.f32 %v4321_v6, %v4224_v5  ;;  %v4213_v4 = vmul.f32 %v4653_v55, %v6062_v43  ;;  %v4438_v6 = vmul.f32 %v4684_v62, %v6056_v22  ;;  %v4085_v43 = vpop.permute.xlu0 %4084  ;;  %v4670_v22 = vld [vmem:[%s6283_s4 + $0x150] sm:$0xff] }
0x6050   :  { %v4275_v12 = vpop.permute.xlu1 %4274 }
0x6051   :  { %v4450_v48 = vadd.f32 %v4434_v9, %v4337_v11  ;;  %v4322_v15 = vmul.f32 %v4665_v36, %v4275_v12  ;;  %v4229_v11 = vadd.f32 %v4213_v4, %v4116_v63 }
0x6053   :  { %v4471_v18 = vsel %vm4463_vm5, %v4450_v48, 0.0  ;;  %v4338_v40 = vadd.f32 %v4322_v15, %v4225_v14  ;;  %v4022_v14 = vld [vmem:[%s6283_s4 + $0x58] sm:$0xff]  ;;  %v4095_v55 = vpop.permute.xlu0 %4094 }
0x6054   :  { %v4472_v0 = vadd.f32 %v4471_v18, %v4470_v49  ;;  %v4279_v34 = vpop.permute.xlu1 %4278  ;;  %v4118_v18 = vmul.f32 %v4085_v43, %v4022_v14 }
0x6055   :  { %v4451_v13 = vadd.f32 %v4435_v19, %v4338_v40  ;;  %v4323_v38 = vmul.f32 %v4666_v28, %v4279_v34 }
0x6056   :  { %v4231_v39 = vadd.f32 %v4215_v30, %v4118_v18 }
0x6057   :  { %v4473_v50 = vsel %vm4463_vm5, %v4451_v13, 0.0  ;;  %v4339_v52 = vadd.f32 %v4323_v38, %v6000_v1  ;;  %v4437_v1 = vmul.f32 %v4683_v53, %v6052_v27  ;;  %v4669_v27 = vld [vmem:[%s6283_s4 + $0x148] sm:$0xff]  ;;  %v4687_v13 = vld [vmem:[%s6283_s4 + $0x1d8] sm:$0xff] }
0x6058   :  { %v4474_v54 = vadd.f32 %v4473_v50, %v4472_v0  ;;  %v4283_v56 = vpop.permute.xlu1 %4282  ;;  %v4440_v0 = vmul.f32 %v4686_v33, %v6064_v44  ;;  %v4441_v61 = vmul.f32 %v4687_v13, %v6068_v45 }
0x6059   :  { %v4452_v58 = vadd.f32 %v4436_v21, %v4339_v52  ;;  %v4324_v25 = vmul.f32 %v4667_v20, %v4283_v56  ;;  %v4672_v52 = vld [vmem:[%s6283_s4 + $0x160] sm:$0xff] }
0x605b   :  { %v4475_v60 = vsel %vm4463_vm5, %v4452_v58, 0.0  ;;  %v4340_v2 = vadd.f32 %v4324_v25, %v4227_v57 }
0x605c   :  { %v4476_v42 = vadd.f32 %v4475_v60, %v4474_v54  ;;  %v4287_v32 = vpop.permute.xlu1 %4286 }
0x605d   :  { %v4453_v5 = vadd.f32 %v4437_v1, %v4340_v2  ;;  %v4325_v3 = vmul.f32 %v4668_v26, %v4287_v32  ;;  %v4024_v2 = vld [vmem:[%s6283_s4 + $0x68] sm:$0xff] }
0x605f   :  { %v4477_v23 = vsel %vm4463_vm5, %v4453_v5, 0.0  ;;  %v4341_v36 = vadd.f32 %v4325_v3, %v6009_v10  ;;  %v4439_v10 = vmul.f32 %v4685_v7, %v6060_v29  ;;  %v4671_v29 = vld [vmem:[%s6283_s4 + $0x158] sm:$0xff] }
0x6060   :  { %v4478_v9 = vadd.f32 %v4477_v23, %v4476_v42  ;;  %v4291_v49 = vpop.permute.xlu1 %4290  ;;  %v4657_v42 = vld [vmem:[%s6283_s4 + $0xe8] sm:$0xff] }
0x6061   :  { %v4454_v35 = vadd.f32 %v4438_v6, %v4341_v36  ;;  %v4326_v12 = vmul.f32 %v4669_v27, %v4291_v49  ;;  %v4217_v32 = vmul.f32 %v4657_v42, %v6070_v46  ;;  %v4689_v27 = vld [vmem:[%s6283_s4 + $0x1e8] sm:$0xff]  ;;  %v4674_v6 = vld [vmem:[%s6283_s4 + $0x170] sm:$0xff]  ;;  %v4026_v46 = vld [vmem:[%s6283_s4 + $0x78] sm:$0xff] }
0x6062   :  { %v4443_v23 = vmul.f32 %v4689_v27, %v6075_v51  ;;  %v4675_v51 = vld [vmem:[%s6283_s4 + $0x178] sm:$0xff] }
0x6063   :  { %v4479_v48 = vsel %vm4463_vm5, %v4454_v35, 0.0  ;;  %v4342_v15 = vadd.f32 %v4326_v12, %v4229_v11  ;;  %v4659_v11 = vld [vmem:[%s6283_s4 + $0xf8] sm:$0xff]  ;;  %v4690_v35 = vld [vmem:[%s6283_s4 + $0x1f0] sm:$0xff] }
0x6064   :  { %v4480_v28 = vadd.f32 %v4479_v48, %v4478_v9  ;;  %v4295_v19 = vpop.permute.xlu1 %4294 }
0x6065   :  { %v4455_v40 = vadd.f32 %v4439_v10, %v4342_v15  ;;  %v4327_v24 = vmul.f32 %v4670_v22, %v4295_v19 }
0x6067   :  { %v4481_v34 = vsel %vm4463_vm5, %v4455_v40, 0.0  ;;  %v4343_v8 = vadd.f32 %v4327_v24, %v6018_v16  ;;  %v4688_v16 = vld [vmem:[%s6283_s4 + $0x1e0] sm:$0xff] }
0x6068   :  { %v4482_v38 = vadd.f32 %v4481_v34, %v4480_v28  ;;  %v4299_v20 = vpop.permute.xlu1 %4298  ;;  %v4442_v25 = vmul.f32 %v4688_v16, %v6072_v47  ;;  %v4673_v47 = vld [vmem:[%s6283_s4 + $0x168] sm:$0xff]  ;;  %v4691_v28 = vld [vmem:[%s6283_s4 + $0x1f8] sm:$0xff] }
0x6069   :  { %v4456_v21 = vadd.f32 %v4440_v0, %v4343_v8  ;;  %v4328_v50 = vmul.f32 %v4671_v29, %v4299_v20 }
0x606b   :  { %v4483_v44 = vsel %vm4463_vm5, %v4456_v21, 0.0  ;;  %v4344_v53 = vadd.f32 %v4328_v50, %v4231_v39  ;;  %v4462_v50 = vld [vmem:[%s6284_s5] sm:$0x1] }
0x606c   :  { %v4484_v54 = vadd.f32 %v4483_v44, %v4482_v38  ;;  %v4303_v56 = vpop.permute.xlu1 %4302 }
0x606d   :  { %v4457_v57 = vadd.f32 %v4441_v61, %v4344_v53  ;;  %v4329_v58 = vmul.f32 %v4672_v52, %v4303_v56 }
0x606f   :  { %v4485_v59 = vsel %vm4463_vm5, %v4457_v57, 0.0  ;;  %v4345_v41 = vadd.f32 %v4329_v58, %v6028_v31  ;;  %v4120_v31 = vmul.f32 %v4095_v55, %v4024_v2 }
0x6070   :  { %v4486_v26 = vadd.f32 %v4485_v59, %v4484_v54  ;;  %v4307_v62 = vpop.permute.xlu1 %4306 }
0x6071   :  { %v4458_v1 = vadd.f32 %v4442_v25, %v4345_v41  ;;  %v4330_v63 = vmul.f32 %v4673_v47, %v4307_v62  ;;  %v4233_v5 = vadd.f32 %v4217_v32, %v4120_v31 }
0x6073   :  { %v4487_v45 = vsel %vm4463_vm5, %v4458_v1, 0.0  ;;  %v4346_v4 = vadd.f32 %v4330_v63, %v4233_v5 }
0x6074   :  { %v4488_v60 = vadd.f32 %v4487_v45, %v4486_v26  ;;  %v4311_v3 = vpop.permute.xlu1 %4310 }
0x6075   :  { %v4459_v9 = vadd.f32 %v4443_v23, %v4346_v4  ;;  %v4331_v49 = vmul.f32 %v4674_v6, %v4311_v3 }
0x6077   :  { %v4489_v10 = vsel %vm4463_vm5, %v4459_v9, 0.0  ;;  %v4347_v48 = vadd.f32 %v4331_v49, %v6032_v37 }
0x6078   :  { %v4490_v18 = vadd.f32 %v4489_v10, %v4488_v60 }
0x60b1   :  { %v4105_v36 = vpop.permute.xlu0 %4104  ;;  %v4202_v7 = vpop.permute.xlu1 %4201 }
0x60b2   :  { %v4122_v12 = vmul.f32 %v4105_v36, %v4026_v46  ;;  %v4219_v14 = vmul.f32 %v4659_v11, %v4202_v7 }
0x60b4   :  { %v4235_v19 = vadd.f32 %v4219_v14, %v4122_v12 }
0x60b6   :  { %v4424_v43 = vpop.permute.xlu0 %4423  ;;  %v4315_v22 = vpop.permute.xlu1 %4314 }
0x60b7   :  { %v4444_v15 = vmul.f32 %v4690_v35, %v4424_v43  ;;  %v4332_v17 = vmul.f32 %v4675_v51, %v4315_v22 }
0x60b9   :  { %v4460_v33 = vadd.f32 %v4444_v15, %v4347_v48  ;;  %v4348_v30 = vadd.f32 %v4332_v17, %v4235_v19 }
0x60bb   :  { %v4491_v40 = vsel %vm4463_vm5, %v4460_v33, 0.0  ;;  %v4428_v24 = vpop.permute.xlu1 %4427 }
0x60bc   :  { %v4492_v29 = vadd.f32 %v4491_v40, %v4490_v18  ;;  %v4445_v0 = vmul.f32 %v4691_v28, %v4428_v24 }
0x60be   :  { %v4461_v34 = vadd.f32 %v4445_v0, %v4348_v30 }
0x60c0   :  { %v4493_v8 = vsel %vm4463_vm5, %v4461_v34, 0.0 }
0x60c1   :  { %v4494_v13 = vadd.f32 %v4493_v8, %v4492_v29 }
0x60c3   :  { %v4495_v37 = vrot.slane %v4494_v13, 4 }
0x60c5   :  { %v4496_v38 = vadd.f32 %v4495_v37, %v4494_v13 }
0x60c7   :  { %v4497_v20 = vrot.slane %v4496_v38, 2 }
0x60c9   :  { %v4498_v39 = vadd.f32 %v4497_v20, %v4496_v38 }
0x60cb   :  { %v4499_v21 = vrot.slane %v4498_v39, 1 }
0x60cd   :  { %v4500_v52 = vadd.f32 %v4499_v21, %v4498_v39 }
0x60cf   :  { %v4501_v61 = vadd.f32 %v4500_v52, %v4462_v50 }
0x60d1   :  { %vm4502_vm7 = vcmp.ge.f32.partialorder %v4501_v61, 0.0  ;;  %v4503_v44 = vmul.f32 0.01, %v4501_v61 }
0x60d3   :  { %v4504_v53 = vsel %vm4502_vm7, %v4501_v61, %v4503_v44 }
0x60d4   :  { %4506 = vst.msk [vmem:[%s6285_s6] sm:$0x1] %vm4505_vm6, %v4504_v53 }

</bundles_post_ra>
